<compile_context>
chip_gen: v7x
topology: tpu7x:2x2x1
jax: 0.10.0
libtpu: 0.0.40
codegen_flags: <defaults>
</compile_context>

<pallas_src>
import functools
import math

import jax
import jax.numpy as jnp
from jax import lax
from jax.experimental import pallas as pl
from jax.experimental.pallas import tpu as pltpu

_VMEM_BUDGET_BYTES = 16 * 1024 * 1024   # stated plan == compiler limit


# ----------------------------------------------------------------------------
# Pallas kernel: the full stacked bidirectional LSTM, resident in VMEM.
# ----------------------------------------------------------------------------
def _char_lstm_kernel(x_ref, wih_ref, whh_ref, b_ref, out_ref, gx_ref, *,
                      num_layers, num_dirs, hidden):
    # x_ref:   (T, B, U)         f32 layer-0 input, time-major, lane-padded to U
    # wih_ref: (L, U, nd*4H)     f32 input->gate weights (gate cols [i,f,o,g] per dir)
    # whh_ref: (L, nd*H, nd*4H)  f32 hidden->gate weights, block-diagonal over dirs
    # b_ref:   (L, 1, nd*4H)     f32 fused biases (b_ih + b_hh)
    # out_ref: (T, B, nd*H)      f32 output; also the inter-layer activation buffer
    # gx_ref:  (T, B, nd*4H)     f32 VMEM scratch for the hoisted input projection
    T, B, _ = x_ref.shape
    H = hidden
    G = 4 * H
    D = num_dirs * H

    for layer in range(num_layers):
        # ---- layer input: x for layer 0, previous layer's output (in out_ref) after.
        # The full input is consumed by the hoisted projection below BEFORE any store
        # of this layer touches out_ref, so reusing out_ref as the buffer is safe.
        xin = x_ref[...] if layer == 0 else out_ref[...]
        din = xin.shape[-1]

        # ---- hoisted input projection: one MXU matmul for every timestep and both
        # directions, bias fused; materialized into the gx scratch so the serialized
        # recurrence reads clean per-step full-vreg slices instead of holding ~16
        # vregs of gx live across the whole time loop.
        wih_l = wih_ref[layer][:din, :]                           # (din, nd*G)
        gx = jnp.dot(xin.reshape(T * B, din), wih_l,
                     preferred_element_type=jnp.float32) + b_ref[layer]
        gx_ref[...] = gx.reshape(T, B, num_dirs * G)

        whh_l = whh_ref[layer]                                    # (D, nd*G) blockdiag

        h_cat = jnp.zeros((B, D), jnp.float32)                    # [h_fwd | h_bwd]
        c = [jnp.zeros((B, H), jnp.float32) for _ in range(num_dirs)]

        # Fully-unrolled time loop (T small & static).  One block-diagonal matmul per
        # step produces both directions' recurrent gate contributions; the fwd chain
        # walks t, the bwd chain walks T-1-t (in-kernel time reversal, no HBM [::-1]).
        for t in range(T):
            hh = jnp.dot(h_cat, whh_l, preferred_element_type=jnp.float32)  # (B,nd*G)
            h_new = []
            for d in range(num_dirs):
                td = t if d == 0 else T - 1 - t
                gates = gx_ref[td, :, d * G:(d + 1) * G] + hh[:, d * G:(d + 1) * G]
                # gate lane order: [i | f | o | g]; sigmoid(x) = 0.5*tanh(0.5*x)+0.5
                sig = 0.5 * jnp.tanh(0.5 * gates[:, 0:3 * H]) + 0.5
                g_g = jnp.tanh(gates[:, 3 * H:4 * H])
                i_g = sig[:, 0 * H:1 * H]
                f_g = sig[:, 1 * H:2 * H]
                o_g = sig[:, 2 * H:3 * H]
                c[d] = f_g * c[d] + i_g * g_g
                h_d = o_g * jnp.tanh(c[d])
                # Direct per-step store into the output/activation buffer.
                out_ref[td, :, d * H:(d + 1) * H] = h_d
                h_new.append(h_d)
            h_cat = h_new[0] if num_dirs == 1 else jnp.concatenate(h_new, axis=-1)


# ----------------------------------------------------------------------------
# CharLSTM forward (stacked, bidirectional) — single pallas_call.
# ----------------------------------------------------------------------------
def char_lstm_forward(x, length, params, *, hidden, num_dirs):
    """x: (B, T, I) batch_first. `length` is accepted but unused, exactly like the
    PyTorch module (it runs the LSTM over the full padded sequence)."""
    del length
    wih_s, whh_s, b_s = params
    L, U, _ = wih_s.shape
    H, nd = hidden, num_dirs
    D, G = nd * H, 4 * H
    B, T, I = x.shape

    # Pad the batch once to a full 8-sublane tile (every load / MXU LHS / store in the
    # kernel is then unmasked) and lane-pad the layer-0 input to the packed weight
    # width U. Padded rows/lanes are zeros, independent, and sliced off at the end.
    B_pad = max(8, ((B + 7) // 8) * 8)
    x_tm = jnp.transpose(x, (1, 0, 2)).astype(jnp.float32)            # (T, B, I)
    x_tm = jnp.pad(x_tm, ((0, 0), (0, B_pad - B), (0, U - I)))

    # All-resident-in-VMEM plan; the stated budget equals the compiler limit.
    approx_vmem = 4 * (x_tm.size + wih_s.size + whh_s.size + b_s.size
                       + T * B_pad * D              # output / inter-layer buffer
                       + T * B_pad * nd * G)        # gx scratch
    # TODO(synk): for long sequences / large batch / hidden, chunk T through a grid
    # axis (h/c carried in VMEM scratch) and size the resident chunk against v7x's
    # 64 MiB physical VMEM rather than v5e/v6e's 128 MiB.
    assert approx_vmem < _VMEM_BUDGET_BYTES, approx_vmem

    vmem = pl.BlockSpec(memory_space=pltpu.MemorySpace.VMEM)
    out = pl.pallas_call(
        functools.partial(_char_lstm_kernel, num_layers=L, num_dirs=nd, hidden=H),
        out_shape=jax.ShapeDtypeStruct((T, B_pad, D), jnp.float32),
        in_specs=[vmem, vmem, vmem, vmem],
        out_specs=vmem,
        scratch_shapes=[pltpu.VMEM((T, B_pad, nd * G), jnp.float32)],
        compiler_params=pltpu.CompilerParams(vmem_limit_bytes=_VMEM_BUDGET_BYTES),
    )(x_tm, wih_s, whh_s, b_s)
    # TODO(synk): on v7x, a direction-parallel grid axis could use both TensorCores,
    # but it forgoes the whole-stack fusion above; at these tiny dims fusion wins.
    return jnp.transpose(out, (1, 0, 2))[:B]


# ----------------------------------------------------------------------------
# Pure-JAX reference (PyTorch LSTM math in f32, same packed weights).
# ----------------------------------------------------------------------------
def char_lstm_ref(x, params, hidden, num_dirs):
    wih_s, whh_s, b_s = params
    H, nd = hidden, num_dirs
    G = 4 * H
    L = wih_s.shape[0]
    cur = jnp.transpose(x, (1, 0, 2)).astype(jnp.float32)              # (T, B, I)
    T, B, _ = cur.shape
    for l in range(L):
        in_size = cur.shape[-1]
        outs = []
        for d in range(nd):
            wih_d = wih_s[l, :in_size, d * G:(d + 1) * G]              # (in, 4H)
            whh_d = whh_s[l, d * H:(d + 1) * H, d * G:(d + 1) * G]     # (H, 4H)
            b_d = b_s[l, 0, d * G:(d + 1) * G]                         # (4H,)
            xs = cur if d == 0 else cur[::-1]

            def step(carry, x_t, wih_d=wih_d, whh_d=whh_d, b_d=b_d):
                h, c = carry
                gates = (jnp.dot(x_t, wih_d, preferred_element_type=jnp.float32)
                         + b_d) + jnp.dot(h, whh_d, preferred_element_type=jnp.float32)
                i_g = jax.nn.sigmoid(gates[:, 0 * H:1 * H])
                f_g = jax.nn.sigmoid(gates[:, 1 * H:2 * H])
                o_g = jax.nn.sigmoid(gates[:, 2 * H:3 * H])
                g_g = jnp.tanh(gates[:, 3 * H:4 * H])
                c = f_g * c + i_g * g_g
                h = o_g * jnp.tanh(c)
                return (h, c), h

            init = (jnp.zeros((B, H), jnp.float32), jnp.zeros((B, H), jnp.float32))
            _, ys = lax.scan(step, init, xs)
            if d == 1:
                ys = ys[::-1]
            outs.append(ys)
        cur = jnp.concatenate(outs, axis=-1)
    return jnp.transpose(cur, (1, 0, 2))


# ----------------------------------------------------------------------------
# Deterministic parameter init (shapes/init match nn.LSTM), packed for the kernel:
#   wih: (L, U, nd*4H)      gate columns reordered to [i, f, o, g], dirs concatenated
#   whh: (L, nd*H, nd*4H)   block-diagonal over directions
#   b:   (L, 1, nd*4H)      b_ih + b_hh fused
# ----------------------------------------------------------------------------
def init_params(key, input_size, hidden, num_layers, bidirectional):
    nd = 2 if bidirectional else 1
    H, G, D = hidden, 4 * hidden, (2 if bidirectional else 1) * hidden
    U = max(input_size, D)                         # uniform packed input width
    bound = 1.0 / math.sqrt(H)
    # PyTorch gate row order is [i, f, g, o]; repack columns to [i, f, o, g].
    perm = jnp.concatenate([jnp.arange(0, 2 * H), jnp.arange(3 * H, 4 * H),
                            jnp.arange(2 * H, 3 * H)])
    wih_list, whh_list, b_list = [], [], []
    for layer in range(num_layers):
        in_size = input_size if layer == 0 else D
        wih_l = jnp.zeros((U, nd * G), jnp.float32)
        whh_l = jnp.zeros((D, nd * G), jnp.float32)
        b_l = jnp.zeros((1, nd * G), jnp.float32)
        for d in range(nd):
            key, k1, k2, k3, k4 = jax.random.split(key, 5)
            w_ih = jax.random.uniform(k1, (4 * H, in_size), jnp.float32, -bound, bound)
            w_hh = jax.random.uniform(k2, (4 * H, H), jnp.float32, -bound, bound)
            b_ih = jax.random.uniform(k3, (4 * H,), jnp.float32, -bound, bound)
            b_hh = jax.random.uniform(k4, (4 * H,), jnp.float32, -bound, bound)
            wih_l = wih_l.at[:in_size, d * G:(d + 1) * G].set(w_ih.T[:, perm])
            whh_l = whh_l.at[d * H:(d + 1) * H, d * G:(d + 1) * G].set(w_hh.T[:, perm])
            b_l = b_l.at[0, d * G:(d + 1) * G].set((b_ih + b_hh)[perm])
        wih_list.append(wih_l)
        whh_list.append(whh_l)
        b_list.append(b_l)
    return (jnp.stack(wih_list), jnp.stack(whh_list), jnp.stack(b_list))


if __name__ == "__main__":
    # config: cnn_features=64 -> input = hidden = 32, lstm_layers=2, bidirectional=True
    config = {"cnn_features": 64, "lstm_layers": 2, "lstm_bidirectional": True}
    hidden = config["cnn_features"] // 2
    num_layers = config["lstm_layers"]
    bidirectional = config["lstm_bidirectional"]
    num_dirs = 2 if bidirectional else 1

    B, T = 2, 8
    key = jax.random.PRNGKey(0)
    kx, kp = jax.random.split(key)
    x = jax.random.normal(kx, (B, T, hidden), jnp.float32)
    length = jnp.full((B,), T, jnp.int32)   # ignored by the forward, as in PyTorch

    params = init_params(kp, hidden, hidden, num_layers, bidirectional)

    fwd = functools.partial(char_lstm_forward, params=params,
                            hidden=hidden, num_dirs=num_dirs)
    out = jax.block_until_ready(jax.jit(fwd)(x, length))
    assert out.shape == (B, T, hidden * num_dirs), out.shape

    # Semantic check: full-f32 LSTM math (PyTorch semantics, same packed weights).
    ref = char_lstm_ref(x, params, hidden, num_dirs)
    err = float(jnp.max(jnp.abs(out - ref)))
    assert err < 1e-3, err

    print("KERNEL_OK")
</pallas_src>

<mosaic_0001>
module attributes {stable_mosaic.version = 11 : i64} {
  func.func @_char_lstm_kernel(%arg0: memref<8x8x64xf32, #tpu.memory_space<vmem>>, %arg1: memref<2x64x256xf32, #tpu.memory_space<vmem>>, %arg2: memref<2x64x256xf32, #tpu.memory_space<vmem>>, %arg3: memref<2x1x256xf32, #tpu.memory_space<vmem>>, %arg4: memref<8x8x64xf32, #tpu.memory_space<vmem>>, %arg5: memref<8x8x256xf32, #tpu.memory_space<vmem>>) attributes {dimension_semantics = [], scalar_prefetch = 0 : i64, scratch_operands = 1 : i64, tpu.core_type = #tpu.core_type<tc>} {
    %c0 = arith.constant 0 : index
    %c0_0 = arith.constant 0 : index
    %c0_1 = arith.constant 0 : index
    %0 = vector.load %arg0[%c0, %c0_0, %c0_1] : memref<8x8x64xf32, #tpu.memory_space<vmem>>, vector<8x8x64xf32>
    %c0_2 = arith.constant 0 : index
    %c0_3 = arith.constant 0 : index
    %c0_4 = arith.constant 0 : index
    %1 = vector.load %arg1[%c0_2, %c0_3, %c0_4] : memref<2x64x256xf32, #tpu.memory_space<vmem>>, vector<1x64x256xf32>
    %2 = vector.shape_cast %1 : vector<1x64x256xf32> to vector<64x256xf32>
    %3 = vector.shape_cast %0 : vector<8x8x64xf32> to vector<64x64xf32>
    %cst = arith.constant dense<0.000000e+00> : vector<64x256xf32>
    %4 = tpu.matmul %3, %2, %cst {dimension_numbers = #tpu.dot_dimension_numbers<[1], [0], [0], [1], [0, 0, 1, 1], [], []>} : vector<64x64xf32>, vector<64x256xf32>, vector<64x256xf32> -> vector<64x256xf32>
    %c0_5 = arith.constant 0 : index
    %c0_6 = arith.constant 0 : index
    %c0_7 = arith.constant 0 : index
    %5 = vector.load %arg3[%c0_5, %c0_6, %c0_7] : memref<2x1x256xf32, #tpu.memory_space<vmem>>, vector<1x1x256xf32>
    %6 = vector.shape_cast %5 : vector<1x1x256xf32> to vector<1x256xf32>
    %7 = vector.broadcast %6 : vector<1x256xf32> to vector<64x256xf32>
    %8 = arith.addf %4, %7 : vector<64x256xf32>
    %9 = vector.shape_cast %8 : vector<64x256xf32> to vector<8x8x256xf32>
    %c0_8 = arith.constant 0 : index
    %c0_9 = arith.constant 0 : index
    %c0_10 = arith.constant 0 : index
    %10 = vector.load %arg5[%c0_8, %c0_9, %c0_10] : memref<8x8x256xf32, #tpu.memory_space<vmem>>, vector<8x8x256xf32>
    tpu.vector_store %arg5[%c0_8, %c0_9, %c0_10], %9 {strides = array<i32>} : memref<8x8x256xf32, #tpu.memory_space<vmem>>, vector<8x8x256xf32>,
    %c0_11 = arith.constant 0 : index
    %c0_12 = arith.constant 0 : index
    %c0_13 = arith.constant 0 : index
    %11 = vector.load %arg2[%c0_11, %c0_12, %c0_13] : memref<2x64x256xf32, #tpu.memory_space<vmem>>, vector<1x64x256xf32>
    %12 = vector.shape_cast %11 : vector<1x64x256xf32> to vector<64x256xf32>
    %cst_14 = arith.constant 0.000000e+00 : f32
    %13 = vector.broadcast %cst_14 : f32 to vector<8x64xf32>
    %cst_15 = arith.constant 0.000000e+00 : f32
    %14 = vector.broadcast %cst_15 : f32 to vector<8x32xf32>
    %cst_16 = arith.constant 0.000000e+00 : f32
    %15 = vector.broadcast %cst_16 : f32 to vector<8x32xf32>
    %cst_17 = arith.constant dense<0.000000e+00> : vector<8x256xf32>
    %16 = tpu.matmul %13, %12, %cst_17 {dimension_numbers = #tpu.dot_dimension_numbers<[1], [0], [0], [1], [0, 0, 1, 1], [], []>} : vector<8x64xf32>, vector<64x256xf32>, vector<8x256xf32> -> vector<8x256xf32>
    %c0_18 = arith.constant 0 : index
    %c0_19 = arith.constant 0 : index
    %c0_20 = arith.constant 0 : index
    %17 = vector.load %arg5[%c0_18, %c0_19, %c0_20] : memref<8x8x256xf32, #tpu.memory_space<vmem>>, vector<1x8x128xf32>
    %18 = vector.shape_cast %17 : vector<1x8x128xf32> to vector<8x128xf32>
    %19 = vector.extract_strided_slice %16 {offsets = [0, 0], sizes = [8, 128], strides = [1, 1]} : vector<8x256xf32> to vector<8x128xf32>
    %20 = arith.addf %18, %19 : vector<8x128xf32>
    %21 = vector.extract_strided_slice %20 {offsets = [0, 0], sizes = [8, 96], strides = [1, 1]} : vector<8x128xf32> to vector<8x96xf32>
    %cst_21 = arith.constant 5.000000e-01 : f32
    %22 = vector.broadcast %cst_21 : f32 to vector<8x96xf32>
    %23 = arith.mulf %22, %21 : vector<8x96xf32>
    %24 = math.tanh %23 : vector<8x96xf32>
    %cst_22 = arith.constant 5.000000e-01 : f32
    %25 = vector.broadcast %cst_22 : f32 to vector<8x96xf32>
    %26 = arith.mulf %25, %24 : vector<8x96xf32>
    %cst_23 = arith.constant 5.000000e-01 : f32
    %27 = vector.broadcast %cst_23 : f32 to vector<8x96xf32>
    %28 = arith.addf %26, %27 : vector<8x96xf32>
    %29 = vector.extract_strided_slice %20 {offsets = [0, 96], sizes = [8, 32], strides = [1, 1]} : vector<8x128xf32> to vector<8x32xf32>
    %30 = math.tanh %29 : vector<8x32xf32>
    %31 = vector.extract_strided_slice %28 {offsets = [0, 0], sizes = [8, 32], strides = [1, 1]} : vector<8x96xf32> to vector<8x32xf32>
    %32 = vector.extract_strided_slice %28 {offsets = [0, 32], sizes = [8, 32], strides = [1, 1]} : vector<8x96xf32> to vector<8x32xf32>
    %33 = vector.extract_strided_slice %28 {offsets = [0, 64], sizes = [8, 32], strides = [1, 1]} : vector<8x96xf32> to vector<8x32xf32>
    %34 = arith.mulf %32, %14 : vector<8x32xf32>
    %35 = arith.mulf %31, %30 : vector<8x32xf32>
    %36 = arith.addf %34, %35 : vector<8x32xf32>
    %37 = math.tanh %36 : vector<8x32xf32>
    %38 = arith.mulf %33, %37 : vector<8x32xf32>
    %c0_24 = arith.constant 0 : index
    %c0_25 = arith.constant 0 : index
    %c0_26 = arith.constant 0 : index
    %39 = vector.load %arg4[%c0_24, %c0_25, %c0_26] : memref<8x8x64xf32, #tpu.memory_space<vmem>>, vector<1x8x32xf32>
    %40 = vector.shape_cast %39 : vector<1x8x32xf32> to vector<8x32xf32>
    %41 = vector.shape_cast %38 : vector<8x32xf32> to vector<1x8x32xf32>
    tpu.vector_store %arg4[%c0_24, %c0_25, %c0_26], %41 {strides = array<i32>} : memref<8x8x64xf32, #tpu.memory_space<vmem>>, vector<1x8x32xf32>,
    %c7 = arith.constant 7 : index
    %c0_27 = arith.constant 0 : index
    %c128 = arith.constant 128 : index
    %42 = vector.load %arg5[%c7, %c0_27, %c128] : memref<8x8x256xf32, #tpu.memory_space<vmem>>, vector<1x8x128xf32>
    %43 = vector.shape_cast %42 : vector<1x8x128xf32> to vector<8x128xf32>
    %44 = vector.extract_strided_slice %16 {offsets = [0, 128], sizes = [8, 128], strides = [1, 1]} : vector<8x256xf32> to vector<8x128xf32>
    %45 = arith.addf %43, %44 : vector<8x128xf32>
    %46 = vector.extract_strided_slice %45 {offsets = [0, 0], sizes = [8, 96], strides = [1, 1]} : vector<8x128xf32> to vector<8x96xf32>
    %cst_28 = arith.constant 5.000000e-01 : f32
    %47 = vector.broadcast %cst_28 : f32 to vector<8x96xf32>
    %48 = arith.mulf %47, %46 : vector<8x96xf32>
    %49 = math.tanh %48 : vector<8x96xf32>
    %cst_29 = arith.constant 5.000000e-01 : f32
    %50 = vector.broadcast %cst_29 : f32 to vector<8x96xf32>
    %51 = arith.mulf %50, %49 : vector<8x96xf32>
    %cst_30 = arith.constant 5.000000e-01 : f32
    %52 = vector.broadcast %cst_30 : f32 to vector<8x96xf32>
    %53 = arith.addf %51, %52 : vector<8x96xf32>
    %54 = vector.extract_strided_slice %45 {offsets = [0, 96], sizes = [8, 32], strides = [1, 1]} : vector<8x128xf32> to vector<8x32xf32>
    %55 = math.tanh %54 : vector<8x32xf32>
    %56 = vector.extract_strided_slice %53 {offsets = [0, 0], sizes = [8, 32], strides = [1, 1]} : vector<8x96xf32> to vector<8x32xf32>
    %57 = vector.extract_strided_slice %53 {offsets = [0, 32], sizes = [8, 32], strides = [1, 1]} : vector<8x96xf32> to vector<8x32xf32>
    %58 = vector.extract_strided_slice %53 {offsets = [0, 64], sizes = [8, 32], strides = [1, 1]} : vector<8x96xf32> to vector<8x32xf32>
    %59 = arith.mulf %57, %15 : vector<8x32xf32>
    %60 = arith.mulf %56, %55 : vector<8x32xf32>
    %61 = arith.addf %59, %60 : vector<8x32xf32>
    %62 = math.tanh %61 : vector<8x32xf32>
    %63 = arith.mulf %58, %62 : vector<8x32xf32>
    %c7_31 = arith.constant 7 : index
    %c0_32 = arith.constant 0 : index
    %c32 = arith.constant 32 : index
    %64 = vector.load %arg4[%c7_31, %c0_32, %c32] : memref<8x8x64xf32, #tpu.memory_space<vmem>>, vector<1x8x32xf32>
    %65 = vector.shape_cast %64 : vector<1x8x32xf32> to vector<8x32xf32>
    %66 = vector.shape_cast %63 : vector<8x32xf32> to vector<1x8x32xf32>
    tpu.vector_store %arg4[%c7_31, %c0_32, %c32], %66 {strides = array<i32>} : memref<8x8x64xf32, #tpu.memory_space<vmem>>, vector<1x8x32xf32>,
    %67 = tpu.concatenate %38, %63 in 1 : vector<8x32xf32>, vector<8x32xf32> -> vector<8x64xf32>
    %cst_33 = arith.constant dense<0.000000e+00> : vector<8x256xf32>
    %68 = tpu.matmul %67, %12, %cst_33 {dimension_numbers = #tpu.dot_dimension_numbers<[1], [0], [0], [1], [0, 0, 1, 1], [], []>} : vector<8x64xf32>, vector<64x256xf32>, vector<8x256xf32> -> vector<8x256xf32>
    %c1 = arith.constant 1 : index
    %c0_34 = arith.constant 0 : index
    %c0_35 = arith.constant 0 : index
    %69 = vector.load %arg5[%c1, %c0_34, %c0_35] : memref<8x8x256xf32, #tpu.memory_space<vmem>>, vector<1x8x128xf32>
    %70 = vector.shape_cast %69 : vector<1x8x128xf32> to vector<8x128xf32>
    %71 = vector.extract_strided_slice %68 {offsets = [0, 0], sizes = [8, 128], strides = [1, 1]} : vector<8x256xf32> to vector<8x128xf32>
    %72 = arith.addf %70, %71 : vector<8x128xf32>
    %73 = vector.extract_strided_slice %72 {offsets = [0, 0], sizes = [8, 96], strides = [1, 1]} : vector<8x128xf32> to vector<8x96xf32>
    %cst_36 = arith.constant 5.000000e-01 : f32
    %74 = vector.broadcast %cst_36 : f32 to vector<8x96xf32>
    %75 = arith.mulf %74, %73 : vector<8x96xf32>
    %76 = math.tanh %75 : vector<8x96xf32>
    %cst_37 = arith.constant 5.000000e-01 : f32
    %77 = vector.broadcast %cst_37 : f32 to vector<8x96xf32>
    %78 = arith.mulf %77, %76 : vector<8x96xf32>
    %cst_38 = arith.constant 5.000000e-01 : f32
    %79 = vector.broadcast %cst_38 : f32 to vector<8x96xf32>
    %80 = arith.addf %78, %79 : vector<8x96xf32>
    %81 = vector.extract_strided_slice %72 {offsets = [0, 96], sizes = [8, 32], strides = [1, 1]} : vector<8x128xf32> to vector<8x32xf32>
    %82 = math.tanh %81 : vector<8x32xf32>
    %83 = vector.extract_strided_slice %80 {offsets = [0, 0], sizes = [8, 32], strides = [1, 1]} : vector<8x96xf32> to vector<8x32xf32>
    %84 = vector.extract_strided_slice %80 {offsets = [0, 32], sizes = [8, 32], strides = [1, 1]} : vector<8x96xf32> to vector<8x32xf32>
    %85 = vector.extract_strided_slice %80 {offsets = [0, 64], sizes = [8, 32], strides = [1, 1]} : vector<8x96xf32> to vector<8x32xf32>
    %86 = arith.mulf %84, %36 : vector<8x32xf32>
    %87 = arith.mulf %83, %82 : vector<8x32xf32>
    %88 = arith.addf %86, %87 : vector<8x32xf32>
    %89 = math.tanh %88 : vector<8x32xf32>
    %90 = arith.mulf %85, %89 : vector<8x32xf32>
    %c1_39 = arith.constant 1 : index
    %c0_40 = arith.constant 0 : index
    %c0_41 = arith.constant 0 : index
    %91 = vector.load %arg4[%c1_39, %c0_40, %c0_41] : memref<8x8x64xf32, #tpu.memory_space<vmem>>, vector<1x8x32xf32>
    %92 = vector.shape_cast %91 : vector<1x8x32xf32> to vector<8x32xf32>
    %93 = vector.shape_cast %90 : vector<8x32xf32> to vector<1x8x32xf32>
    tpu.vector_store %arg4[%c1_39, %c0_40, %c0_41], %93 {strides = array<i32>} : memref<8x8x64xf32, #tpu.memory_space<vmem>>, vector<1x8x32xf32>,
    %c6 = arith.constant 6 : index
    %c0_42 = arith.constant 0 : index
    %c128_43 = arith.constant 128 : index
    %94 = vector.load %arg5[%c6, %c0_42, %c128_43] : memref<8x8x256xf32, #tpu.memory_space<vmem>>, vector<1x8x128xf32>
    %95 = vector.shape_cast %94 : vector<1x8x128xf32> to vector<8x128xf32>
    %96 = vector.extract_strided_slice %68 {offsets = [0, 128], sizes = [8, 128], strides = [1, 1]} : vector<8x256xf32> to vector<8x128xf32>
    %97 = arith.addf %95, %96 : vector<8x128xf32>
    %98 = vector.extract_strided_slice %97 {offsets = [0, 0], sizes = [8, 96], strides = [1, 1]} : vector<8x128xf32> to vector<8x96xf32>
    %cst_44 = arith.constant 5.000000e-01 : f32
    %99 = vector.broadcast %cst_44 : f32 to vector<8x96xf32>
    %100 = arith.mulf %99, %98 : vector<8x96xf32>
    %101 = math.tanh %100 : vector<8x96xf32>
    %cst_45 = arith.constant 5.000000e-01 : f32
    %102 = vector.broadcast %cst_45 : f32 to vector<8x96xf32>
    %103 = arith.mulf %102, %101 : vector<8x96xf32>
    %cst_46 = arith.constant 5.000000e-01 : f32
    %104 = vector.broadcast %cst_46 : f32 to vector<8x96xf32>
    %105 = arith.addf %103, %104 : vector<8x96xf32>
    %106 = vector.extract_strided_slice %97 {offsets = [0, 96], sizes = [8, 32], strides = [1, 1]} : vector<8x128xf32> to vector<8x32xf32>
    %107 = math.tanh %106 : vector<8x32xf32>
    %108 = vector.extract_strided_slice %105 {offsets = [0, 0], sizes = [8, 32], strides = [1, 1]} : vector<8x96xf32> to vector<8x32xf32>
    %109 = vector.extract_strided_slice %105 {offsets = [0, 32], sizes = [8, 32], strides = [1, 1]} : vector<8x96xf32> to vector<8x32xf32>
    %110 = vector.extract_strided_slice %105 {offsets = [0, 64], sizes = [8, 32], strides = [1, 1]} : vector<8x96xf32> to vector<8x32xf32>
    %111 = arith.mulf %109, %61 : vector<8x32xf32>
    %112 = arith.mulf %108, %107 : vector<8x32xf32>
    %113 = arith.addf %111, %112 : vector<8x32xf32>
    %114 = math.tanh %113 : vector<8x32xf32>
    %115 = arith.mulf %110, %114 : vector<8x32xf32>
    %c6_47 = arith.constant 6 : index
    %c0_48 = arith.constant 0 : index
    %c32_49 = arith.constant 32 : index
    %116 = vector.load %arg4[%c6_47, %c0_48, %c32_49] : memref<8x8x64xf32, #tpu.memory_space<vmem>>, vector<1x8x32xf32>
    %117 = vector.shape_cast %116 : vector<1x8x32xf32> to vector<8x32xf32>
    %118 = vector.shape_cast %115 : vector<8x32xf32> to vector<1x8x32xf32>
    tpu.vector_store %arg4[%c6_47, %c0_48, %c32_49], %118 {strides = array<i32>} : memref<8x8x64xf32, #tpu.memory_space<vmem>>, vector<1x8x32xf32>,
    %119 = tpu.concatenate %90, %115 in 1 : vector<8x32xf32>, vector<8x32xf32> -> vector<8x64xf32>
    %cst_50 = arith.constant dense<0.000000e+00> : vector<8x256xf32>
    %120 = tpu.matmul %119, %12, %cst_50 {dimension_numbers = #tpu.dot_dimension_numbers<[1], [0], [0], [1], [0, 0, 1, 1], [], []>} : vector<8x64xf32>, vector<64x256xf32>, vector<8x256xf32> -> vector<8x256xf32>
    %c2 = arith.constant 2 : index
    %c0_51 = arith.constant 0 : index
    %c0_52 = arith.constant 0 : index
    %121 = vector.load %arg5[%c2, %c0_51, %c0_52] : memref<8x8x256xf32, #tpu.memory_space<vmem>>, vector<1x8x128xf32>
    %122 = vector.shape_cast %121 : vector<1x8x128xf32> to vector<8x128xf32>
    %123 = vector.extract_strided_slice %120 {offsets = [0, 0], sizes = [8, 128], strides = [1, 1]} : vector<8x256xf32> to vector<8x128xf32>
    %124 = arith.addf %122, %123 : vector<8x128xf32>
    %125 = vector.extract_strided_slice %124 {offsets = [0, 0], sizes = [8, 96], strides = [1, 1]} : vector<8x128xf32> to vector<8x96xf32>
    %cst_53 = arith.constant 5.000000e-01 : f32
    %126 = vector.broadcast %cst_53 : f32 to vector<8x96xf32>
    %127 = arith.mulf %126, %125 : vector<8x96xf32>
    %128 = math.tanh %127 : vector<8x96xf32>
    %cst_54 = arith.constant 5.000000e-01 : f32
    %129 = vector.broadcast %cst_54 : f32 to vector<8x96xf32>
    %130 = arith.mulf %129, %128 : vector<8x96xf32>
    %cst_55 = arith.constant 5.000000e-01 : f32
    %131 = vector.broadcast %cst_55 : f32 to vector<8x96xf32>
    %132 = arith.addf %130, %131 : vector<8x96xf32>
    %133 = vector.extract_strided_slice %124 {offsets = [0, 96], sizes = [8, 32], strides = [1, 1]} : vector<8x128xf32> to vector<8x32xf32>
    %134 = math.tanh %133 : vector<8x32xf32>
    %135 = vector.extract_strided_slice %132 {offsets = [0, 0], sizes = [8, 32], strides = [1, 1]} : vector<8x96xf32> to vector<8x32xf32>
    %136 = vector.extract_strided_slice %132 {offsets = [0, 32], sizes = [8, 32], strides = [1, 1]} : vector<8x96xf32> to vector<8x32xf32>
    %137 = vector.extract_strided_slice %132 {offsets = [0, 64], sizes = [8, 32], strides = [1, 1]} : vector<8x96xf32> to vector<8x32xf32>
    %138 = arith.mulf %136, %88 : vector<8x32xf32>
    %139 = arith.mulf %135, %134 : vector<8x32xf32>
    %140 = arith.addf %138, %139 : vector<8x32xf32>
    %141 = math.tanh %140 : vector<8x32xf32>
    %142 = arith.mulf %137, %141 : vector<8x32xf32>
    %c2_56 = arith.constant 2 : index
    %c0_57 = arith.constant 0 : index
    %c0_58 = arith.constant 0 : index
    %143 = vector.load %arg4[%c2_56, %c0_57, %c0_58] : memref<8x8x64xf32, #tpu.memory_space<vmem>>, vector<1x8x32xf32>
    %144 = vector.shape_cast %143 : vector<1x8x32xf32> to vector<8x32xf32>
    %145 = vector.shape_cast %142 : vector<8x32xf32> to vector<1x8x32xf32>
    tpu.vector_store %arg4[%c2_56, %c0_57, %c0_58], %145 {strides = array<i32>} : memref<8x8x64xf32, #tpu.memory_space<vmem>>, vector<1x8x32xf32>,
    %c5 = arith.constant 5 : index
    %c0_59 = arith.constant 0 : index
    %c128_60 = arith.constant 128 : index
    %146 = vector.load %arg5[%c5, %c0_59, %c128_60] : memref<8x8x256xf32, #tpu.memory_space<vmem>>, vector<1x8x128xf32>
    %147 = vector.shape_cast %146 : vector<1x8x128xf32> to vector<8x128xf32>
    %148 = vector.extract_strided_slice %120 {offsets = [0, 128], sizes = [8, 128], strides = [1, 1]} : vector<8x256xf32> to vector<8x128xf32>
    %149 = arith.addf %147, %148 : vector<8x128xf32>
    %150 = vector.extract_strided_slice %149 {offsets = [0, 0], sizes = [8, 96], strides = [1, 1]} : vector<8x128xf32> to vector<8x96xf32>
    %cst_61 = arith.constant 5.000000e-01 : f32
    %151 = vector.broadcast %cst_61 : f32 to vector<8x96xf32>
    %152 = arith.mulf %151, %150 : vector<8x96xf32>
    %153 = math.tanh %152 : vector<8x96xf32>
    %cst_62 = arith.constant 5.000000e-01 : f32
    %154 = vector.broadcast %cst_62 : f32 to vector<8x96xf32>
    %155 = arith.mulf %154, %153 : vector<8x96xf32>
    %cst_63 = arith.constant 5.000000e-01 : f32
    %156 = vector.broadcast %cst_63 : f32 to vector<8x96xf32>
    %157 = arith.addf %155, %156 : vector<8x96xf32>
    %158 = vector.extract_strided_slice %149 {offsets = [0, 96], sizes = [8, 32], strides = [1, 1]} : vector<8x128xf32> to vector<8x32xf32>
    %159 = math.tanh %158 : vector<8x32xf32>
    %160 = vector.extract_strided_slice %157 {offsets = [0, 0], sizes = [8, 32], strides = [1, 1]} : vector<8x96xf32> to vector<8x32xf32>
    %161 = vector.extract_strided_slice %157 {offsets = [0, 32], sizes = [8, 32], strides = [1, 1]} : vector<8x96xf32> to vector<8x32xf32>
    %162 = vector.extract_strided_slice %157 {offsets = [0, 64], sizes = [8, 32], strides = [1, 1]} : vector<8x96xf32> to vector<8x32xf32>
    %163 = arith.mulf %161, %113 : vector<8x32xf32>
    %164 = arith.mulf %160, %159 : vector<8x32xf32>
    %165 = arith.addf %163, %164 : vector<8x32xf32>
    %166 = math.tanh %165 : vector<8x32xf32>
    %167 = arith.mulf %162, %166 : vector<8x32xf32>
    %c5_64 = arith.constant 5 : index
    %c0_65 = arith.constant 0 : index
    %c32_66 = arith.constant 32 : index
    %168 = vector.load %arg4[%c5_64, %c0_65, %c32_66] : memref<8x8x64xf32, #tpu.memory_space<vmem>>, vector<1x8x32xf32>
    %169 = vector.shape_cast %168 : vector<1x8x32xf32> to vector<8x32xf32>
    %170 = vector.shape_cast %167 : vector<8x32xf32> to vector<1x8x32xf32>
    tpu.vector_store %arg4[%c5_64, %c0_65, %c32_66], %170 {strides = array<i32>} : memref<8x8x64xf32, #tpu.memory_space<vmem>>, vector<1x8x32xf32>,
    %171 = tpu.concatenate %142, %167 in 1 : vector<8x32xf32>, vector<8x32xf32> -> vector<8x64xf32>
    %cst_67 = arith.constant dense<0.000000e+00> : vector<8x256xf32>
    %172 = tpu.matmul %171, %12, %cst_67 {dimension_numbers = #tpu.dot_dimension_numbers<[1], [0], [0], [1], [0, 0, 1, 1], [], []>} : vector<8x64xf32>, vector<64x256xf32>, vector<8x256xf32> -> vector<8x256xf32>
    %c3 = arith.constant 3 : index
    %c0_68 = arith.constant 0 : index
    %c0_69 = arith.constant 0 : index
    %173 = vector.load %arg5[%c3, %c0_68, %c0_69] : memref<8x8x256xf32, #tpu.memory_space<vmem>>, vector<1x8x128xf32>
    %174 = vector.shape_cast %173 : vector<1x8x128xf32> to vector<8x128xf32>
    %175 = vector.extract_strided_slice %172 {offsets = [0, 0], sizes = [8, 128], strides = [1, 1]} : vector<8x256xf32> to vector<8x128xf32>
    %176 = arith.addf %174, %175 : vector<8x128xf32>
    %177 = vector.extract_strided_slice %176 {offsets = [0, 0], sizes = [8, 96], strides = [1, 1]} : vector<8x128xf32> to vector<8x96xf32>
    %cst_70 = arith.constant 5.000000e-01 : f32
    %178 = vector.broadcast %cst_70 : f32 to vector<8x96xf32>
    %179 = arith.mulf %178, %177 : vector<8x96xf32>
    %180 = math.tanh %179 : vector<8x96xf32>
    %cst_71 = arith.constant 5.000000e-01 : f32
    %181 = vector.broadcast %cst_71 : f32 to vector<8x96xf32>
    %182 = arith.mulf %181, %180 : vector<8x96xf32>
    %cst_72 = arith.constant 5.000000e-01 : f32
    %183 = vector.broadcast %cst_72 : f32 to vector<8x96xf32>
    %184 = arith.addf %182, %183 : vector<8x96xf32>
    %185 = vector.extract_strided_slice %176 {offsets = [0, 96], sizes = [8, 32], strides = [1, 1]} : vector<8x128xf32> to vector<8x32xf32>
    %186 = math.tanh %185 : vector<8x32xf32>
    %187 = vector.extract_strided_slice %184 {offsets = [0, 0], sizes = [8, 32], strides = [1, 1]} : vector<8x96xf32> to vector<8x32xf32>
    %188 = vector.extract_strided_slice %184 {offsets = [0, 32], sizes = [8, 32], strides = [1, 1]} : vector<8x96xf32> to vector<8x32xf32>
    %189 = vector.extract_strided_slice %184 {offsets = [0, 64], sizes = [8, 32], strides = [1, 1]} : vector<8x96xf32> to vector<8x32xf32>
    %190 = arith.mulf %188, %140 : vector<8x32xf32>
    %191 = arith.mulf %187, %186 : vector<8x32xf32>
    %192 = arith.addf %190, %191 : vector<8x32xf32>
    %193 = math.tanh %192 : vector<8x32xf32>
    %194 = arith.mulf %189, %193 : vector<8x32xf32>
    %c3_73 = arith.constant 3 : index
    %c0_74 = arith.constant 0 : index
    %c0_75 = arith.constant 0 : index
    %195 = vector.load %arg4[%c3_73, %c0_74, %c0_75] : memref<8x8x64xf32, #tpu.memory_space<vmem>>, vector<1x8x32xf32>
    %196 = vector.shape_cast %195 : vector<1x8x32xf32> to vector<8x32xf32>
    %197 = vector.shape_cast %194 : vector<8x32xf32> to vector<1x8x32xf32>
    tpu.vector_store %arg4[%c3_73, %c0_74, %c0_75], %197 {strides = array<i32>} : memref<8x8x64xf32, #tpu.memory_space<vmem>>, vector<1x8x32xf32>,
    %c4 = arith.constant 4 : index
    %c0_76 = arith.constant 0 : index
    %c128_77 = arith.constant 128 : index
    %198 = vector.load %arg5[%c4, %c0_76, %c128_77] : memref<8x8x256xf32, #tpu.memory_space<vmem>>, vector<1x8x128xf32>
    %199 = vector.shape_cast %198 : vector<1x8x128xf32> to vector<8x128xf32>
    %200 = vector.extract_strided_slice %172 {offsets = [0, 128], sizes = [8, 128], strides = [1, 1]} : vector<8x256xf32> to vector<8x128xf32>
    %201 = arith.addf %199, %200 : vector<8x128xf32>
    %202 = vector.extract_strided_slice %201 {offsets = [0, 0], sizes = [8, 96], strides = [1, 1]} : vector<8x128xf32> to vector<8x96xf32>
    %cst_78 = arith.constant 5.000000e-01 : f32
    %203 = vector.broadcast %cst_78 : f32 to vector<8x96xf32>
    %204 = arith.mulf %203, %202 : vector<8x96xf32>
    %205 = math.tanh %204 : vector<8x96xf32>
    %cst_79 = arith.constant 5.000000e-01 : f32
    %206 = vector.broadcast %cst_79 : f32 to vector<8x96xf32>
    %207 = arith.mulf %206, %205 : vector<8x96xf32>
    %cst_80 = arith.constant 5.000000e-01 : f32
    %208 = vector.broadcast %cst_80 : f32 to vector<8x96xf32>
    %209 = arith.addf %207, %208 : vector<8x96xf32>
    %210 = vector.extract_strided_slice %201 {offsets = [0, 96], sizes = [8, 32], strides = [1, 1]} : vector<8x128xf32> to vector<8x32xf32>
    %211 = math.tanh %210 : vector<8x32xf32>
    %212 = vector.extract_strided_slice %209 {offsets = [0, 0], sizes = [8, 32], strides = [1, 1]} : vector<8x96xf32> to vector<8x32xf32>
    %213 = vector.extract_strided_slice %209 {offsets = [0, 32], sizes = [8, 32], strides = [1, 1]} : vector<8x96xf32> to vector<8x32xf32>
    %214 = vector.extract_strided_slice %209 {offsets = [0, 64], sizes = [8, 32], strides = [1, 1]} : vector<8x96xf32> to vector<8x32xf32>
    %215 = arith.mulf %213, %165 : vector<8x32xf32>
    %216 = arith.mulf %212, %211 : vector<8x32xf32>
    %217 = arith.addf %215, %216 : vector<8x32xf32>
    %218 = math.tanh %217 : vector<8x32xf32>
    %219 = arith.mulf %214, %218 : vector<8x32xf32>
    %c4_81 = arith.constant 4 : index
    %c0_82 = arith.constant 0 : index
    %c32_83 = arith.constant 32 : index
    %220 = vector.load %arg4[%c4_81, %c0_82, %c32_83] : memref<8x8x64xf32, #tpu.memory_space<vmem>>, vector<1x8x32xf32>
    %221 = vector.shape_cast %220 : vector<1x8x32xf32> to vector<8x32xf32>
    %222 = vector.shape_cast %219 : vector<8x32xf32> to vector<1x8x32xf32>
    tpu.vector_store %arg4[%c4_81, %c0_82, %c32_83], %222 {strides = array<i32>} : memref<8x8x64xf32, #tpu.memory_space<vmem>>, vector<1x8x32xf32>,
    %223 = tpu.concatenate %194, %219 in 1 : vector<8x32xf32>, vector<8x32xf32> -> vector<8x64xf32>
    %cst_84 = arith.constant dense<0.000000e+00> : vector<8x256xf32>
    %224 = tpu.matmul %223, %12, %cst_84 {dimension_numbers = #tpu.dot_dimension_numbers<[1], [0], [0], [1], [0, 0, 1, 1], [], []>} : vector<8x64xf32>, vector<64x256xf32>, vector<8x256xf32> -> vector<8x256xf32>
    %c4_85 = arith.constant 4 : index
    %c0_86 = arith.constant 0 : index
    %c0_87 = arith.constant 0 : index
    %225 = vector.load %arg5[%c4_85, %c0_86, %c0_87] : memref<8x8x256xf32, #tpu.memory_space<vmem>>, vector<1x8x128xf32>
    %226 = vector.shape_cast %225 : vector<1x8x128xf32> to vector<8x128xf32>
    %227 = vector.extract_strided_slice %224 {offsets = [0, 0], sizes = [8, 128], strides = [1, 1]} : vector<8x256xf32> to vector<8x128xf32>
    %228 = arith.addf %226, %227 : vector<8x128xf32>
    %229 = vector.extract_strided_slice %228 {offsets = [0, 0], sizes = [8, 96], strides = [1, 1]} : vector<8x128xf32> to vector<8x96xf32>
    %cst_88 = arith.constant 5.000000e-01 : f32
    %230 = vector.broadcast %cst_88 : f32 to vector<8x96xf32>
    %231 = arith.mulf %230, %229 : vector<8x96xf32>
    %232 = math.tanh %231 : vector<8x96xf32>
    %cst_89 = arith.constant 5.000000e-01 : f32
    %233 = vector.broadcast %cst_89 : f32 to vector<8x96xf32>
    %234 = arith.mulf %233, %232 : vector<8x96xf32>
    %cst_90 = arith.constant 5.000000e-01 : f32
    %235 = vector.broadcast %cst_90 : f32 to vector<8x96xf32>
    %236 = arith.addf %234, %235 : vector<8x96xf32>
    %237 = vector.extract_strided_slice %228 {offsets = [0, 96], sizes = [8, 32], strides = [1, 1]} : vector<8x128xf32> to vector<8x32xf32>
    %238 = math.tanh %237 : vector<8x32xf32>
    %239 = vector.extract_strided_slice %236 {offsets = [0, 0], sizes = [8, 32], strides = [1, 1]} : vector<8x96xf32> to vector<8x32xf32>
    %240 = vector.extract_strided_slice %236 {offsets = [0, 32], sizes = [8, 32], strides = [1, 1]} : vector<8x96xf32> to vector<8x32xf32>
    %241 = vector.extract_strided_slice %236 {offsets = [0, 64], sizes = [8, 32], strides = [1, 1]} : vector<8x96xf32> to vector<8x32xf32>
    %242 = arith.mulf %240, %192 : vector<8x32xf32>
    %243 = arith.mulf %239, %238 : vector<8x32xf32>
    %244 = arith.addf %242, %243 : vector<8x32xf32>
    %245 = math.tanh %244 : vector<8x32xf32>
    %246 = arith.mulf %241, %245 : vector<8x32xf32>
    %c4_91 = arith.constant 4 : index
    %c0_92 = arith.constant 0 : index
    %c0_93 = arith.constant 0 : index
    %247 = vector.load %arg4[%c4_91, %c0_92, %c0_93] : memref<8x8x64xf32, #tpu.memory_space<vmem>>, vector<1x8x32xf32>
    %248 = vector.shape_cast %247 : vector<1x8x32xf32> to vector<8x32xf32>
    %249 = vector.shape_cast %246 : vector<8x32xf32> to vector<1x8x32xf32>
    tpu.vector_store %arg4[%c4_91, %c0_92, %c0_93], %249 {strides = array<i32>} : memref<8x8x64xf32, #tpu.memory_space<vmem>>, vector<1x8x32xf32>,
    %c3_94 = arith.constant 3 : index
    %c0_95 = arith.constant 0 : index
    %c128_96 = arith.constant 128 : index
    %250 = vector.load %arg5[%c3_94, %c0_95, %c128_96] : memref<8x8x256xf32, #tpu.memory_space<vmem>>, vector<1x8x128xf32>
    %251 = vector.shape_cast %250 : vector<1x8x128xf32> to vector<8x128xf32>
    %252 = vector.extract_strided_slice %224 {offsets = [0, 128], sizes = [8, 128], strides = [1, 1]} : vector<8x256xf32> to vector<8x128xf32>
    %253 = arith.addf %251, %252 : vector<8x128xf32>
    %254 = vector.extract_strided_slice %253 {offsets = [0, 0], sizes = [8, 96], strides = [1, 1]} : vector<8x128xf32> to vector<8x96xf32>
    %cst_97 = arith.constant 5.000000e-01 : f32
    %255 = vector.broadcast %cst_97 : f32 to vector<8x96xf32>
    %256 = arith.mulf %255, %254 : vector<8x96xf32>
    %257 = math.tanh %256 : vector<8x96xf32>
    %cst_98 = arith.constant 5.000000e-01 : f32
    %258 = vector.broadcast %cst_98 : f32 to vector<8x96xf32>
    %259 = arith.mulf %258, %257 : vector<8x96xf32>
    %cst_99 = arith.constant 5.000000e-01 : f32
    %260 = vector.broadcast %cst_99 : f32 to vector<8x96xf32>
    %261 = arith.addf %259, %260 : vector<8x96xf32>
    %262 = vector.extract_strided_slice %253 {offsets = [0, 96], sizes = [8, 32], strides = [1, 1]} : vector<8x128xf32> to vector<8x32xf32>
    %263 = math.tanh %262 : vector<8x32xf32>
    %264 = vector.extract_strided_slice %261 {offsets = [0, 0], sizes = [8, 32], strides = [1, 1]} : vector<8x96xf32> to vector<8x32xf32>
    %265 = vector.extract_strided_slice %261 {offsets = [0, 32], sizes = [8, 32], strides = [1, 1]} : vector<8x96xf32> to vector<8x32xf32>
    %266 = vector.extract_strided_slice %261 {offsets = [0, 64], sizes = [8, 32], strides = [1, 1]} : vector<8x96xf32> to vector<8x32xf32>
    %267 = arith.mulf %265, %217 : vector<8x32xf32>
    %268 = arith.mulf %264, %263 : vector<8x32xf32>
    %269 = arith.addf %267, %268 : vector<8x32xf32>
    %270 = math.tanh %269 : vector<8x32xf32>
    %271 = arith.mulf %266, %270 : vector<8x32xf32>
    %c3_100 = arith.constant 3 : index
    %c0_101 = arith.constant 0 : index
    %c32_102 = arith.constant 32 : index
    %272 = vector.load %arg4[%c3_100, %c0_101, %c32_102] : memref<8x8x64xf32, #tpu.memory_space<vmem>>, vector<1x8x32xf32>
    %273 = vector.shape_cast %272 : vector<1x8x32xf32> to vector<8x32xf32>
    %274 = vector.shape_cast %271 : vector<8x32xf32> to vector<1x8x32xf32>
    tpu.vector_store %arg4[%c3_100, %c0_101, %c32_102], %274 {strides = array<i32>} : memref<8x8x64xf32, #tpu.memory_space<vmem>>, vector<1x8x32xf32>,
    %275 = tpu.concatenate %246, %271 in 1 : vector<8x32xf32>, vector<8x32xf32> -> vector<8x64xf32>
    %cst_103 = arith.constant dense<0.000000e+00> : vector<8x256xf32>
    %276 = tpu.matmul %275, %12, %cst_103 {dimension_numbers = #tpu.dot_dimension_numbers<[1], [0], [0], [1], [0, 0, 1, 1], [], []>} : vector<8x64xf32>, vector<64x256xf32>, vector<8x256xf32> -> vector<8x256xf32>
    %c5_104 = arith.constant 5 : index
    %c0_105 = arith.constant 0 : index
    %c0_106 = arith.constant 0 : index
    %277 = vector.load %arg5[%c5_104, %c0_105, %c0_106] : memref<8x8x256xf32, #tpu.memory_space<vmem>>, vector<1x8x128xf32>
    %278 = vector.shape_cast %277 : vector<1x8x128xf32> to vector<8x128xf32>
    %279 = vector.extract_strided_slice %276 {offsets = [0, 0], sizes = [8, 128], strides = [1, 1]} : vector<8x256xf32> to vector<8x128xf32>
    %280 = arith.addf %278, %279 : vector<8x128xf32>
    %281 = vector.extract_strided_slice %280 {offsets = [0, 0], sizes = [8, 96], strides = [1, 1]} : vector<8x128xf32> to vector<8x96xf32>
    %cst_107 = arith.constant 5.000000e-01 : f32
    %282 = vector.broadcast %cst_107 : f32 to vector<8x96xf32>
    %283 = arith.mulf %282, %281 : vector<8x96xf32>
    %284 = math.tanh %283 : vector<8x96xf32>
    %cst_108 = arith.constant 5.000000e-01 : f32
    %285 = vector.broadcast %cst_108 : f32 to vector<8x96xf32>
    %286 = arith.mulf %285, %284 : vector<8x96xf32>
    %cst_109 = arith.constant 5.000000e-01 : f32
    %287 = vector.broadcast %cst_109 : f32 to vector<8x96xf32>
    %288 = arith.addf %286, %287 : vector<8x96xf32>
    %289 = vector.extract_strided_slice %280 {offsets = [0, 96], sizes = [8, 32], strides = [1, 1]} : vector<8x128xf32> to vector<8x32xf32>
    %290 = math.tanh %289 : vector<8x32xf32>
    %291 = vector.extract_strided_slice %288 {offsets = [0, 0], sizes = [8, 32], strides = [1, 1]} : vector<8x96xf32> to vector<8x32xf32>
    %292 = vector.extract_strided_slice %288 {offsets = [0, 32], sizes = [8, 32], strides = [1, 1]} : vector<8x96xf32> to vector<8x32xf32>
    %293 = vector.extract_strided_slice %288 {offsets = [0, 64], sizes = [8, 32], strides = [1, 1]} : vector<8x96xf32> to vector<8x32xf32>
    %294 = arith.mulf %292, %244 : vector<8x32xf32>
    %295 = arith.mulf %291, %290 : vector<8x32xf32>
    %296 = arith.addf %294, %295 : vector<8x32xf32>
    %297 = math.tanh %296 : vector<8x32xf32>
    %298 = arith.mulf %293, %297 : vector<8x32xf32>
    %c5_110 = arith.constant 5 : index
    %c0_111 = arith.constant 0 : index
    %c0_112 = arith.constant 0 : index
    %299 = vector.load %arg4[%c5_110, %c0_111, %c0_112] : memref<8x8x64xf32, #tpu.memory_space<vmem>>, vector<1x8x32xf32>
    %300 = vector.shape_cast %299 : vector<1x8x32xf32> to vector<8x32xf32>
    %301 = vector.shape_cast %298 : vector<8x32xf32> to vector<1x8x32xf32>
    tpu.vector_store %arg4[%c5_110, %c0_111, %c0_112], %301 {strides = array<i32>} : memref<8x8x64xf32, #tpu.memory_space<vmem>>, vector<1x8x32xf32>,
    %c2_113 = arith.constant 2 : index
    %c0_114 = arith.constant 0 : index
    %c128_115 = arith.constant 128 : index
    %302 = vector.load %arg5[%c2_113, %c0_114, %c128_115] : memref<8x8x256xf32, #tpu.memory_space<vmem>>, vector<1x8x128xf32>
    %303 = vector.shape_cast %302 : vector<1x8x128xf32> to vector<8x128xf32>
    %304 = vector.extract_strided_slice %276 {offsets = [0, 128], sizes = [8, 128], strides = [1, 1]} : vector<8x256xf32> to vector<8x128xf32>
    %305 = arith.addf %303, %304 : vector<8x128xf32>
    %306 = vector.extract_strided_slice %305 {offsets = [0, 0], sizes = [8, 96], strides = [1, 1]} : vector<8x128xf32> to vector<8x96xf32>
    %cst_116 = arith.constant 5.000000e-01 : f32
    %307 = vector.broadcast %cst_116 : f32 to vector<8x96xf32>
    %308 = arith.mulf %307, %306 : vector<8x96xf32>
    %309 = math.tanh %308 : vector<8x96xf32>
    %cst_117 = arith.constant 5.000000e-01 : f32
    %310 = vector.broadcast %cst_117 : f32 to vector<8x96xf32>
    %311 = arith.mulf %310, %309 : vector<8x96xf32>
    %cst_118 = arith.constant 5.000000e-01 : f32
    %312 = vector.broadcast %cst_118 : f32 to vector<8x96xf32>
    %313 = arith.addf %311, %312 : vector<8x96xf32>
    %314 = vector.extract_strided_slice %305 {offsets = [0, 96], sizes = [8, 32], strides = [1, 1]} : vector<8x128xf32> to vector<8x32xf32>
    %315 = math.tanh %314 : vector<8x32xf32>
    %316 = vector.extract_strided_slice %313 {offsets = [0, 0], sizes = [8, 32], strides = [1, 1]} : vector<8x96xf32> to vector<8x32xf32>
    %317 = vector.extract_strided_slice %313 {offsets = [0, 32], sizes = [8, 32], strides = [1, 1]} : vector<8x96xf32> to vector<8x32xf32>
    %318 = vector.extract_strided_slice %313 {offsets = [0, 64], sizes = [8, 32], strides = [1, 1]} : vector<8x96xf32> to vector<8x32xf32>
    %319 = arith.mulf %317, %269 : vector<8x32xf32>
    %320 = arith.mulf %316, %315 : vector<8x32xf32>
    %321 = arith.addf %319, %320 : vector<8x32xf32>
    %322 = math.tanh %321 : vector<8x32xf32>
    %323 = arith.mulf %318, %322 : vector<8x32xf32>
    %c2_119 = arith.constant 2 : index
    %c0_120 = arith.constant 0 : index
    %c32_121 = arith.constant 32 : index
    %324 = vector.load %arg4[%c2_119, %c0_120, %c32_121] : memref<8x8x64xf32, #tpu.memory_space<vmem>>, vector<1x8x32xf32>
    %325 = vector.shape_cast %324 : vector<1x8x32xf32> to vector<8x32xf32>
    %326 = vector.shape_cast %323 : vector<8x32xf32> to vector<1x8x32xf32>
    tpu.vector_store %arg4[%c2_119, %c0_120, %c32_121], %326 {strides = array<i32>} : memref<8x8x64xf32, #tpu.memory_space<vmem>>, vector<1x8x32xf32>,
    %327 = tpu.concatenate %298, %323 in 1 : vector<8x32xf32>, vector<8x32xf32> -> vector<8x64xf32>
    %cst_122 = arith.constant dense<0.000000e+00> : vector<8x256xf32>
    %328 = tpu.matmul %327, %12, %cst_122 {dimension_numbers = #tpu.dot_dimension_numbers<[1], [0], [0], [1], [0, 0, 1, 1], [], []>} : vector<8x64xf32>, vector<64x256xf32>, vector<8x256xf32> -> vector<8x256xf32>
    %c6_123 = arith.constant 6 : index
    %c0_124 = arith.constant 0 : index
    %c0_125 = arith.constant 0 : index
    %329 = vector.load %arg5[%c6_123, %c0_124, %c0_125] : memref<8x8x256xf32, #tpu.memory_space<vmem>>, vector<1x8x128xf32>
    %330 = vector.shape_cast %329 : vector<1x8x128xf32> to vector<8x128xf32>
    %331 = vector.extract_strided_slice %328 {offsets = [0, 0], sizes = [8, 128], strides = [1, 1]} : vector<8x256xf32> to vector<8x128xf32>
    %332 = arith.addf %330, %331 : vector<8x128xf32>
    %333 = vector.extract_strided_slice %332 {offsets = [0, 0], sizes = [8, 96], strides = [1, 1]} : vector<8x128xf32> to vector<8x96xf32>
    %cst_126 = arith.constant 5.000000e-01 : f32
    %334 = vector.broadcast %cst_126 : f32 to vector<8x96xf32>
    %335 = arith.mulf %334, %333 : vector<8x96xf32>
    %336 = math.tanh %335 : vector<8x96xf32>
    %cst_127 = arith.constant 5.000000e-01 : f32
    %337 = vector.broadcast %cst_127 : f32 to vector<8x96xf32>
    %338 = arith.mulf %337, %336 : vector<8x96xf32>
    %cst_128 = arith.constant 5.000000e-01 : f32
    %339 = vector.broadcast %cst_128 : f32 to vector<8x96xf32>
    %340 = arith.addf %338, %339 : vector<8x96xf32>
    %341 = vector.extract_strided_slice %332 {offsets = [0, 96], sizes = [8, 32], strides = [1, 1]} : vector<8x128xf32> to vector<8x32xf32>
    %342 = math.tanh %341 : vector<8x32xf32>
    %343 = vector.extract_strided_slice %340 {offsets = [0, 0], sizes = [8, 32], strides = [1, 1]} : vector<8x96xf32> to vector<8x32xf32>
    %344 = vector.extract_strided_slice %340 {offsets = [0, 32], sizes = [8, 32], strides = [1, 1]} : vector<8x96xf32> to vector<8x32xf32>
    %345 = vector.extract_strided_slice %340 {offsets = [0, 64], sizes = [8, 32], strides = [1, 1]} : vector<8x96xf32> to vector<8x32xf32>
    %346 = arith.mulf %344, %296 : vector<8x32xf32>
    %347 = arith.mulf %343, %342 : vector<8x32xf32>
    %348 = arith.addf %346, %347 : vector<8x32xf32>
    %349 = math.tanh %348 : vector<8x32xf32>
    %350 = arith.mulf %345, %349 : vector<8x32xf32>
    %c6_129 = arith.constant 6 : index
    %c0_130 = arith.constant 0 : index
    %c0_131 = arith.constant 0 : index
    %351 = vector.load %arg4[%c6_129, %c0_130, %c0_131] : memref<8x8x64xf32, #tpu.memory_space<vmem>>, vector<1x8x32xf32>
    %352 = vector.shape_cast %351 : vector<1x8x32xf32> to vector<8x32xf32>
    %353 = vector.shape_cast %350 : vector<8x32xf32> to vector<1x8x32xf32>
    tpu.vector_store %arg4[%c6_129, %c0_130, %c0_131], %353 {strides = array<i32>} : memref<8x8x64xf32, #tpu.memory_space<vmem>>, vector<1x8x32xf32>,
    %c1_132 = arith.constant 1 : index
    %c0_133 = arith.constant 0 : index
    %c128_134 = arith.constant 128 : index
    %354 = vector.load %arg5[%c1_132, %c0_133, %c128_134] : memref<8x8x256xf32, #tpu.memory_space<vmem>>, vector<1x8x128xf32>
    %355 = vector.shape_cast %354 : vector<1x8x128xf32> to vector<8x128xf32>
    %356 = vector.extract_strided_slice %328 {offsets = [0, 128], sizes = [8, 128], strides = [1, 1]} : vector<8x256xf32> to vector<8x128xf32>
    %357 = arith.addf %355, %356 : vector<8x128xf32>
    %358 = vector.extract_strided_slice %357 {offsets = [0, 0], sizes = [8, 96], strides = [1, 1]} : vector<8x128xf32> to vector<8x96xf32>
    %cst_135 = arith.constant 5.000000e-01 : f32
    %359 = vector.broadcast %cst_135 : f32 to vector<8x96xf32>
    %360 = arith.mulf %359, %358 : vector<8x96xf32>
    %361 = math.tanh %360 : vector<8x96xf32>
    %cst_136 = arith.constant 5.000000e-01 : f32
    %362 = vector.broadcast %cst_136 : f32 to vector<8x96xf32>
    %363 = arith.mulf %362, %361 : vector<8x96xf32>
    %cst_137 = arith.constant 5.000000e-01 : f32
    %364 = vector.broadcast %cst_137 : f32 to vector<8x96xf32>
    %365 = arith.addf %363, %364 : vector<8x96xf32>
    %366 = vector.extract_strided_slice %357 {offsets = [0, 96], sizes = [8, 32], strides = [1, 1]} : vector<8x128xf32> to vector<8x32xf32>
    %367 = math.tanh %366 : vector<8x32xf32>
    %368 = vector.extract_strided_slice %365 {offsets = [0, 0], sizes = [8, 32], strides = [1, 1]} : vector<8x96xf32> to vector<8x32xf32>
    %369 = vector.extract_strided_slice %365 {offsets = [0, 32], sizes = [8, 32], strides = [1, 1]} : vector<8x96xf32> to vector<8x32xf32>
    %370 = vector.extract_strided_slice %365 {offsets = [0, 64], sizes = [8, 32], strides = [1, 1]} : vector<8x96xf32> to vector<8x32xf32>
    %371 = arith.mulf %369, %321 : vector<8x32xf32>
    %372 = arith.mulf %368, %367 : vector<8x32xf32>
    %373 = arith.addf %371, %372 : vector<8x32xf32>
    %374 = math.tanh %373 : vector<8x32xf32>
    %375 = arith.mulf %370, %374 : vector<8x32xf32>
    %c1_138 = arith.constant 1 : index
    %c0_139 = arith.constant 0 : index
    %c32_140 = arith.constant 32 : index
    %376 = vector.load %arg4[%c1_138, %c0_139, %c32_140] : memref<8x8x64xf32, #tpu.memory_space<vmem>>, vector<1x8x32xf32>
    %377 = vector.shape_cast %376 : vector<1x8x32xf32> to vector<8x32xf32>
    %378 = vector.shape_cast %375 : vector<8x32xf32> to vector<1x8x32xf32>
    tpu.vector_store %arg4[%c1_138, %c0_139, %c32_140], %378 {strides = array<i32>} : memref<8x8x64xf32, #tpu.memory_space<vmem>>, vector<1x8x32xf32>,
    %379 = tpu.concatenate %350, %375 in 1 : vector<8x32xf32>, vector<8x32xf32> -> vector<8x64xf32>
    %cst_141 = arith.constant dense<0.000000e+00> : vector<8x256xf32>
    %380 = tpu.matmul %379, %12, %cst_141 {dimension_numbers = #tpu.dot_dimension_numbers<[1], [0], [0], [1], [0, 0, 1, 1], [], []>} : vector<8x64xf32>, vector<64x256xf32>, vector<8x256xf32> -> vector<8x256xf32>
    %c7_142 = arith.constant 7 : index
    %c0_143 = arith.constant 0 : index
    %c0_144 = arith.constant 0 : index
    %381 = vector.load %arg5[%c7_142, %c0_143, %c0_144] : memref<8x8x256xf32, #tpu.memory_space<vmem>>, vector<1x8x128xf32>
    %382 = vector.shape_cast %381 : vector<1x8x128xf32> to vector<8x128xf32>
    %383 = vector.extract_strided_slice %380 {offsets = [0, 0], sizes = [8, 128], strides = [1, 1]} : vector<8x256xf32> to vector<8x128xf32>
    %384 = arith.addf %382, %383 : vector<8x128xf32>
    %385 = vector.extract_strided_slice %384 {offsets = [0, 0], sizes = [8, 96], strides = [1, 1]} : vector<8x128xf32> to vector<8x96xf32>
    %cst_145 = arith.constant 5.000000e-01 : f32
    %386 = vector.broadcast %cst_145 : f32 to vector<8x96xf32>
    %387 = arith.mulf %386, %385 : vector<8x96xf32>
    %388 = math.tanh %387 : vector<8x96xf32>
    %cst_146 = arith.constant 5.000000e-01 : f32
    %389 = vector.broadcast %cst_146 : f32 to vector<8x96xf32>
    %390 = arith.mulf %389, %388 : vector<8x96xf32>
    %cst_147 = arith.constant 5.000000e-01 : f32
    %391 = vector.broadcast %cst_147 : f32 to vector<8x96xf32>
    %392 = arith.addf %390, %391 : vector<8x96xf32>
    %393 = vector.extract_strided_slice %384 {offsets = [0, 96], sizes = [8, 32], strides = [1, 1]} : vector<8x128xf32> to vector<8x32xf32>
    %394 = math.tanh %393 : vector<8x32xf32>
    %395 = vector.extract_strided_slice %392 {offsets = [0, 0], sizes = [8, 32], strides = [1, 1]} : vector<8x96xf32> to vector<8x32xf32>
    %396 = vector.extract_strided_slice %392 {offsets = [0, 32], sizes = [8, 32], strides = [1, 1]} : vector<8x96xf32> to vector<8x32xf32>
    %397 = vector.extract_strided_slice %392 {offsets = [0, 64], sizes = [8, 32], strides = [1, 1]} : vector<8x96xf32> to vector<8x32xf32>
    %398 = arith.mulf %396, %348 : vector<8x32xf32>
    %399 = arith.mulf %395, %394 : vector<8x32xf32>
    %400 = arith.addf %398, %399 : vector<8x32xf32>
    %401 = math.tanh %400 : vector<8x32xf32>
    %402 = arith.mulf %397, %401 : vector<8x32xf32>
    %c7_148 = arith.constant 7 : index
    %c0_149 = arith.constant 0 : index
    %c0_150 = arith.constant 0 : index
    %403 = vector.load %arg4[%c7_148, %c0_149, %c0_150] : memref<8x8x64xf32, #tpu.memory_space<vmem>>, vector<1x8x32xf32>
    %404 = vector.shape_cast %403 : vector<1x8x32xf32> to vector<8x32xf32>
    %405 = vector.shape_cast %402 : vector<8x32xf32> to vector<1x8x32xf32>
    tpu.vector_store %arg4[%c7_148, %c0_149, %c0_150], %405 {strides = array<i32>} : memref<8x8x64xf32, #tpu.memory_space<vmem>>, vector<1x8x32xf32>,
    %c0_151 = arith.constant 0 : index
    %c0_152 = arith.constant 0 : index
    %c128_153 = arith.constant 128 : index
    %406 = vector.load %arg5[%c0_151, %c0_152, %c128_153] : memref<8x8x256xf32, #tpu.memory_space<vmem>>, vector<1x8x128xf32>
    %407 = vector.shape_cast %406 : vector<1x8x128xf32> to vector<8x128xf32>
    %408 = vector.extract_strided_slice %380 {offsets = [0, 128], sizes = [8, 128], strides = [1, 1]} : vector<8x256xf32> to vector<8x128xf32>
    %409 = arith.addf %407, %408 : vector<8x128xf32>
    %410 = vector.extract_strided_slice %409 {offsets = [0, 0], sizes = [8, 96], strides = [1, 1]} : vector<8x128xf32> to vector<8x96xf32>
    %cst_154 = arith.constant 5.000000e-01 : f32
    %411 = vector.broadcast %cst_154 : f32 to vector<8x96xf32>
    %412 = arith.mulf %411, %410 : vector<8x96xf32>
    %413 = math.tanh %412 : vector<8x96xf32>
    %cst_155 = arith.constant 5.000000e-01 : f32
    %414 = vector.broadcast %cst_155 : f32 to vector<8x96xf32>
    %415 = arith.mulf %414, %413 : vector<8x96xf32>
    %cst_156 = arith.constant 5.000000e-01 : f32
    %416 = vector.broadcast %cst_156 : f32 to vector<8x96xf32>
    %417 = arith.addf %415, %416 : vector<8x96xf32>
    %418 = vector.extract_strided_slice %409 {offsets = [0, 96], sizes = [8, 32], strides = [1, 1]} : vector<8x128xf32> to vector<8x32xf32>
    %419 = math.tanh %418 : vector<8x32xf32>
    %420 = vector.extract_strided_slice %417 {offsets = [0, 0], sizes = [8, 32], strides = [1, 1]} : vector<8x96xf32> to vector<8x32xf32>
    %421 = vector.extract_strided_slice %417 {offsets = [0, 32], sizes = [8, 32], strides = [1, 1]} : vector<8x96xf32> to vector<8x32xf32>
    %422 = vector.extract_strided_slice %417 {offsets = [0, 64], sizes = [8, 32], strides = [1, 1]} : vector<8x96xf32> to vector<8x32xf32>
    %423 = arith.mulf %421, %373 : vector<8x32xf32>
    %424 = arith.mulf %420, %419 : vector<8x32xf32>
    %425 = arith.addf %423, %424 : vector<8x32xf32>
    %426 = math.tanh %425 : vector<8x32xf32>
    %427 = arith.mulf %422, %426 : vector<8x32xf32>
    %c0_157 = arith.constant 0 : index
    %c0_158 = arith.constant 0 : index
    %c32_159 = arith.constant 32 : index
    %428 = vector.load %arg4[%c0_157, %c0_158, %c32_159] : memref<8x8x64xf32, #tpu.memory_space<vmem>>, vector<1x8x32xf32>
    %429 = vector.shape_cast %428 : vector<1x8x32xf32> to vector<8x32xf32>
    %430 = vector.shape_cast %427 : vector<8x32xf32> to vector<1x8x32xf32>
    tpu.vector_store %arg4[%c0_157, %c0_158, %c32_159], %430 {strides = array<i32>} : memref<8x8x64xf32, #tpu.memory_space<vmem>>, vector<1x8x32xf32>,
    %c0_160 = arith.constant 0 : index
    %c0_161 = arith.constant 0 : index
    %c0_162 = arith.constant 0 : index
    %431 = vector.load %arg4[%c0_160, %c0_161, %c0_162] : memref<8x8x64xf32, #tpu.memory_space<vmem>>, vector<8x8x64xf32>
    %c1_163 = arith.constant 1 : index
    %c0_164 = arith.constant 0 : index
    %c0_165 = arith.constant 0 : index
    %432 = vector.load %arg1[%c1_163, %c0_164, %c0_165] : memref<2x64x256xf32, #tpu.memory_space<vmem>>, vector<1x64x256xf32>
    %433 = vector.shape_cast %432 : vector<1x64x256xf32> to vector<64x256xf32>
    %434 = vector.shape_cast %431 : vector<8x8x64xf32> to vector<64x64xf32>
    %cst_166 = arith.constant dense<0.000000e+00> : vector<64x256xf32>
    %435 = tpu.matmul %434, %433, %cst_166 {dimension_numbers = #tpu.dot_dimension_numbers<[1], [0], [0], [1], [0, 0, 1, 1], [], []>} : vector<64x64xf32>, vector<64x256xf32>, vector<64x256xf32> -> vector<64x256xf32>
    %c1_167 = arith.constant 1 : index
    %c0_168 = arith.constant 0 : index
    %c0_169 = arith.constant 0 : index
    %436 = vector.load %arg3[%c1_167, %c0_168, %c0_169] : memref<2x1x256xf32, #tpu.memory_space<vmem>>, vector<1x1x256xf32>
    %437 = vector.shape_cast %436 : vector<1x1x256xf32> to vector<1x256xf32>
    %438 = vector.broadcast %437 : vector<1x256xf32> to vector<64x256xf32>
    %439 = arith.addf %435, %438 : vector<64x256xf32>
    %440 = vector.shape_cast %439 : vector<64x256xf32> to vector<8x8x256xf32>
    %c0_170 = arith.constant 0 : index
    %c0_171 = arith.constant 0 : index
    %c0_172 = arith.constant 0 : index
    %441 = vector.load %arg5[%c0_170, %c0_171, %c0_172] : memref<8x8x256xf32, #tpu.memory_space<vmem>>, vector<8x8x256xf32>
    tpu.vector_store %arg5[%c0_170, %c0_171, %c0_172], %440 {strides = array<i32>} : memref<8x8x256xf32, #tpu.memory_space<vmem>>, vector<8x8x256xf32>,
    %c1_173 = arith.constant 1 : index
    %c0_174 = arith.constant 0 : index
    %c0_175 = arith.constant 0 : index
    %442 = vector.load %arg2[%c1_173, %c0_174, %c0_175] : memref<2x64x256xf32, #tpu.memory_space<vmem>>, vector<1x64x256xf32>
    %443 = vector.shape_cast %442 : vector<1x64x256xf32> to vector<64x256xf32>
    %cst_176 = arith.constant 0.000000e+00 : f32
    %444 = vector.broadcast %cst_176 : f32 to vector<8x64xf32>
    %cst_177 = arith.constant 0.000000e+00 : f32
    %445 = vector.broadcast %cst_177 : f32 to vector<8x32xf32>
    %cst_178 = arith.constant 0.000000e+00 : f32
    %446 = vector.broadcast %cst_178 : f32 to vector<8x32xf32>
    %cst_179 = arith.constant dense<0.000000e+00> : vector<8x256xf32>
    %447 = tpu.matmul %444, %443, %cst_179 {dimension_numbers = #tpu.dot_dimension_numbers<[1], [0], [0], [1], [0, 0, 1, 1], [], []>} : vector<8x64xf32>, vector<64x256xf32>, vector<8x256xf32> -> vector<8x256xf32>
    %c0_180 = arith.constant 0 : index
    %c0_181 = arith.constant 0 : index
    %c0_182 = arith.constant 0 : index
    %448 = vector.load %arg5[%c0_180, %c0_181, %c0_182] : memref<8x8x256xf32, #tpu.memory_space<vmem>>, vector<1x8x128xf32>
    %449 = vector.shape_cast %448 : vector<1x8x128xf32> to vector<8x128xf32>
    %450 = vector.extract_strided_slice %447 {offsets = [0, 0], sizes = [8, 128], strides = [1, 1]} : vector<8x256xf32> to vector<8x128xf32>
    %451 = arith.addf %449, %450 : vector<8x128xf32>
    %452 = vector.extract_strided_slice %451 {offsets = [0, 0], sizes = [8, 96], strides = [1, 1]} : vector<8x128xf32> to vector<8x96xf32>
    %cst_183 = arith.constant 5.000000e-01 : f32
    %453 = vector.broadcast %cst_183 : f32 to vector<8x96xf32>
    %454 = arith.mulf %453, %452 : vector<8x96xf32>
    %455 = math.tanh %454 : vector<8x96xf32>
    %cst_184 = arith.constant 5.000000e-01 : f32
    %456 = vector.broadcast %cst_184 : f32 to vector<8x96xf32>
    %457 = arith.mulf %456, %455 : vector<8x96xf32>
    %cst_185 = arith.constant 5.000000e-01 : f32
    %458 = vector.broadcast %cst_185 : f32 to vector<8x96xf32>
    %459 = arith.addf %457, %458 : vector<8x96xf32>
    %460 = vector.extract_strided_slice %451 {offsets = [0, 96], sizes = [8, 32], strides = [1, 1]} : vector<8x128xf32> to vector<8x32xf32>
    %461 = math.tanh %460 : vector<8x32xf32>
    %462 = vector.extract_strided_slice %459 {offsets = [0, 0], sizes = [8, 32], strides = [1, 1]} : vector<8x96xf32> to vector<8x32xf32>
    %463 = vector.extract_strided_slice %459 {offsets = [0, 32], sizes = [8, 32], strides = [1, 1]} : vector<8x96xf32> to vector<8x32xf32>
    %464 = vector.extract_strided_slice %459 {offsets = [0, 64], sizes = [8, 32], strides = [1, 1]} : vector<8x96xf32> to vector<8x32xf32>
    %465 = arith.mulf %463, %445 : vector<8x32xf32>
    %466 = arith.mulf %462, %461 : vector<8x32xf32>
    %467 = arith.addf %465, %466 : vector<8x32xf32>
    %468 = math.tanh %467 : vector<8x32xf32>
    %469 = arith.mulf %464, %468 : vector<8x32xf32>
    %c0_186 = arith.constant 0 : index
    %c0_187 = arith.constant 0 : index
    %c0_188 = arith.constant 0 : index
    %470 = vector.load %arg4[%c0_186, %c0_187, %c0_188] : memref<8x8x64xf32, #tpu.memory_space<vmem>>, vector<1x8x32xf32>
    %471 = vector.shape_cast %470 : vector<1x8x32xf32> to vector<8x32xf32>
    %472 = vector.shape_cast %469 : vector<8x32xf32> to vector<1x8x32xf32>
    tpu.vector_store %arg4[%c0_186, %c0_187, %c0_188], %472 {strides = array<i32>} : memref<8x8x64xf32, #tpu.memory_space<vmem>>, vector<1x8x32xf32>,
    %c7_189 = arith.constant 7 : index
    %c0_190 = arith.constant 0 : index
    %c128_191 = arith.constant 128 : index
    %473 = vector.load %arg5[%c7_189, %c0_190, %c128_191] : memref<8x8x256xf32, #tpu.memory_space<vmem>>, vector<1x8x128xf32>
    %474 = vector.shape_cast %473 : vector<1x8x128xf32> to vector<8x128xf32>
    %475 = vector.extract_strided_slice %447 {offsets = [0, 128], sizes = [8, 128], strides = [1, 1]} : vector<8x256xf32> to vector<8x128xf32>
    %476 = arith.addf %474, %475 : vector<8x128xf32>
    %477 = vector.extract_strided_slice %476 {offsets = [0, 0], sizes = [8, 96], strides = [1, 1]} : vector<8x128xf32> to vector<8x96xf32>
    %cst_192 = arith.constant 5.000000e-01 : f32
    %478 = vector.broadcast %cst_192 : f32 to vector<8x96xf32>
    %479 = arith.mulf %478, %477 : vector<8x96xf32>
    %480 = math.tanh %479 : vector<8x96xf32>
    %cst_193 = arith.constant 5.000000e-01 : f32
    %481 = vector.broadcast %cst_193 : f32 to vector<8x96xf32>
    %482 = arith.mulf %481, %480 : vector<8x96xf32>
    %cst_194 = arith.constant 5.000000e-01 : f32
    %483 = vector.broadcast %cst_194 : f32 to vector<8x96xf32>
    %484 = arith.addf %482, %483 : vector<8x96xf32>
    %485 = vector.extract_strided_slice %476 {offsets = [0, 96], sizes = [8, 32], strides = [1, 1]} : vector<8x128xf32> to vector<8x32xf32>
    %486 = math.tanh %485 : vector<8x32xf32>
    %487 = vector.extract_strided_slice %484 {offsets = [0, 0], sizes = [8, 32], strides = [1, 1]} : vector<8x96xf32> to vector<8x32xf32>
    %488 = vector.extract_strided_slice %484 {offsets = [0, 32], sizes = [8, 32], strides = [1, 1]} : vector<8x96xf32> to vector<8x32xf32>
    %489 = vector.extract_strided_slice %484 {offsets = [0, 64], sizes = [8, 32], strides = [1, 1]} : vector<8x96xf32> to vector<8x32xf32>
    %490 = arith.mulf %488, %446 : vector<8x32xf32>
    %491 = arith.mulf %487, %486 : vector<8x32xf32>
    %492 = arith.addf %490, %491 : vector<8x32xf32>
    %493 = math.tanh %492 : vector<8x32xf32>
    %494 = arith.mulf %489, %493 : vector<8x32xf32>
    %c7_195 = arith.constant 7 : index
    %c0_196 = arith.constant 0 : index
    %c32_197 = arith.constant 32 : index
    %495 = vector.load %arg4[%c7_195, %c0_196, %c32_197] : memref<8x8x64xf32, #tpu.memory_space<vmem>>, vector<1x8x32xf32>
    %496 = vector.shape_cast %495 : vector<1x8x32xf32> to vector<8x32xf32>
    %497 = vector.shape_cast %494 : vector<8x32xf32> to vector<1x8x32xf32>
    tpu.vector_store %arg4[%c7_195, %c0_196, %c32_197], %497 {strides = array<i32>} : memref<8x8x64xf32, #tpu.memory_space<vmem>>, vector<1x8x32xf32>,
    %498 = tpu.concatenate %469, %494 in 1 : vector<8x32xf32>, vector<8x32xf32> -> vector<8x64xf32>
    %cst_198 = arith.constant dense<0.000000e+00> : vector<8x256xf32>
    %499 = tpu.matmul %498, %443, %cst_198 {dimension_numbers = #tpu.dot_dimension_numbers<[1], [0], [0], [1], [0, 0, 1, 1], [], []>} : vector<8x64xf32>, vector<64x256xf32>, vector<8x256xf32> -> vector<8x256xf32>
    %c1_199 = arith.constant 1 : index
    %c0_200 = arith.constant 0 : index
    %c0_201 = arith.constant 0 : index
    %500 = vector.load %arg5[%c1_199, %c0_200, %c0_201] : memref<8x8x256xf32, #tpu.memory_space<vmem>>, vector<1x8x128xf32>
    %501 = vector.shape_cast %500 : vector<1x8x128xf32> to vector<8x128xf32>
    %502 = vector.extract_strided_slice %499 {offsets = [0, 0], sizes = [8, 128], strides = [1, 1]} : vector<8x256xf32> to vector<8x128xf32>
    %503 = arith.addf %501, %502 : vector<8x128xf32>
    %504 = vector.extract_strided_slice %503 {offsets = [0, 0], sizes = [8, 96], strides = [1, 1]} : vector<8x128xf32> to vector<8x96xf32>
    %cst_202 = arith.constant 5.000000e-01 : f32
    %505 = vector.broadcast %cst_202 : f32 to vector<8x96xf32>
    %506 = arith.mulf %505, %504 : vector<8x96xf32>
    %507 = math.tanh %506 : vector<8x96xf32>
    %cst_203 = arith.constant 5.000000e-01 : f32
    %508 = vector.broadcast %cst_203 : f32 to vector<8x96xf32>
    %509 = arith.mulf %508, %507 : vector<8x96xf32>
    %cst_204 = arith.constant 5.000000e-01 : f32
    %510 = vector.broadcast %cst_204 : f32 to vector<8x96xf32>
    %511 = arith.addf %509, %510 : vector<8x96xf32>
    %512 = vector.extract_strided_slice %503 {offsets = [0, 96], sizes = [8, 32], strides = [1, 1]} : vector<8x128xf32> to vector<8x32xf32>
    %513 = math.tanh %512 : vector<8x32xf32>
    %514 = vector.extract_strided_slice %511 {offsets = [0, 0], sizes = [8, 32], strides = [1, 1]} : vector<8x96xf32> to vector<8x32xf32>
    %515 = vector.extract_strided_slice %511 {offsets = [0, 32], sizes = [8, 32], strides = [1, 1]} : vector<8x96xf32> to vector<8x32xf32>
    %516 = vector.extract_strided_slice %511 {offsets = [0, 64], sizes = [8, 32], strides = [1, 1]} : vector<8x96xf32> to vector<8x32xf32>
    %517 = arith.mulf %515, %467 : vector<8x32xf32>
    %518 = arith.mulf %514, %513 : vector<8x32xf32>
    %519 = arith.addf %517, %518 : vector<8x32xf32>
    %520 = math.tanh %519 : vector<8x32xf32>
    %521 = arith.mulf %516, %520 : vector<8x32xf32>
    %c1_205 = arith.constant 1 : index
    %c0_206 = arith.constant 0 : index
    %c0_207 = arith.constant 0 : index
    %522 = vector.load %arg4[%c1_205, %c0_206, %c0_207] : memref<8x8x64xf32, #tpu.memory_space<vmem>>, vector<1x8x32xf32>
    %523 = vector.shape_cast %522 : vector<1x8x32xf32> to vector<8x32xf32>
    %524 = vector.shape_cast %521 : vector<8x32xf32> to vector<1x8x32xf32>
    tpu.vector_store %arg4[%c1_205, %c0_206, %c0_207], %524 {strides = array<i32>} : memref<8x8x64xf32, #tpu.memory_space<vmem>>, vector<1x8x32xf32>,
    %c6_208 = arith.constant 6 : index
    %c0_209 = arith.constant 0 : index
    %c128_210 = arith.constant 128 : index
    %525 = vector.load %arg5[%c6_208, %c0_209, %c128_210] : memref<8x8x256xf32, #tpu.memory_space<vmem>>, vector<1x8x128xf32>
    %526 = vector.shape_cast %525 : vector<1x8x128xf32> to vector<8x128xf32>
    %527 = vector.extract_strided_slice %499 {offsets = [0, 128], sizes = [8, 128], strides = [1, 1]} : vector<8x256xf32> to vector<8x128xf32>
    %528 = arith.addf %526, %527 : vector<8x128xf32>
    %529 = vector.extract_strided_slice %528 {offsets = [0, 0], sizes = [8, 96], strides = [1, 1]} : vector<8x128xf32> to vector<8x96xf32>
    %cst_211 = arith.constant 5.000000e-01 : f32
    %530 = vector.broadcast %cst_211 : f32 to vector<8x96xf32>
    %531 = arith.mulf %530, %529 : vector<8x96xf32>
    %532 = math.tanh %531 : vector<8x96xf32>
    %cst_212 = arith.constant 5.000000e-01 : f32
    %533 = vector.broadcast %cst_212 : f32 to vector<8x96xf32>
    %534 = arith.mulf %533, %532 : vector<8x96xf32>
    %cst_213 = arith.constant 5.000000e-01 : f32
    %535 = vector.broadcast %cst_213 : f32 to vector<8x96xf32>
    %536 = arith.addf %534, %535 : vector<8x96xf32>
    %537 = vector.extract_strided_slice %528 {offsets = [0, 96], sizes = [8, 32], strides = [1, 1]} : vector<8x128xf32> to vector<8x32xf32>
    %538 = math.tanh %537 : vector<8x32xf32>
    %539 = vector.extract_strided_slice %536 {offsets = [0, 0], sizes = [8, 32], strides = [1, 1]} : vector<8x96xf32> to vector<8x32xf32>
    %540 = vector.extract_strided_slice %536 {offsets = [0, 32], sizes = [8, 32], strides = [1, 1]} : vector<8x96xf32> to vector<8x32xf32>
    %541 = vector.extract_strided_slice %536 {offsets = [0, 64], sizes = [8, 32], strides = [1, 1]} : vector<8x96xf32> to vector<8x32xf32>
    %542 = arith.mulf %540, %492 : vector<8x32xf32>
    %543 = arith.mulf %539, %538 : vector<8x32xf32>
    %544 = arith.addf %542, %543 : vector<8x32xf32>
    %545 = math.tanh %544 : vector<8x32xf32>
    %546 = arith.mulf %541, %545 : vector<8x32xf32>
    %c6_214 = arith.constant 6 : index
    %c0_215 = arith.constant 0 : index
    %c32_216 = arith.constant 32 : index
    %547 = vector.load %arg4[%c6_214, %c0_215, %c32_216] : memref<8x8x64xf32, #tpu.memory_space<vmem>>, vector<1x8x32xf32>
    %548 = vector.shape_cast %547 : vector<1x8x32xf32> to vector<8x32xf32>
    %549 = vector.shape_cast %546 : vector<8x32xf32> to vector<1x8x32xf32>
    tpu.vector_store %arg4[%c6_214, %c0_215, %c32_216], %549 {strides = array<i32>} : memref<8x8x64xf32, #tpu.memory_space<vmem>>, vector<1x8x32xf32>,
    %550 = tpu.concatenate %521, %546 in 1 : vector<8x32xf32>, vector<8x32xf32> -> vector<8x64xf32>
    %cst_217 = arith.constant dense<0.000000e+00> : vector<8x256xf32>
    %551 = tpu.matmul %550, %443, %cst_217 {dimension_numbers = #tpu.dot_dimension_numbers<[1], [0], [0], [1], [0, 0, 1, 1], [], []>} : vector<8x64xf32>, vector<64x256xf32>, vector<8x256xf32> -> vector<8x256xf32>
    %c2_218 = arith.constant 2 : index
    %c0_219 = arith.constant 0 : index
    %c0_220 = arith.constant 0 : index
    %552 = vector.load %arg5[%c2_218, %c0_219, %c0_220] : memref<8x8x256xf32, #tpu.memory_space<vmem>>, vector<1x8x128xf32>
    %553 = vector.shape_cast %552 : vector<1x8x128xf32> to vector<8x128xf32>
    %554 = vector.extract_strided_slice %551 {offsets = [0, 0], sizes = [8, 128], strides = [1, 1]} : vector<8x256xf32> to vector<8x128xf32>
    %555 = arith.addf %553, %554 : vector<8x128xf32>
    %556 = vector.extract_strided_slice %555 {offsets = [0, 0], sizes = [8, 96], strides = [1, 1]} : vector<8x128xf32> to vector<8x96xf32>
    %cst_221 = arith.constant 5.000000e-01 : f32
    %557 = vector.broadcast %cst_221 : f32 to vector<8x96xf32>
    %558 = arith.mulf %557, %556 : vector<8x96xf32>
    %559 = math.tanh %558 : vector<8x96xf32>
    %cst_222 = arith.constant 5.000000e-01 : f32
    %560 = vector.broadcast %cst_222 : f32 to vector<8x96xf32>
    %561 = arith.mulf %560, %559 : vector<8x96xf32>
    %cst_223 = arith.constant 5.000000e-01 : f32
    %562 = vector.broadcast %cst_223 : f32 to vector<8x96xf32>
    %563 = arith.addf %561, %562 : vector<8x96xf32>
    %564 = vector.extract_strided_slice %555 {offsets = [0, 96], sizes = [8, 32], strides = [1, 1]} : vector<8x128xf32> to vector<8x32xf32>
    %565 = math.tanh %564 : vector<8x32xf32>
    %566 = vector.extract_strided_slice %563 {offsets = [0, 0], sizes = [8, 32], strides = [1, 1]} : vector<8x96xf32> to vector<8x32xf32>
    %567 = vector.extract_strided_slice %563 {offsets = [0, 32], sizes = [8, 32], strides = [1, 1]} : vector<8x96xf32> to vector<8x32xf32>
    %568 = vector.extract_strided_slice %563 {offsets = [0, 64], sizes = [8, 32], strides = [1, 1]} : vector<8x96xf32> to vector<8x32xf32>
    %569 = arith.mulf %567, %519 : vector<8x32xf32>
    %570 = arith.mulf %566, %565 : vector<8x32xf32>
    %571 = arith.addf %569, %570 : vector<8x32xf32>
    %572 = math.tanh %571 : vector<8x32xf32>
    %573 = arith.mulf %568, %572 : vector<8x32xf32>
    %c2_224 = arith.constant 2 : index
    %c0_225 = arith.constant 0 : index
    %c0_226 = arith.constant 0 : index
    %574 = vector.load %arg4[%c2_224, %c0_225, %c0_226] : memref<8x8x64xf32, #tpu.memory_space<vmem>>, vector<1x8x32xf32>
    %575 = vector.shape_cast %574 : vector<1x8x32xf32> to vector<8x32xf32>
    %576 = vector.shape_cast %573 : vector<8x32xf32> to vector<1x8x32xf32>
    tpu.vector_store %arg4[%c2_224, %c0_225, %c0_226], %576 {strides = array<i32>} : memref<8x8x64xf32, #tpu.memory_space<vmem>>, vector<1x8x32xf32>,
    %c5_227 = arith.constant 5 : index
    %c0_228 = arith.constant 0 : index
    %c128_229 = arith.constant 128 : index
    %577 = vector.load %arg5[%c5_227, %c0_228, %c128_229] : memref<8x8x256xf32, #tpu.memory_space<vmem>>, vector<1x8x128xf32>
    %578 = vector.shape_cast %577 : vector<1x8x128xf32> to vector<8x128xf32>
    %579 = vector.extract_strided_slice %551 {offsets = [0, 128], sizes = [8, 128], strides = [1, 1]} : vector<8x256xf32> to vector<8x128xf32>
    %580 = arith.addf %578, %579 : vector<8x128xf32>
    %581 = vector.extract_strided_slice %580 {offsets = [0, 0], sizes = [8, 96], strides = [1, 1]} : vector<8x128xf32> to vector<8x96xf32>
    %cst_230 = arith.constant 5.000000e-01 : f32
    %582 = vector.broadcast %cst_230 : f32 to vector<8x96xf32>
    %583 = arith.mulf %582, %581 : vector<8x96xf32>
    %584 = math.tanh %583 : vector<8x96xf32>
    %cst_231 = arith.constant 5.000000e-01 : f32
    %585 = vector.broadcast %cst_231 : f32 to vector<8x96xf32>
    %586 = arith.mulf %585, %584 : vector<8x96xf32>
    %cst_232 = arith.constant 5.000000e-01 : f32
    %587 = vector.broadcast %cst_232 : f32 to vector<8x96xf32>
    %588 = arith.addf %586, %587 : vector<8x96xf32>
    %589 = vector.extract_strided_slice %580 {offsets = [0, 96], sizes = [8, 32], strides = [1, 1]} : vector<8x128xf32> to vector<8x32xf32>
    %590 = math.tanh %589 : vector<8x32xf32>
    %591 = vector.extract_strided_slice %588 {offsets = [0, 0], sizes = [8, 32], strides = [1, 1]} : vector<8x96xf32> to vector<8x32xf32>
    %592 = vector.extract_strided_slice %588 {offsets = [0, 32], sizes = [8, 32], strides = [1, 1]} : vector<8x96xf32> to vector<8x32xf32>
    %593 = vector.extract_strided_slice %588 {offsets = [0, 64], sizes = [8, 32], strides = [1, 1]} : vector<8x96xf32> to vector<8x32xf32>
    %594 = arith.mulf %592, %544 : vector<8x32xf32>
    %595 = arith.mulf %591, %590 : vector<8x32xf32>
    %596 = arith.addf %594, %595 : vector<8x32xf32>
    %597 = math.tanh %596 : vector<8x32xf32>
    %598 = arith.mulf %593, %597 : vector<8x32xf32>
    %c5_233 = arith.constant 5 : index
    %c0_234 = arith.constant 0 : index
    %c32_235 = arith.constant 32 : index
    %599 = vector.load %arg4[%c5_233, %c0_234, %c32_235] : memref<8x8x64xf32, #tpu.memory_space<vmem>>, vector<1x8x32xf32>
    %600 = vector.shape_cast %599 : vector<1x8x32xf32> to vector<8x32xf32>
    %601 = vector.shape_cast %598 : vector<8x32xf32> to vector<1x8x32xf32>
    tpu.vector_store %arg4[%c5_233, %c0_234, %c32_235], %601 {strides = array<i32>} : memref<8x8x64xf32, #tpu.memory_space<vmem>>, vector<1x8x32xf32>,
    %602 = tpu.concatenate %573, %598 in 1 : vector<8x32xf32>, vector<8x32xf32> -> vector<8x64xf32>
    %cst_236 = arith.constant dense<0.000000e+00> : vector<8x256xf32>
    %603 = tpu.matmul %602, %443, %cst_236 {dimension_numbers = #tpu.dot_dimension_numbers<[1], [0], [0], [1], [0, 0, 1, 1], [], []>} : vector<8x64xf32>, vector<64x256xf32>, vector<8x256xf32> -> vector<8x256xf32>
    %c3_237 = arith.constant 3 : index
    %c0_238 = arith.constant 0 : index
    %c0_239 = arith.constant 0 : index
    %604 = vector.load %arg5[%c3_237, %c0_238, %c0_239] : memref<8x8x256xf32, #tpu.memory_space<vmem>>, vector<1x8x128xf32>
    %605 = vector.shape_cast %604 : vector<1x8x128xf32> to vector<8x128xf32>
    %606 = vector.extract_strided_slice %603 {offsets = [0, 0], sizes = [8, 128], strides = [1, 1]} : vector<8x256xf32> to vector<8x128xf32>
    %607 = arith.addf %605, %606 : vector<8x128xf32>
    %608 = vector.extract_strided_slice %607 {offsets = [0, 0], sizes = [8, 96], strides = [1, 1]} : vector<8x128xf32> to vector<8x96xf32>
    %cst_240 = arith.constant 5.000000e-01 : f32
    %609 = vector.broadcast %cst_240 : f32 to vector<8x96xf32>
    %610 = arith.mulf %609, %608 : vector<8x96xf32>
    %611 = math.tanh %610 : vector<8x96xf32>
    %cst_241 = arith.constant 5.000000e-01 : f32
    %612 = vector.broadcast %cst_241 : f32 to vector<8x96xf32>
    %613 = arith.mulf %612, %611 : vector<8x96xf32>
    %cst_242 = arith.constant 5.000000e-01 : f32
    %614 = vector.broadcast %cst_242 : f32 to vector<8x96xf32>
    %615 = arith.addf %613, %614 : vector<8x96xf32>
    %616 = vector.extract_strided_slice %607 {offsets = [0, 96], sizes = [8, 32], strides = [1, 1]} : vector<8x128xf32> to vector<8x32xf32>
    %617 = math.tanh %616 : vector<8x32xf32>
    %618 = vector.extract_strided_slice %615 {offsets = [0, 0], sizes = [8, 32], strides = [1, 1]} : vector<8x96xf32> to vector<8x32xf32>
    %619 = vector.extract_strided_slice %615 {offsets = [0, 32], sizes = [8, 32], strides = [1, 1]} : vector<8x96xf32> to vector<8x32xf32>
    %620 = vector.extract_strided_slice %615 {offsets = [0, 64], sizes = [8, 32], strides = [1, 1]} : vector<8x96xf32> to vector<8x32xf32>
    %621 = arith.mulf %619, %571 : vector<8x32xf32>
    %622 = arith.mulf %618, %617 : vector<8x32xf32>
    %623 = arith.addf %621, %622 : vector<8x32xf32>
    %624 = math.tanh %623 : vector<8x32xf32>
    %625 = arith.mulf %620, %624 : vector<8x32xf32>
    %c3_243 = arith.constant 3 : index
    %c0_244 = arith.constant 0 : index
    %c0_245 = arith.constant 0 : index
    %626 = vector.load %arg4[%c3_243, %c0_244, %c0_245] : memref<8x8x64xf32, #tpu.memory_space<vmem>>, vector<1x8x32xf32>
    %627 = vector.shape_cast %626 : vector<1x8x32xf32> to vector<8x32xf32>
    %628 = vector.shape_cast %625 : vector<8x32xf32> to vector<1x8x32xf32>
    tpu.vector_store %arg4[%c3_243, %c0_244, %c0_245], %628 {strides = array<i32>} : memref<8x8x64xf32, #tpu.memory_space<vmem>>, vector<1x8x32xf32>,
    %c4_246 = arith.constant 4 : index
    %c0_247 = arith.constant 0 : index
    %c128_248 = arith.constant 128 : index
    %629 = vector.load %arg5[%c4_246, %c0_247, %c128_248] : memref<8x8x256xf32, #tpu.memory_space<vmem>>, vector<1x8x128xf32>
    %630 = vector.shape_cast %629 : vector<1x8x128xf32> to vector<8x128xf32>
    %631 = vector.extract_strided_slice %603 {offsets = [0, 128], sizes = [8, 128], strides = [1, 1]} : vector<8x256xf32> to vector<8x128xf32>
    %632 = arith.addf %630, %631 : vector<8x128xf32>
    %633 = vector.extract_strided_slice %632 {offsets = [0, 0], sizes = [8, 96], strides = [1, 1]} : vector<8x128xf32> to vector<8x96xf32>
    %cst_249 = arith.constant 5.000000e-01 : f32
    %634 = vector.broadcast %cst_249 : f32 to vector<8x96xf32>
    %635 = arith.mulf %634, %633 : vector<8x96xf32>
    %636 = math.tanh %635 : vector<8x96xf32>
    %cst_250 = arith.constant 5.000000e-01 : f32
    %637 = vector.broadcast %cst_250 : f32 to vector<8x96xf32>
    %638 = arith.mulf %637, %636 : vector<8x96xf32>
    %cst_251 = arith.constant 5.000000e-01 : f32
    %639 = vector.broadcast %cst_251 : f32 to vector<8x96xf32>
    %640 = arith.addf %638, %639 : vector<8x96xf32>
    %641 = vector.extract_strided_slice %632 {offsets = [0, 96], sizes = [8, 32], strides = [1, 1]} : vector<8x128xf32> to vector<8x32xf32>
    %642 = math.tanh %641 : vector<8x32xf32>
    %643 = vector.extract_strided_slice %640 {offsets = [0, 0], sizes = [8, 32], strides = [1, 1]} : vector<8x96xf32> to vector<8x32xf32>
    %644 = vector.extract_strided_slice %640 {offsets = [0, 32], sizes = [8, 32], strides = [1, 1]} : vector<8x96xf32> to vector<8x32xf32>
    %645 = vector.extract_strided_slice %640 {offsets = [0, 64], sizes = [8, 32], strides = [1, 1]} : vector<8x96xf32> to vector<8x32xf32>
    %646 = arith.mulf %644, %596 : vector<8x32xf32>
    %647 = arith.mulf %643, %642 : vector<8x32xf32>
    %648 = arith.addf %646, %647 : vector<8x32xf32>
    %649 = math.tanh %648 : vector<8x32xf32>
    %650 = arith.mulf %645, %649 : vector<8x32xf32>
    %c4_252 = arith.constant 4 : index
    %c0_253 = arith.constant 0 : index
    %c32_254 = arith.constant 32 : index
    %651 = vector.load %arg4[%c4_252, %c0_253, %c32_254] : memref<8x8x64xf32, #tpu.memory_space<vmem>>, vector<1x8x32xf32>
    %652 = vector.shape_cast %651 : vector<1x8x32xf32> to vector<8x32xf32>
    %653 = vector.shape_cast %650 : vector<8x32xf32> to vector<1x8x32xf32>
    tpu.vector_store %arg4[%c4_252, %c0_253, %c32_254], %653 {strides = array<i32>} : memref<8x8x64xf32, #tpu.memory_space<vmem>>, vector<1x8x32xf32>,
    %654 = tpu.concatenate %625, %650 in 1 : vector<8x32xf32>, vector<8x32xf32> -> vector<8x64xf32>
    %cst_255 = arith.constant dense<0.000000e+00> : vector<8x256xf32>
    %655 = tpu.matmul %654, %443, %cst_255 {dimension_numbers = #tpu.dot_dimension_numbers<[1], [0], [0], [1], [0, 0, 1, 1], [], []>} : vector<8x64xf32>, vector<64x256xf32>, vector<8x256xf32> -> vector<8x256xf32>
    %c4_256 = arith.constant 4 : index
    %c0_257 = arith.constant 0 : index
    %c0_258 = arith.constant 0 : index
    %656 = vector.load %arg5[%c4_256, %c0_257, %c0_258] : memref<8x8x256xf32, #tpu.memory_space<vmem>>, vector<1x8x128xf32>
    %657 = vector.shape_cast %656 : vector<1x8x128xf32> to vector<8x128xf32>
    %658 = vector.extract_strided_slice %655 {offsets = [0, 0], sizes = [8, 128], strides = [1, 1]} : vector<8x256xf32> to vector<8x128xf32>
    %659 = arith.addf %657, %658 : vector<8x128xf32>
    %660 = vector.extract_strided_slice %659 {offsets = [0, 0], sizes = [8, 96], strides = [1, 1]} : vector<8x128xf32> to vector<8x96xf32>
    %cst_259 = arith.constant 5.000000e-01 : f32
    %661 = vector.broadcast %cst_259 : f32 to vector<8x96xf32>
    %662 = arith.mulf %661, %660 : vector<8x96xf32>
    %663 = math.tanh %662 : vector<8x96xf32>
    %cst_260 = arith.constant 5.000000e-01 : f32
    %664 = vector.broadcast %cst_260 : f32 to vector<8x96xf32>
    %665 = arith.mulf %664, %663 : vector<8x96xf32>
    %cst_261 = arith.constant 5.000000e-01 : f32
    %666 = vector.broadcast %cst_261 : f32 to vector<8x96xf32>
    %667 = arith.addf %665, %666 : vector<8x96xf32>
    %668 = vector.extract_strided_slice %659 {offsets = [0, 96], sizes = [8, 32], strides = [1, 1]} : vector<8x128xf32> to vector<8x32xf32>
    %669 = math.tanh %668 : vector<8x32xf32>
    %670 = vector.extract_strided_slice %667 {offsets = [0, 0], sizes = [8, 32], strides = [1, 1]} : vector<8x96xf32> to vector<8x32xf32>
    %671 = vector.extract_strided_slice %667 {offsets = [0, 32], sizes = [8, 32], strides = [1, 1]} : vector<8x96xf32> to vector<8x32xf32>
    %672 = vector.extract_strided_slice %667 {offsets = [0, 64], sizes = [8, 32], strides = [1, 1]} : vector<8x96xf32> to vector<8x32xf32>
    %673 = arith.mulf %671, %623 : vector<8x32xf32>
    %674 = arith.mulf %670, %669 : vector<8x32xf32>
    %675 = arith.addf %673, %674 : vector<8x32xf32>
    %676 = math.tanh %675 : vector<8x32xf32>
    %677 = arith.mulf %672, %676 : vector<8x32xf32>
    %c4_262 = arith.constant 4 : index
    %c0_263 = arith.constant 0 : index
    %c0_264 = arith.constant 0 : index
    %678 = vector.load %arg4[%c4_262, %c0_263, %c0_264] : memref<8x8x64xf32, #tpu.memory_space<vmem>>, vector<1x8x32xf32>
    %679 = vector.shape_cast %678 : vector<1x8x32xf32> to vector<8x32xf32>
    %680 = vector.shape_cast %677 : vector<8x32xf32> to vector<1x8x32xf32>
    tpu.vector_store %arg4[%c4_262, %c0_263, %c0_264], %680 {strides = array<i32>} : memref<8x8x64xf32, #tpu.memory_space<vmem>>, vector<1x8x32xf32>,
    %c3_265 = arith.constant 3 : index
    %c0_266 = arith.constant 0 : index
    %c128_267 = arith.constant 128 : index
    %681 = vector.load %arg5[%c3_265, %c0_266, %c128_267] : memref<8x8x256xf32, #tpu.memory_space<vmem>>, vector<1x8x128xf32>
    %682 = vector.shape_cast %681 : vector<1x8x128xf32> to vector<8x128xf32>
    %683 = vector.extract_strided_slice %655 {offsets = [0, 128], sizes = [8, 128], strides = [1, 1]} : vector<8x256xf32> to vector<8x128xf32>
    %684 = arith.addf %682, %683 : vector<8x128xf32>
    %685 = vector.extract_strided_slice %684 {offsets = [0, 0], sizes = [8, 96], strides = [1, 1]} : vector<8x128xf32> to vector<8x96xf32>
    %cst_268 = arith.constant 5.000000e-01 : f32
    %686 = vector.broadcast %cst_268 : f32 to vector<8x96xf32>
    %687 = arith.mulf %686, %685 : vector<8x96xf32>
    %688 = math.tanh %687 : vector<8x96xf32>
    %cst_269 = arith.constant 5.000000e-01 : f32
    %689 = vector.broadcast %cst_269 : f32 to vector<8x96xf32>
    %690 = arith.mulf %689, %688 : vector<8x96xf32>
    %cst_270 = arith.constant 5.000000e-01 : f32
    %691 = vector.broadcast %cst_270 : f32 to vector<8x96xf32>
    %692 = arith.addf %690, %691 : vector<8x96xf32>
    %693 = vector.extract_strided_slice %684 {offsets = [0, 96], sizes = [8, 32], strides = [1, 1]} : vector<8x128xf32> to vector<8x32xf32>
    %694 = math.tanh %693 : vector<8x32xf32>
    %695 = vector.extract_strided_slice %692 {offsets = [0, 0], sizes = [8, 32], strides = [1, 1]} : vector<8x96xf32> to vector<8x32xf32>
    %696 = vector.extract_strided_slice %692 {offsets = [0, 32], sizes = [8, 32], strides = [1, 1]} : vector<8x96xf32> to vector<8x32xf32>
    %697 = vector.extract_strided_slice %692 {offsets = [0, 64], sizes = [8, 32], strides = [1, 1]} : vector<8x96xf32> to vector<8x32xf32>
    %698 = arith.mulf %696, %648 : vector<8x32xf32>
    %699 = arith.mulf %695, %694 : vector<8x32xf32>
    %700 = arith.addf %698, %699 : vector<8x32xf32>
    %701 = math.tanh %700 : vector<8x32xf32>
    %702 = arith.mulf %697, %701 : vector<8x32xf32>
    %c3_271 = arith.constant 3 : index
    %c0_272 = arith.constant 0 : index
    %c32_273 = arith.constant 32 : index
    %703 = vector.load %arg4[%c3_271, %c0_272, %c32_273] : memref<8x8x64xf32, #tpu.memory_space<vmem>>, vector<1x8x32xf32>
    %704 = vector.shape_cast %703 : vector<1x8x32xf32> to vector<8x32xf32>
    %705 = vector.shape_cast %702 : vector<8x32xf32> to vector<1x8x32xf32>
    tpu.vector_store %arg4[%c3_271, %c0_272, %c32_273], %705 {strides = array<i32>} : memref<8x8x64xf32, #tpu.memory_space<vmem>>, vector<1x8x32xf32>,
    %706 = tpu.concatenate %677, %702 in 1 : vector<8x32xf32>, vector<8x32xf32> -> vector<8x64xf32>
    %cst_274 = arith.constant dense<0.000000e+00> : vector<8x256xf32>
    %707 = tpu.matmul %706, %443, %cst_274 {dimension_numbers = #tpu.dot_dimension_numbers<[1], [0], [0], [1], [0, 0, 1, 1], [], []>} : vector<8x64xf32>, vector<64x256xf32>, vector<8x256xf32> -> vector<8x256xf32>
    %c5_275 = arith.constant 5 : index
    %c0_276 = arith.constant 0 : index
    %c0_277 = arith.constant 0 : index
    %708 = vector.load %arg5[%c5_275, %c0_276, %c0_277] : memref<8x8x256xf32, #tpu.memory_space<vmem>>, vector<1x8x128xf32>
    %709 = vector.shape_cast %708 : vector<1x8x128xf32> to vector<8x128xf32>
    %710 = vector.extract_strided_slice %707 {offsets = [0, 0], sizes = [8, 128], strides = [1, 1]} : vector<8x256xf32> to vector<8x128xf32>
    %711 = arith.addf %709, %710 : vector<8x128xf32>
    %712 = vector.extract_strided_slice %711 {offsets = [0, 0], sizes = [8, 96], strides = [1, 1]} : vector<8x128xf32> to vector<8x96xf32>
    %cst_278 = arith.constant 5.000000e-01 : f32
    %713 = vector.broadcast %cst_278 : f32 to vector<8x96xf32>
    %714 = arith.mulf %713, %712 : vector<8x96xf32>
    %715 = math.tanh %714 : vector<8x96xf32>
    %cst_279 = arith.constant 5.000000e-01 : f32
    %716 = vector.broadcast %cst_279 : f32 to vector<8x96xf32>
    %717 = arith.mulf %716, %715 : vector<8x96xf32>
    %cst_280 = arith.constant 5.000000e-01 : f32
    %718 = vector.broadcast %cst_280 : f32 to vector<8x96xf32>
    %719 = arith.addf %717, %718 : vector<8x96xf32>
    %720 = vector.extract_strided_slice %711 {offsets = [0, 96], sizes = [8, 32], strides = [1, 1]} : vector<8x128xf32> to vector<8x32xf32>
    %721 = math.tanh %720 : vector<8x32xf32>
    %722 = vector.extract_strided_slice %719 {offsets = [0, 0], sizes = [8, 32], strides = [1, 1]} : vector<8x96xf32> to vector<8x32xf32>
    %723 = vector.extract_strided_slice %719 {offsets = [0, 32], sizes = [8, 32], strides = [1, 1]} : vector<8x96xf32> to vector<8x32xf32>
    %724 = vector.extract_strided_slice %719 {offsets = [0, 64], sizes = [8, 32], strides = [1, 1]} : vector<8x96xf32> to vector<8x32xf32>
    %725 = arith.mulf %723, %675 : vector<8x32xf32>
    %726 = arith.mulf %722, %721 : vector<8x32xf32>
    %727 = arith.addf %725, %726 : vector<8x32xf32>
    %728 = math.tanh %727 : vector<8x32xf32>
    %729 = arith.mulf %724, %728 : vector<8x32xf32>
    %c5_281 = arith.constant 5 : index
    %c0_282 = arith.constant 0 : index
    %c0_283 = arith.constant 0 : index
    %730 = vector.load %arg4[%c5_281, %c0_282, %c0_283] : memref<8x8x64xf32, #tpu.memory_space<vmem>>, vector<1x8x32xf32>
    %731 = vector.shape_cast %730 : vector<1x8x32xf32> to vector<8x32xf32>
    %732 = vector.shape_cast %729 : vector<8x32xf32> to vector<1x8x32xf32>
    tpu.vector_store %arg4[%c5_281, %c0_282, %c0_283], %732 {strides = array<i32>} : memref<8x8x64xf32, #tpu.memory_space<vmem>>, vector<1x8x32xf32>,
    %c2_284 = arith.constant 2 : index
    %c0_285 = arith.constant 0 : index
    %c128_286 = arith.constant 128 : index
    %733 = vector.load %arg5[%c2_284, %c0_285, %c128_286] : memref<8x8x256xf32, #tpu.memory_space<vmem>>, vector<1x8x128xf32>
    %734 = vector.shape_cast %733 : vector<1x8x128xf32> to vector<8x128xf32>
    %735 = vector.extract_strided_slice %707 {offsets = [0, 128], sizes = [8, 128], strides = [1, 1]} : vector<8x256xf32> to vector<8x128xf32>
    %736 = arith.addf %734, %735 : vector<8x128xf32>
    %737 = vector.extract_strided_slice %736 {offsets = [0, 0], sizes = [8, 96], strides = [1, 1]} : vector<8x128xf32> to vector<8x96xf32>
    %cst_287 = arith.constant 5.000000e-01 : f32
    %738 = vector.broadcast %cst_287 : f32 to vector<8x96xf32>
    %739 = arith.mulf %738, %737 : vector<8x96xf32>
    %740 = math.tanh %739 : vector<8x96xf32>
    %cst_288 = arith.constant 5.000000e-01 : f32
    %741 = vector.broadcast %cst_288 : f32 to vector<8x96xf32>
    %742 = arith.mulf %741, %740 : vector<8x96xf32>
    %cst_289 = arith.constant 5.000000e-01 : f32
    %743 = vector.broadcast %cst_289 : f32 to vector<8x96xf32>
    %744 = arith.addf %742, %743 : vector<8x96xf32>
    %745 = vector.extract_strided_slice %736 {offsets = [0, 96], sizes = [8, 32], strides = [1, 1]} : vector<8x128xf32> to vector<8x32xf32>
    %746 = math.tanh %745 : vector<8x32xf32>
    %747 = vector.extract_strided_slice %744 {offsets = [0, 0], sizes = [8, 32], strides = [1, 1]} : vector<8x96xf32> to vector<8x32xf32>
    %748 = vector.extract_strided_slice %744 {offsets = [0, 32], sizes = [8, 32], strides = [1, 1]} : vector<8x96xf32> to vector<8x32xf32>
    %749 = vector.extract_strided_slice %744 {offsets = [0, 64], sizes = [8, 32], strides = [1, 1]} : vector<8x96xf32> to vector<8x32xf32>
    %750 = arith.mulf %748, %700 : vector<8x32xf32>
    %751 = arith.mulf %747, %746 : vector<8x32xf32>
    %752 = arith.addf %750, %751 : vector<8x32xf32>
    %753 = math.tanh %752 : vector<8x32xf32>
    %754 = arith.mulf %749, %753 : vector<8x32xf32>
    %c2_290 = arith.constant 2 : index
    %c0_291 = arith.constant 0 : index
    %c32_292 = arith.constant 32 : index
    %755 = vector.load %arg4[%c2_290, %c0_291, %c32_292] : memref<8x8x64xf32, #tpu.memory_space<vmem>>, vector<1x8x32xf32>
    %756 = vector.shape_cast %755 : vector<1x8x32xf32> to vector<8x32xf32>
    %757 = vector.shape_cast %754 : vector<8x32xf32> to vector<1x8x32xf32>
    tpu.vector_store %arg4[%c2_290, %c0_291, %c32_292], %757 {strides = array<i32>} : memref<8x8x64xf32, #tpu.memory_space<vmem>>, vector<1x8x32xf32>,
    %758 = tpu.concatenate %729, %754 in 1 : vector<8x32xf32>, vector<8x32xf32> -> vector<8x64xf32>
    %cst_293 = arith.constant dense<0.000000e+00> : vector<8x256xf32>
    %759 = tpu.matmul %758, %443, %cst_293 {dimension_numbers = #tpu.dot_dimension_numbers<[1], [0], [0], [1], [0, 0, 1, 1], [], []>} : vector<8x64xf32>, vector<64x256xf32>, vector<8x256xf32> -> vector<8x256xf32>
    %c6_294 = arith.constant 6 : index
    %c0_295 = arith.constant 0 : index
    %c0_296 = arith.constant 0 : index
    %760 = vector.load %arg5[%c6_294, %c0_295, %c0_296] : memref<8x8x256xf32, #tpu.memory_space<vmem>>, vector<1x8x128xf32>
    %761 = vector.shape_cast %760 : vector<1x8x128xf32> to vector<8x128xf32>
    %762 = vector.extract_strided_slice %759 {offsets = [0, 0], sizes = [8, 128], strides = [1, 1]} : vector<8x256xf32> to vector<8x128xf32>
    %763 = arith.addf %761, %762 : vector<8x128xf32>
    %764 = vector.extract_strided_slice %763 {offsets = [0, 0], sizes = [8, 96], strides = [1, 1]} : vector<8x128xf32> to vector<8x96xf32>
    %cst_297 = arith.constant 5.000000e-01 : f32
    %765 = vector.broadcast %cst_297 : f32 to vector<8x96xf32>
    %766 = arith.mulf %765, %764 : vector<8x96xf32>
    %767 = math.tanh %766 : vector<8x96xf32>
    %cst_298 = arith.constant 5.000000e-01 : f32
    %768 = vector.broadcast %cst_298 : f32 to vector<8x96xf32>
    %769 = arith.mulf %768, %767 : vector<8x96xf32>
    %cst_299 = arith.constant 5.000000e-01 : f32
    %770 = vector.broadcast %cst_299 : f32 to vector<8x96xf32>
    %771 = arith.addf %769, %770 : vector<8x96xf32>
    %772 = vector.extract_strided_slice %763 {offsets = [0, 96], sizes = [8, 32], strides = [1, 1]} : vector<8x128xf32> to vector<8x32xf32>
    %773 = math.tanh %772 : vector<8x32xf32>
    %774 = vector.extract_strided_slice %771 {offsets = [0, 0], sizes = [8, 32], strides = [1, 1]} : vector<8x96xf32> to vector<8x32xf32>
    %775 = vector.extract_strided_slice %771 {offsets = [0, 32], sizes = [8, 32], strides = [1, 1]} : vector<8x96xf32> to vector<8x32xf32>
    %776 = vector.extract_strided_slice %771 {offsets = [0, 64], sizes = [8, 32], strides = [1, 1]} : vector<8x96xf32> to vector<8x32xf32>
    %777 = arith.mulf %775, %727 : vector<8x32xf32>
    %778 = arith.mulf %774, %773 : vector<8x32xf32>
    %779 = arith.addf %777, %778 : vector<8x32xf32>
    %780 = math.tanh %779 : vector<8x32xf32>
    %781 = arith.mulf %776, %780 : vector<8x32xf32>
    %c6_300 = arith.constant 6 : index
    %c0_301 = arith.constant 0 : index
    %c0_302 = arith.constant 0 : index
    %782 = vector.load %arg4[%c6_300, %c0_301, %c0_302] : memref<8x8x64xf32, #tpu.memory_space<vmem>>, vector<1x8x32xf32>
    %783 = vector.shape_cast %782 : vector<1x8x32xf32> to vector<8x32xf32>
    %784 = vector.shape_cast %781 : vector<8x32xf32> to vector<1x8x32xf32>
    tpu.vector_store %arg4[%c6_300, %c0_301, %c0_302], %784 {strides = array<i32>} : memref<8x8x64xf32, #tpu.memory_space<vmem>>, vector<1x8x32xf32>,
    %c1_303 = arith.constant 1 : index
    %c0_304 = arith.constant 0 : index
    %c128_305 = arith.constant 128 : index
    %785 = vector.load %arg5[%c1_303, %c0_304, %c128_305] : memref<8x8x256xf32, #tpu.memory_space<vmem>>, vector<1x8x128xf32>
    %786 = vector.shape_cast %785 : vector<1x8x128xf32> to vector<8x128xf32>
    %787 = vector.extract_strided_slice %759 {offsets = [0, 128], sizes = [8, 128], strides = [1, 1]} : vector<8x256xf32> to vector<8x128xf32>
    %788 = arith.addf %786, %787 : vector<8x128xf32>
    %789 = vector.extract_strided_slice %788 {offsets = [0, 0], sizes = [8, 96], strides = [1, 1]} : vector<8x128xf32> to vector<8x96xf32>
    %cst_306 = arith.constant 5.000000e-01 : f32
    %790 = vector.broadcast %cst_306 : f32 to vector<8x96xf32>
    %791 = arith.mulf %790, %789 : vector<8x96xf32>
    %792 = math.tanh %791 : vector<8x96xf32>
    %cst_307 = arith.constant 5.000000e-01 : f32
    %793 = vector.broadcast %cst_307 : f32 to vector<8x96xf32>
    %794 = arith.mulf %793, %792 : vector<8x96xf32>
    %cst_308 = arith.constant 5.000000e-01 : f32
    %795 = vector.broadcast %cst_308 : f32 to vector<8x96xf32>
    %796 = arith.addf %794, %795 : vector<8x96xf32>
    %797 = vector.extract_strided_slice %788 {offsets = [0, 96], sizes = [8, 32], strides = [1, 1]} : vector<8x128xf32> to vector<8x32xf32>
    %798 = math.tanh %797 : vector<8x32xf32>
    %799 = vector.extract_strided_slice %796 {offsets = [0, 0], sizes = [8, 32], strides = [1, 1]} : vector<8x96xf32> to vector<8x32xf32>
    %800 = vector.extract_strided_slice %796 {offsets = [0, 32], sizes = [8, 32], strides = [1, 1]} : vector<8x96xf32> to vector<8x32xf32>
    %801 = vector.extract_strided_slice %796 {offsets = [0, 64], sizes = [8, 32], strides = [1, 1]} : vector<8x96xf32> to vector<8x32xf32>
    %802 = arith.mulf %800, %752 : vector<8x32xf32>
    %803 = arith.mulf %799, %798 : vector<8x32xf32>
    %804 = arith.addf %802, %803 : vector<8x32xf32>
    %805 = math.tanh %804 : vector<8x32xf32>
    %806 = arith.mulf %801, %805 : vector<8x32xf32>
    %c1_309 = arith.constant 1 : index
    %c0_310 = arith.constant 0 : index
    %c32_311 = arith.constant 32 : index
    %807 = vector.load %arg4[%c1_309, %c0_310, %c32_311] : memref<8x8x64xf32, #tpu.memory_space<vmem>>, vector<1x8x32xf32>
    %808 = vector.shape_cast %807 : vector<1x8x32xf32> to vector<8x32xf32>
    %809 = vector.shape_cast %806 : vector<8x32xf32> to vector<1x8x32xf32>
    tpu.vector_store %arg4[%c1_309, %c0_310, %c32_311], %809 {strides = array<i32>} : memref<8x8x64xf32, #tpu.memory_space<vmem>>, vector<1x8x32xf32>,
    %810 = tpu.concatenate %781, %806 in 1 : vector<8x32xf32>, vector<8x32xf32> -> vector<8x64xf32>
    %cst_312 = arith.constant dense<0.000000e+00> : vector<8x256xf32>
    %811 = tpu.matmul %810, %443, %cst_312 {dimension_numbers = #tpu.dot_dimension_numbers<[1], [0], [0], [1], [0, 0, 1, 1], [], []>} : vector<8x64xf32>, vector<64x256xf32>, vector<8x256xf32> -> vector<8x256xf32>
    %c7_313 = arith.constant 7 : index
    %c0_314 = arith.constant 0 : index
    %c0_315 = arith.constant 0 : index
    %812 = vector.load %arg5[%c7_313, %c0_314, %c0_315] : memref<8x8x256xf32, #tpu.memory_space<vmem>>, vector<1x8x128xf32>
    %813 = vector.shape_cast %812 : vector<1x8x128xf32> to vector<8x128xf32>
    %814 = vector.extract_strided_slice %811 {offsets = [0, 0], sizes = [8, 128], strides = [1, 1]} : vector<8x256xf32> to vector<8x128xf32>
    %815 = arith.addf %813, %814 : vector<8x128xf32>
    %816 = vector.extract_strided_slice %815 {offsets = [0, 0], sizes = [8, 96], strides = [1, 1]} : vector<8x128xf32> to vector<8x96xf32>
    %cst_316 = arith.constant 5.000000e-01 : f32
    %817 = vector.broadcast %cst_316 : f32 to vector<8x96xf32>
    %818 = arith.mulf %817, %816 : vector<8x96xf32>
    %819 = math.tanh %818 : vector<8x96xf32>
    %cst_317 = arith.constant 5.000000e-01 : f32
    %820 = vector.broadcast %cst_317 : f32 to vector<8x96xf32>
    %821 = arith.mulf %820, %819 : vector<8x96xf32>
    %cst_318 = arith.constant 5.000000e-01 : f32
    %822 = vector.broadcast %cst_318 : f32 to vector<8x96xf32>
    %823 = arith.addf %821, %822 : vector<8x96xf32>
    %824 = vector.extract_strided_slice %815 {offsets = [0, 96], sizes = [8, 32], strides = [1, 1]} : vector<8x128xf32> to vector<8x32xf32>
    %825 = math.tanh %824 : vector<8x32xf32>
    %826 = vector.extract_strided_slice %823 {offsets = [0, 0], sizes = [8, 32], strides = [1, 1]} : vector<8x96xf32> to vector<8x32xf32>
    %827 = vector.extract_strided_slice %823 {offsets = [0, 32], sizes = [8, 32], strides = [1, 1]} : vector<8x96xf32> to vector<8x32xf32>
    %828 = vector.extract_strided_slice %823 {offsets = [0, 64], sizes = [8, 32], strides = [1, 1]} : vector<8x96xf32> to vector<8x32xf32>
    %829 = arith.mulf %827, %779 : vector<8x32xf32>
    %830 = arith.mulf %826, %825 : vector<8x32xf32>
    %831 = arith.addf %829, %830 : vector<8x32xf32>
    %832 = math.tanh %831 : vector<8x32xf32>
    %833 = arith.mulf %828, %832 : vector<8x32xf32>
    %c7_319 = arith.constant 7 : index
    %c0_320 = arith.constant 0 : index
    %c0_321 = arith.constant 0 : index
    %834 = vector.load %arg4[%c7_319, %c0_320, %c0_321] : memref<8x8x64xf32, #tpu.memory_space<vmem>>, vector<1x8x32xf32>
    %835 = vector.shape_cast %834 : vector<1x8x32xf32> to vector<8x32xf32>
    %836 = vector.shape_cast %833 : vector<8x32xf32> to vector<1x8x32xf32>
    tpu.vector_store %arg4[%c7_319, %c0_320, %c0_321], %836 {strides = array<i32>} : memref<8x8x64xf32, #tpu.memory_space<vmem>>, vector<1x8x32xf32>,
    %c0_322 = arith.constant 0 : index
    %c0_323 = arith.constant 0 : index
    %c128_324 = arith.constant 128 : index
    %837 = vector.load %arg5[%c0_322, %c0_323, %c128_324] : memref<8x8x256xf32, #tpu.memory_space<vmem>>, vector<1x8x128xf32>
    %838 = vector.shape_cast %837 : vector<1x8x128xf32> to vector<8x128xf32>
    %839 = vector.extract_strided_slice %811 {offsets = [0, 128], sizes = [8, 128], strides = [1, 1]} : vector<8x256xf32> to vector<8x128xf32>
    %840 = arith.addf %838, %839 : vector<8x128xf32>
    %841 = vector.extract_strided_slice %840 {offsets = [0, 0], sizes = [8, 96], strides = [1, 1]} : vector<8x128xf32> to vector<8x96xf32>
    %cst_325 = arith.constant 5.000000e-01 : f32
    %842 = vector.broadcast %cst_325 : f32 to vector<8x96xf32>
    %843 = arith.mulf %842, %841 : vector<8x96xf32>
    %844 = math.tanh %843 : vector<8x96xf32>
    %cst_326 = arith.constant 5.000000e-01 : f32
    %845 = vector.broadcast %cst_326 : f32 to vector<8x96xf32>
    %846 = arith.mulf %845, %844 : vector<8x96xf32>
    %cst_327 = arith.constant 5.000000e-01 : f32
    %847 = vector.broadcast %cst_327 : f32 to vector<8x96xf32>
    %848 = arith.addf %846, %847 : vector<8x96xf32>
    %849 = vector.extract_strided_slice %840 {offsets = [0, 96], sizes = [8, 32], strides = [1, 1]} : vector<8x128xf32> to vector<8x32xf32>
    %850 = math.tanh %849 : vector<8x32xf32>
    %851 = vector.extract_strided_slice %848 {offsets = [0, 0], sizes = [8, 32], strides = [1, 1]} : vector<8x96xf32> to vector<8x32xf32>
    %852 = vector.extract_strided_slice %848 {offsets = [0, 32], sizes = [8, 32], strides = [1, 1]} : vector<8x96xf32> to vector<8x32xf32>
    %853 = vector.extract_strided_slice %848 {offsets = [0, 64], sizes = [8, 32], strides = [1, 1]} : vector<8x96xf32> to vector<8x32xf32>
    %854 = arith.mulf %852, %804 : vector<8x32xf32>
    %855 = arith.mulf %851, %850 : vector<8x32xf32>
    %856 = arith.addf %854, %855 : vector<8x32xf32>
    %857 = math.tanh %856 : vector<8x32xf32>
    %858 = arith.mulf %853, %857 : vector<8x32xf32>
    %c0_328 = arith.constant 0 : index
    %c0_329 = arith.constant 0 : index
    %c32_330 = arith.constant 32 : index
    %859 = vector.load %arg4[%c0_328, %c0_329, %c32_330] : memref<8x8x64xf32, #tpu.memory_space<vmem>>, vector<1x8x32xf32>
    %860 = vector.shape_cast %859 : vector<1x8x32xf32> to vector<8x32xf32>
    %861 = vector.shape_cast %858 : vector<8x32xf32> to vector<1x8x32xf32>
    tpu.vector_store %arg4[%c0_328, %c0_329, %c32_330], %861 {strides = array<i32>} : memref<8x8x64xf32, #tpu.memory_space<vmem>>, vector<1x8x32xf32>,
    return
  }
}

</mosaic_0001>

<bundles_post_ra>
// kernel: char_lstm_forward.1
= control target key start
LH: loop header
LB: loop body
LE: loop exit
PB: predicated region body
PF: predicated region fallthrough
CT: control target
= control target key end

     0   :  { %9 = vsyncpa [#allocation4], 0  ;;  %s3907_s0 = inlined_call_operand.vmem [shape: f32[8,8,64], index: 0, kind: input, shape index: {}]   ;;  %s3908_s1 = inlined_call_operand.hbm [shape: f32[2,64,256], index: 1, kind: input, shape index: {}]   ;;  %s3909_s2 = inlined_call_operand.hbm [shape: f32[2,64,256], index: 2, kind: input, shape index: {}]   ;;  %s3910_s3 = inlined_call_operand.vmem [shape: f32[2,1,256], index: 3, kind: input, shape index: {}]   ;;  %s3911_s4 = inlined_call_operand.vmem [shape: f32[8,8,64], index: 4, kind: output, shape index: {}]  }
   0x1   :  { %10 = vsyncpa [#allocation6], 0  ;;  %s3199_s15 = smov [#allocation3]   ;;  %s3151_s19 = scalar_lea.hbm %s3908_s1, 4096 }
   0x2   :  { %s18_s16 = sshll.u32 %s3199_s15, 4  ;;  %p3152_p0 = scmp.ne.s32.totalorder %s3908_s1, %s3151_s19  ;;  %s19_s16 = int_to_ptr.vmem [resolvable:$true] %s18_s16 }
   0x3   :  { %p3155_p1 = scmp.lt.u32.totalorder %s3151_s19, %s3908_s1 }
   0x5   :  { %p3157_p2 = pnand %p3155_p1, %p3152_p0 }
   0x7   :  { %3160 = shalt.err (!%p3157_p2)
}
   0x8   :  { %s3161_s24 = scalar_lea.vmem %s19_s16, 4096  ;;  %p3166_p4 = scmp.lt.s32.totalorder %s19_s16, %s19_s16 }
   0x9   :  { %p3162_p3 = scmp.ne.s32.totalorder %s19_s16, %s3161_s24  ;;  %p3167_p5 = scmp.lt.s32.totalorder %s3161_s24, %s3161_s24 }
   0xb   :  { %p3168_p6 = por %p3167_p5, %p3166_p4 }
   0xd   :  { %p3169_p7 = pnand %p3168_p6, %p3162_p3 }
   0xf   :  { %3172 = shalt.err (!%p3169_p7)
}
  0x10   :  { %s3200_s25 = smov 256   ;;  %s3201_s26 = smov 16  }
  0x11   :  { %24 = dma.hbm_to_vmem [thread:$0]  %s3908_s1, 4096, %s19_s16, [#allocation4], %s3200_s25, %s3200_s25, %s3201_s26  }
  0x12   :  { %s3202_s29 = smov [#allocation5]   ;;  %s3173_s7 = scalar_lea.hbm %s3909_s2, 4096 }
  0x13   :  { %s30_s30 = sshll.u32 %s3202_s29, 4  ;;  %p3174_p8 = scmp.ne.s32.totalorder %s3909_s2, %s3173_s7  ;;  %s31_s30 = int_to_ptr.vmem [resolvable:$true] %s30_s30 }
  0x14   :  { %p3177_p9 = scmp.lt.u32.totalorder %s3173_s7, %s3909_s2 }
  0x16   :  { %p3179_p10 = pnand %p3177_p9, %p3174_p8 }
  0x18   :  { %3182 = shalt.err (!%p3179_p10)
}
  0x19   :  { %s3183_s12 = scalar_lea.vmem %s31_s30, 4096  ;;  %p3188_p12 = scmp.lt.s32.totalorder %s31_s30, %s31_s30 }
  0x1a   :  { %p3184_p11 = scmp.ne.s32.totalorder %s31_s30, %s3183_s12  ;;  %p3189_p13 = scmp.lt.s32.totalorder %s3183_s12, %s3183_s12 }
  0x1c   :  { %p3190_p0 = por %p3189_p13, %p3188_p12 }
  0x1e   :  { %p3191_p1 = pnand %p3190_p0, %p3184_p11 }
  0x20   :  { %3194 = shalt.err (!%p3191_p1)
}
  0x21   :  { %36 = dma.hbm_to_vmem [thread:$0]  %s3909_s2, 4096, %s31_s30, [#allocation6], %s3200_s25, %s3200_s25, %s3201_s26  }
  0x22   :  { %3195 = dma.done.wait [#allocation4], 4096  }
  0x23   :  { %3196 = vsyncadd [#allocation4], 4294963200 }
  0x24   :  { %3197 = dma.done.wait [#allocation6], 4096  }
  0x25   :  { %3198 = vsyncadd [#allocation6], 4294963200  ;;  %v3203_v0 = vmov 0.0   ;;  %v54_v1 = vld [vmem:[#allocation3 + $0x8] sm:$0xff]  ;;  %v56_v2 = vld [vmem:[#allocation3 + $0x18] sm:$0xff]  ;;  %vm81_vm0 = vcmask 523264   ;;  %v71_v57 = vlaneseq }
  0x26   :  { %170 = vmatprep.mubr.f32.mxu0 %v3203_v0  ;;  %318 = vmatprep.mubr.f32.mxu1 %v3203_v0  ;;  %v53_v3 = vld [vmem:[#allocation3] sm:$0xff]  ;;  %v2663_v4 = vpack.c.bf16 %v56_v2, %v54_v1  ;;  %v55_v5 = vld [vmem:[#allocation3 + $0x10] sm:$0xff]  ;;  %v236_v6 = vld [vmem:[#allocation5 + $0x8] sm:$0xff]  ;;  %s3205_s5 = smov 64   ;;  %s3206_s6 = smov 96   ;;  %vm353_vm1 = vcmask 261120  }
  0x27   :  { %v238_v7 = vld [vmem:[#allocation5 + $0x18] sm:$0xff]  ;;  %v2665_v8 = vpack.c.bf16 %v55_v5, %v53_v3  ;;  %v235_v10 = vld [vmem:[#allocation5] sm:$0xff]  ;;  %v237_v11 = vld [vmem:[#allocation5 + $0x10] sm:$0xff]  ;;  %v3342_v58 = vshrl.u32 %v71_v57, 7  ;;  %vm385_vm2 = vcmask 523520  }
  0x28   :  { %v3258_v9 = vpack.c.bf16 %v238_v7, %v236_v6  ;;  %v58_v12 = vld [vmem:[#allocation3 + $0x28] sm:$0xff]  ;;  %2664 = vmatprep.subr.bf16.mxu0 %v2663_v4  ;;  %v3260_v13 = vpack.c.bf16 %v237_v11, %v235_v10  ;;  %v60_v14 = vld [vmem:[#allocation3 + $0x38] sm:$0xff]  ;;  %v57_v15 = vld [vmem:[#allocation3 + $0x20] sm:$0xff] }
  0x29   :  { %v59_v16 = vld [vmem:[#allocation3 + $0x30] sm:$0xff]  ;;  %2666 = vmatpush1.bf16.msra.mxu0 %v2665_v8  ;;  %v2667_v17 = vpack.c.bf16 %v60_v14, %v58_v12  ;;  %v240_v19 = vld [vmem:[#allocation5 + $0x28] sm:$0xff]  ;;  %v242_v20 = vld [vmem:[#allocation5 + $0x38] sm:$0xff]  ;;  %v73_v59 = vsub.s32 0, %v3342_v58  ;;  %v77_v61 = vsub.s32 1, %v3342_v58 }
  0x2a   :  { %2680 = vmatprep.subr.bf16.mxu1 %v3258_v9  ;;  %v2669_v18 = vpack.c.bf16 %v59_v16, %v57_v15  ;;  %v239_v21 = vld [vmem:[#allocation5 + $0x20] sm:$0xff]  ;;  %v3264_v22 = vpack.c.bf16 %v242_v20, %v240_v19  ;;  %v241_v23 = vld [vmem:[#allocation5 + $0x30] sm:$0xff]  ;;  %v62_v24 = vld [vmem:[#allocation3 + $0x48] sm:$0xff] }
  0x2b   :  { %2682 = vmatpush1.bf16.msra.mxu1 %v3260_v13  ;;  %v64_v25 = vld [vmem:[#allocation3 + $0x58] sm:$0xff]  ;;  %2668 = vmatprep.subr.bf16.mxu0 %v2667_v17  ;;  %v3266_v26 = vpack.c.bf16 %v241_v23, %v239_v21  ;;  %v61_v28 = vld [vmem:[#allocation3 + $0x40] sm:$0xff]  ;;  %v63_v29 = vld [vmem:[#allocation3 + $0x50] sm:$0xff] }
  0x2c   :  { %v2671_v27 = vpack.c.bf16 %v64_v25, %v62_v24  ;;  %v244_v30 = vld [vmem:[#allocation5 + $0x48] sm:$0xff]  ;;  %2684 = vmatprep.subr.bf16.mxu1 %v3264_v22  ;;  %v246_v31 = vld [vmem:[#allocation5 + $0x58] sm:$0xff]  ;;  %v243_v32 = vld [vmem:[#allocation5 + $0x40] sm:$0xff]  ;;  %v2673_v34 = vpack.c.bf16 %v63_v29, %v61_v28 }
  0x2d   :  { %v245_v33 = vld [vmem:[#allocation5 + $0x50] sm:$0xff]  ;;  %2670 = vmatpush1.bf16.msra.mxu0 %v2669_v18  ;;  %v3269_v35 = vpack.c.bf16 %v246_v31, %v244_v30  ;;  %v66_v36 = vld [vmem:[#allocation3 + $0x68] sm:$0xff]  ;;  %v68_v37 = vld [vmem:[#allocation3 + $0x78] sm:$0xff] }
  0x2e   :  { %v65_v38 = vld [vmem:[#allocation3 + $0x60] sm:$0xff]  ;;  %2672 = vmatprep.subr.bf16.mxu0 %v2671_v27  ;;  %v3272_v39 = vpack.c.bf16 %v245_v33, %v243_v32  ;;  %v2675_v40 = vpack.c.bf16 %v68_v37, %v66_v36  ;;  %v67_v41 = vld [vmem:[#allocation3 + $0x70] sm:$0xff]  ;;  %v248_v42 = vld [vmem:[#allocation5 + $0x68] sm:$0xff] }
  0x2f   :  { %2686 = vmatpush1.bf16.msra.mxu1 %v3266_v26  ;;  %v250_v43 = vld [vmem:[#allocation5 + $0x78] sm:$0xff]  ;;  %v247_v45 = vld [vmem:[#allocation5 + $0x60] sm:$0xff]  ;;  %v249_v46 = vld [vmem:[#allocation5 + $0x70] sm:$0xff]  ;;  %v2677_v47 = vpack.c.bf16 %v67_v41, %v65_v38 }
  0x30   :  { %2688 = vmatprep.subr.bf16.mxu1 %v3269_v35  ;;  %v3275_v44 = vpack.c.bf16 %v250_v43, %v248_v42  ;;  %v3278_v48 = vpack.c.bf16 %v249_v46, %v247_v45  ;;  %v45_v49 = vld [vmem:[%s3907_s0] sm:$0xff]  ;;  %v46_v50 = vld [vmem:[%s3907_s0 + $0x8] sm:$0xff]  ;;  %v47_v51 = vld [vmem:[%s3907_s0 + $0x10] sm:$0xff] }
  0x31   :  { %2674 = vmatpush1.bf16.msra.mxu0 %v2673_v34  ;;  %v48_v52 = vld [vmem:[%s3907_s0 + $0x18] sm:$0xff]  ;;  %v49_v53 = vld [vmem:[%s3907_s0 + $0x20] sm:$0xff]  ;;  %v50_v54 = vld [vmem:[%s3907_s0 + $0x28] sm:$0xff] }
  0x32   :  { %2676 = vmatprep.subr.bf16.mxu0 %v2675_v40  ;;  %v51_v55 = vld [vmem:[%s3907_s0 + $0x30] sm:$0xff]  ;;  %v52_v56 = vld [vmem:[%s3907_s0 + $0x38] sm:$0xff]  ;;  %v69_v60 = vld [vmem:[%s3910_s3] sm:$0x3]  ;;  %s3204_s0 = smov 32  }
  0x33   :  { %2690 = vmatpush1.bf16.msra.mxu1 %v3272_v39  ;;  %v74_v62 = vrot.slane %v69_v60, %v73_v59  ;;  %v78_v63 = vrot.slane %v69_v60, %v77_v61 }
  0x34   :  { %2692 = vmatprep.subr.bf16.mxu1 %v3275_v44 }
  0x35   :  { %2678 = vmatpush1.bf16.msra.mxu0 %v2677_v47 }
  0x36   :  { %2712 = vmatprep.subr.bf16.mxu0 %v3258_v9 }
  0x37   :  { %2694 = vmatpush1.bf16.msra.mxu1 %v3278_v48 }
  0x38   :  { %2696 = vmatprep.subr.bf16.mxu1 %v3258_v9  ;;  %2604 = vmatmul.mubr.msk.f32.vlgmr.msra.gmra.mrb[0].mxu0 %vm81_vm0, %v45_v49 }
  0x39   :  { %176 = vmatprep.mubr.f32.mxu0 %v3203_v0  ;;  %2714 = vmatpush1.bf16.msra.mxu0 %v3260_v13 }
  0x3a   :  { %319 = vmatmul.mubr.f32.vlgmr.msra.gmra.mrb[0].mxu1 %v3203_v0  ;;  %2716 = vmatprep.subr.bf16.mxu0 %v3264_v22 }
  0x3b   :  { %2698 = vmatpush1.bf16.msra.mxu1 %v3260_v13  ;;  %455 = vmatprep.mubr.f32.mxu1 %v3203_v0 }
  0x3c   :  { %2700 = vmatprep.subr.bf16.mxu1 %v3264_v22  ;;  %2605 = vmatmul.mubr.msk.f32.gmra.mrb[2].mxu0 %vm81_vm0, %v46_v50 }
  0x3d   :  { %182 = vmatprep.mubr.f32.mxu0 %v3203_v0  ;;  %2718 = vmatpush1.bf16.msra.mxu0 %v3266_v26 }
  0x3e   :  { %2720 = vmatprep.subr.bf16.mxu0 %v3269_v35 }
  0x3f   :  { %2702 = vmatpush1.bf16.msra.mxu1 %v3266_v26 }
  0x40   :  { %2704 = vmatprep.subr.bf16.mxu1 %v3269_v35  ;;  %2606 = vmatmul.mubr.msk.f32.gmra.mrb[4].mxu0 %vm81_vm0, %v47_v51 }
  0x41   :  { %188 = vmatprep.mubr.f32.mxu0 %v3203_v0  ;;  %2722 = vmatpush1.bf16.msra.mxu0 %v3272_v39 }
  0x42   :  { %2724 = vmatprep.subr.bf16.mxu0 %v3275_v44 }
  0x43   :  { %2706 = vmatpush1.bf16.msra.mxu1 %v3272_v39 }
  0x44   :  { %2708 = vmatprep.subr.bf16.mxu1 %v3275_v44  ;;  %2607 = vmatmul.mubr.msk.f32.gmra.mrb[6].mxu0 %vm81_vm0, %v48_v52 }
  0x45   :  { %194 = vmatprep.mubr.f32.mxu0 %v3203_v0  ;;  %2726 = vmatpush1.bf16.msra.mxu0 %v3278_v48 }
  0x46   :  { %2744 = vmatprep.subr.bf16.mxu0 %v3258_v9 }
  0x47   :  { %2710 = vmatpush1.bf16.msra.mxu1 %v3278_v48 }
  0x48   :  { %2728 = vmatprep.subr.bf16.mxu1 %v3258_v9  ;;  %2608 = vmatmul.mubr.msk.f32.gmra.mrb[8].mxu0 %vm81_vm0, %v49_v53 }
  0x49   :  { %200 = vmatprep.mubr.f32.mxu0 %v3203_v0 }
  0x4c   :  { %2609 = vmatmul.mubr.msk.f32.gmra.mrb[10].mxu0 %vm81_vm0, %v50_v54 }
  0x4d   :  { %206 = vmatprep.mubr.f32.mxu0 %v3203_v0 }
  0x50   :  { %2610 = vmatmul.mubr.msk.f32.gmra.mrb[12].mxu0 %vm81_vm0, %v51_v55 }
  0x51   :  { %212 = vmatprep.mubr.f32.mxu0 %v3203_v0 }
  0x54   :  { %2611 = vmatmul.mubr.msk.f32.gmra.mrb[14].mxu0 %vm81_vm0, %v52_v56 }
  0x55   :  { %592 = vmatprep.mubr.f32.mxu0 %v3203_v0 }
 0x10b   :  { %v172_v1 = vpop.f32.mrb[0].mxu0 }
 0x10c   :  { %v173_v2 = vadd.f32 %v172_v1, %v74_v62  ;;  %v174_v3 = vpop.f32.mrb[1].mxu0 }
 0x10d   :  { %v320_v4 = vpop.f32.mrb[0].mxu1  ;;  %v3353_v5 = vadd.f32 %v174_v3, %v78_v63 }
 0x10e   :  { %v322_v6 = vpop.f32.mrb[1].mxu1  ;;  %v326_v7 = vadd.f32 %v320_v4, %v173_v2 }
 0x10f   :  { %v178_v8 = vpop.f32.mrb[2].mxu0 }
 0x110   :  { %2959 = vtanh.f32 %v326_v7  ;;  %v3355_v10 = vadd.f32 %v178_v8, %v74_v62  ;;  %v180_v11 = vpop.f32.mrb[3].mxu0  ;;  %v327_v46 = vmul.f32 0.5, %v326_v7 }
 0x111   :  { %v3357_v12 = vadd.f32 %v180_v11, %v78_v63 }
 0x113   :  { %v184_v14 = vpop.f32.mrb[4].mxu0 }
 0x114   :  { %v3359_v15 = vadd.f32 %v184_v14, %v74_v62  ;;  %v186_v16 = vpop.f32.mrb[5].mxu0 }
 0x115   :  { %v3361_v17 = vadd.f32 %v186_v16, %v78_v63 }
 0x117   :  { %v190_v18 = vpop.f32.mrb[6].mxu0 }
 0x118   :  { %v3363_v19 = vadd.f32 %v190_v18, %v74_v62  ;;  %v192_v20 = vpop.f32.mrb[7].mxu0 }
 0x119   :  { %v3365_v21 = vadd.f32 %v192_v20, %v78_v63 }
 0x11a   :  { %v2960_v23 = vpop.eup %2959 }
 0x11b   :  { %v196_v24 = vpop.f32.mrb[8].mxu0  ;;  %334 = vrot.lane.b32.xlu0 %v2960_v23, %s3204_s0 }
 0x11c   :  { %v3368_v25 = vadd.f32 %v196_v24, %v74_v62  ;;  %v198_v27 = vpop.f32.mrb[9].mxu0 }
 0x11d   :  { %v3370_v28 = vadd.f32 %v198_v27, %v78_v63 }
 0x11f   :  { %v202_v29 = vpop.f32.mrb[10].mxu0 }
 0x120   :  { %v3372_v30 = vadd.f32 %v202_v29, %v74_v62  ;;  %v204_v31 = vpop.f32.mrb[11].mxu0 }
 0x121   :  { %v3374_v32 = vadd.f32 %v204_v31, %v78_v63 }
 0x123   :  { %v208_v33 = vpop.f32.mrb[12].mxu0 }
 0x124   :  { %v3376_v34 = vadd.f32 %v208_v33, %v74_v62  ;;  %v210_v36 = vpop.f32.mrb[13].mxu0 }
 0x125   :  { %v3378_v37 = vadd.f32 %v210_v36, %v78_v63 }
 0x127   :  { %v214_v38 = vpop.f32.mrb[14].mxu0 }
 0x128   :  { %v3380_v40 = vadd.f32 %v214_v38, %v74_v62  ;;  %v216_v41 = vpop.f32.mrb[15].mxu0 }
 0x129   :  { %v217_v42 = vadd.f32 %v216_v41, %v78_v63 }
 0x12b   :  { %v357_v43 = vadd.f32 %v322_v6, %v217_v42 }
 0x12d   :  { %2961 = vtanh.f32 %v357_v43  ;;  %v358_v53 = vmul.f32 0.5, %v357_v43 }
 0x12e   :  { %2963 = vtanh.f32 %v327_v46 }
 0x12f   :  { %2965 = vtanh.f32 %v358_v53 }
 0x137   :  { %v2962_v45 = vpop.eup %2961 }
 0x138   :  { %365 = vrot.lane.b32.xlu0 %v2962_v45, %s3204_s0  ;;  %v2964_v47 = vpop.eup %2963 }
 0x139   :  { %v329_v49 = vmul.f32 0.5, %v2964_v47  ;;  %v2966_v54 = vpop.eup %2965 }
 0x13a   :  { %v360_v55 = vmul.f32 0.5, %v2966_v54 }
 0x13b   :  { %v330_v50 = vadd.f32 0.5, %v329_v49 }
 0x13c   :  { %v361_v56 = vadd.f32 0.5, %v360_v55 }
 0x13d   :  { %v332_v62 = vmul.f32 0.0, %v330_v50 }
 0x13e   :  { %v363_v3 = vmul.f32 0.0, %v361_v56 }
 0x18d   :  { %v335_v51 = vpop.permute.xlu0 %334 }
 0x18e   :  { %v337_v52 = vmul.f32 %v335_v51, %v330_v50 }
 0x190   :  { %339 = vrot.lane.b32.xlu1 %v337_v52, %s3204_s0 }
 0x1aa   :  { %v366_v57 = vpop.permute.xlu0 %365 }
 0x1ab   :  { %v368_v60 = vmul.f32 %v366_v57, %v361_v56 }
 0x1ad   :  { %370 = vrot.lane.b32.xlu1 %v368_v60, %s3204_s0 }
 0x202   :  { %v340_v63 = vpop.permute.xlu1 %339 }
 0x203   :  { %v342_v1 = vadd.f32 %v340_v63, %v332_v62 }
 0x205   :  { %2967 = vtanh.f32 %v342_v1 }
 0x20f   :  { %v2968_v2 = vpop.eup %2967 }
 0x210   :  { %345 = vrot.lane.b32.xlu0 %v2968_v2, %s3204_s0 }
 0x21f   :  { %v371_v4 = vpop.permute.xlu1 %370 }
 0x220   :  { %v373_v6 = vadd.f32 %v371_v4, %v363_v3 }
 0x222   :  { %2969 = vtanh.f32 %v373_v6 }
 0x22c   :  { %v2970_v7 = vpop.eup %2969 }
 0x22d   :  { %376 = vrot.lane.b32.xlu1 %v2970_v7, %s3204_s0 }
 0x282   :  { %v346_v8 = vpop.permute.xlu0 %345 }
 0x283   :  { %v348_v11 = vmul.f32 %v346_v8, %v330_v50 }
 0x285   :  { %350 = vrot.lane.b32.xlu0 %v348_v11, %s3205_s5 }
 0x29f   :  { %v377_v14 = vpop.permute.xlu1 %376 }
 0x2a0   :  { %v379_v16 = vmul.f32 %v377_v14, %v361_v56 }
 0x2a2   :  { %381 = vrot.lane.b32.xlu1 %v379_v16, %s3206_s6 }
 0x2f7   :  { %v351_v18 = vpop.permute.xlu0 %350 }
 0x2f8   :  { %354 = vst.msk [vmem:[%s3911_s4] sm:$0xff] %vm353_vm1, %v351_v18 }
 0x314   :  { %v382_v20 = vpop.permute.xlu1 %381 }
 0x315   :  { %2612 = vst.msk [vmem:[%s3911_s4 + $0x38] sm:$0xff] %vm385_vm2, %v382_v20  ;;  %v387_v23 = vsel %vm353_vm1, %v351_v18, %v382_v20 }
 0x316   :  { %2613 = vmatmul.mubr.msk.f32.vlgmr.msra.gmra.mrb[2].mxu1 %vm81_vm0, %v387_v23 }
 0x317   :  { %2730 = vmatpush1.bf16.msra.mxu1 %v3260_v13  ;;  %729 = vmatprep.mubr.f32.mxu1 %v3203_v0 }
 0x318   :  { %2732 = vmatprep.subr.bf16.mxu1 %v3264_v22 }
 0x31b   :  { %2734 = vmatpush1.bf16.msra.mxu1 %v3266_v26 }
 0x31c   :  { %2736 = vmatprep.subr.bf16.mxu1 %v3269_v35 }
 0x31f   :  { %2738 = vmatpush1.bf16.msra.mxu1 %v3272_v39 }
 0x320   :  { %2740 = vmatprep.subr.bf16.mxu1 %v3275_v44 }
 0x323   :  { %2742 = vmatpush1.bf16.msra.mxu1 %v3278_v48 }
 0x324   :  { %2760 = vmatprep.subr.bf16.mxu1 %v3258_v9 }
 0x3e9   :  { %v457_v24 = vpop.f32.mrb[2].mxu1 }
 0x3ea   :  { %v464_v27 = vadd.f32 %v457_v24, %v3355_v10  ;;  %v459_v29 = vpop.f32.mrb[3].mxu1 }
 0x3eb   :  { %v495_v31 = vadd.f32 %v459_v29, %v3378_v37 }
 0x3ec   :  { %2971 = vtanh.f32 %v464_v27  ;;  %v465_v38 = vmul.f32 0.5, %v464_v27 }
 0x3ed   :  { %2973 = vtanh.f32 %v495_v31  ;;  %v496_v41 = vmul.f32 0.5, %v495_v31 }
 0x3ee   :  { %2975 = vtanh.f32 %v465_v38 }
 0x3ef   :  { %2977 = vtanh.f32 %v496_v41 }
 0x3f6   :  { %v2972_v33 = vpop.eup %2971 }
 0x3f7   :  { %v2974_v36 = vpop.eup %2973  ;;  %472 = vrot.lane.b32.xlu0 %v2972_v33, %s3204_s0 }
 0x3f8   :  { %503 = vrot.lane.b32.xlu1 %v2974_v36, %s3204_s0  ;;  %v2976_v42 = vpop.eup %2975 }
 0x3f9   :  { %v2978_v43 = vpop.eup %2977  ;;  %v467_v45 = vmul.f32 0.5, %v2976_v42 }
 0x3fa   :  { %v498_v46 = vmul.f32 0.5, %v2978_v43 }
 0x3fb   :  { %v468_v10 = vadd.f32 0.5, %v467_v45 }
 0x3fc   :  { %v499_v49 = vadd.f32 0.5, %v498_v46 }
 0x3fd   :  { %v470_v52 = vmul.f32 %v468_v10, %v342_v1 }
 0x3fe   :  { %v501_v54 = vmul.f32 %v499_v49, %v373_v6 }
 0x469   :  { %v473_v47 = vpop.permute.xlu0 %472 }
 0x46a   :  { %v475_v37 = vmul.f32 %v473_v47, %v468_v10  ;;  %v504_v50 = vpop.permute.xlu1 %503 }
 0x46b   :  { %v506_v51 = vmul.f32 %v504_v50, %v499_v49 }
 0x46c   :  { %477 = vrot.lane.b32.xlu0 %v475_v37, %s3204_s0 }
 0x46d   :  { %508 = vrot.lane.b32.xlu1 %v506_v51, %s3204_s0 }
 0x4de   :  { %v478_v53 = vpop.permute.xlu0 %477 }
 0x4df   :  { %v480_v55 = vadd.f32 %v478_v53, %v470_v52  ;;  %v509_v56 = vpop.permute.xlu1 %508 }
 0x4e0   :  { %v511_v57 = vadd.f32 %v509_v56, %v501_v54 }
 0x4e1   :  { %2979 = vtanh.f32 %v480_v55 }
 0x4e2   :  { %2981 = vtanh.f32 %v511_v57 }
 0x4eb   :  { %v2980_v60 = vpop.eup %2979 }
 0x4ec   :  { %v2982_v62 = vpop.eup %2981  ;;  %483 = vrot.lane.b32.xlu0 %v2980_v60, %s3204_s0 }
 0x4ed   :  { %514 = vrot.lane.b32.xlu1 %v2982_v62, %s3204_s0 }
 0x55e   :  { %v484_v63 = vpop.permute.xlu0 %483 }
 0x55f   :  { %v486_v2 = vmul.f32 %v484_v63, %v468_v10  ;;  %v515_v3 = vpop.permute.xlu1 %514 }
 0x560   :  { %v517_v4 = vmul.f32 %v515_v3, %v499_v49 }
 0x561   :  { %488 = vrot.lane.b32.xlu0 %v486_v2, %s3205_s5 }
 0x562   :  { %519 = vrot.lane.b32.xlu1 %v517_v4, %s3206_s6 }
 0x5d3   :  { %v489_v1 = vpop.permute.xlu0 %488 }
 0x5d4   :  { %2614 = vst.msk [vmem:[%s3911_s4 + $0x8] sm:$0xff] %vm353_vm1, %v489_v1  ;;  %v520_v6 = vpop.permute.xlu1 %519 }
 0x5d5   :  { %2615 = vst.msk [vmem:[%s3911_s4 + $0x30] sm:$0xff] %vm385_vm2, %v520_v6  ;;  %v524_v7 = vsel %vm353_vm1, %v489_v1, %v520_v6 }
 0x5d6   :  { %2616 = vmatmul.mubr.msk.f32.vlgmr.msra.gmra.mrb[16].mxu0 %vm81_vm0, %v524_v7 }
 0x5d7   :  { %2746 = vmatpush1.bf16.msra.mxu0 %v3260_v13  ;;  %866 = vmatprep.mubr.f32.mxu0 %v3203_v0 }
 0x5d8   :  { %2748 = vmatprep.subr.bf16.mxu0 %v3264_v22 }
 0x5db   :  { %2750 = vmatpush1.bf16.msra.mxu0 %v3266_v26 }
 0x5dc   :  { %2752 = vmatprep.subr.bf16.mxu0 %v3269_v35 }
 0x5df   :  { %2754 = vmatpush1.bf16.msra.mxu0 %v3272_v39 }
 0x5e0   :  { %2756 = vmatprep.subr.bf16.mxu0 %v3275_v44 }
 0x5e3   :  { %2758 = vmatpush1.bf16.msra.mxu0 %v3278_v48 }
 0x5e4   :  { %2776 = vmatprep.subr.bf16.mxu0 %v3258_v9 }
 0x6a9   :  { %v594_v8 = vpop.f32.mrb[16].mxu0 }
 0x6aa   :  { %v601_v11 = vadd.f32 %v594_v8, %v3359_v15  ;;  %v596_v14 = vpop.f32.mrb[17].mxu0 }
 0x6ab   :  { %v632_v16 = vadd.f32 %v596_v14, %v3374_v32 }
 0x6ac   :  { %2983 = vtanh.f32 %v601_v11  ;;  %v602_v23 = vmul.f32 0.5, %v601_v11 }
 0x6ad   :  { %2985 = vtanh.f32 %v632_v16  ;;  %v633_v24 = vmul.f32 0.5, %v632_v16 }
 0x6ae   :  { %2987 = vtanh.f32 %v602_v23 }
 0x6af   :  { %2989 = vtanh.f32 %v633_v24 }
 0x6b6   :  { %v2984_v18 = vpop.eup %2983 }
 0x6b7   :  { %v2986_v20 = vpop.eup %2985  ;;  %609 = vrot.lane.b32.xlu0 %v2984_v18, %s3204_s0 }
 0x6b8   :  { %640 = vrot.lane.b32.xlu1 %v2986_v20, %s3204_s0  ;;  %v2988_v27 = vpop.eup %2987 }
 0x6b9   :  { %v2990_v29 = vpop.eup %2989  ;;  %v604_v31 = vmul.f32 0.5, %v2988_v27 }
 0x6ba   :  { %v635_v33 = vmul.f32 0.5, %v2990_v29 }
 0x6bb   :  { %v605_v15 = vadd.f32 0.5, %v604_v31 }
 0x6bc   :  { %v636_v38 = vadd.f32 0.5, %v635_v33 }
 0x6bd   :  { %v607_v43 = vmul.f32 %v605_v15, %v480_v55 }
 0x6be   :  { %v638_v46 = vmul.f32 %v636_v38, %v511_v57 }
 0x729   :  { %v610_v36 = vpop.permute.xlu0 %609 }
 0x72a   :  { %v612_v32 = vmul.f32 %v610_v36, %v605_v15  ;;  %v641_v41 = vpop.permute.xlu1 %640 }
 0x72b   :  { %v643_v42 = vmul.f32 %v641_v41, %v636_v38 }
 0x72c   :  { %614 = vrot.lane.b32.xlu0 %v612_v32, %s3204_s0 }
 0x72d   :  { %645 = vrot.lane.b32.xlu1 %v643_v42, %s3204_s0 }
 0x79e   :  { %v615_v45 = vpop.permute.xlu0 %614 }
 0x79f   :  { %v617_v10 = vadd.f32 %v615_v45, %v607_v43  ;;  %v646_v47 = vpop.permute.xlu1 %645 }
 0x7a0   :  { %v648_v49 = vadd.f32 %v646_v47, %v638_v46 }
 0x7a1   :  { %2991 = vtanh.f32 %v617_v10 }
 0x7a2   :  { %2993 = vtanh.f32 %v648_v49 }
 0x7ab   :  { %v2992_v37 = vpop.eup %2991 }
 0x7ac   :  { %v2994_v50 = vpop.eup %2993  ;;  %620 = vrot.lane.b32.xlu0 %v2992_v37, %s3204_s0 }
 0x7ad   :  { %651 = vrot.lane.b32.xlu1 %v2994_v50, %s3204_s0 }
 0x81e   :  { %v621_v51 = vpop.permute.xlu0 %620 }
 0x81f   :  { %v623_v52 = vmul.f32 %v621_v51, %v605_v15  ;;  %v652_v53 = vpop.permute.xlu1 %651 }
 0x820   :  { %v654_v54 = vmul.f32 %v652_v53, %v636_v38 }
 0x821   :  { %625 = vrot.lane.b32.xlu0 %v623_v52, %s3205_s5 }
 0x822   :  { %656 = vrot.lane.b32.xlu1 %v654_v54, %s3206_s6 }
 0x893   :  { %v626_v55 = vpop.permute.xlu0 %625 }
 0x894   :  { %2617 = vst.msk [vmem:[%s3911_s4 + $0x10] sm:$0xff] %vm353_vm1, %v626_v55  ;;  %v657_v56 = vpop.permute.xlu1 %656 }
 0x895   :  { %2618 = vst.msk [vmem:[%s3911_s4 + $0x28] sm:$0xff] %vm385_vm2, %v657_v56  ;;  %v661_v57 = vsel %vm353_vm1, %v626_v55, %v657_v56 }
 0x896   :  { %2619 = vmatmul.mubr.msk.f32.vlgmr.msra.gmra.mrb[4].mxu1 %vm81_vm0, %v661_v57 }
 0x897   :  { %2762 = vmatpush1.bf16.msra.mxu1 %v3260_v13  ;;  %999 = vmatprep.mubr.f32.mxu1 %v3203_v0 }
 0x898   :  { %2764 = vmatprep.subr.bf16.mxu1 %v3264_v22 }
 0x89b   :  { %2766 = vmatpush1.bf16.msra.mxu1 %v3266_v26 }
 0x89c   :  { %2768 = vmatprep.subr.bf16.mxu1 %v3269_v35 }
 0x89f   :  { %2770 = vmatpush1.bf16.msra.mxu1 %v3272_v39 }
 0x8a0   :  { %2772 = vmatprep.subr.bf16.mxu1 %v3275_v44 }
 0x8a3   :  { %2774 = vmatpush1.bf16.msra.mxu1 %v3278_v48 }
 0x8a4   :  { %2792 = vmatprep.subr.bf16.mxu1 %v3258_v9 }
 0x969   :  { %v731_v60 = vpop.f32.mrb[4].mxu1 }
 0x96a   :  { %v738_v62 = vadd.f32 %v731_v60, %v3363_v19  ;;  %v733_v63 = vpop.f32.mrb[5].mxu1 }
 0x96b   :  { %v769_v2 = vadd.f32 %v733_v63, %v3370_v28 }
 0x96c   :  { %2995 = vtanh.f32 %v738_v62  ;;  %v739_v1 = vmul.f32 0.5, %v738_v62 }
 0x96d   :  { %2997 = vtanh.f32 %v769_v2  ;;  %v770_v6 = vmul.f32 0.5, %v769_v2 }
 0x96e   :  { %2999 = vtanh.f32 %v739_v1 }
 0x96f   :  { %3001 = vtanh.f32 %v770_v6 }
 0x976   :  { %v2996_v3 = vpop.eup %2995 }
 0x977   :  { %v2998_v4 = vpop.eup %2997  ;;  %746 = vrot.lane.b32.xlu0 %v2996_v3, %s3204_s0 }
 0x978   :  { %777 = vrot.lane.b32.xlu1 %v2998_v4, %s3204_s0  ;;  %v3000_v7 = vpop.eup %2999 }
 0x979   :  { %v3002_v9 = vpop.eup %3001  ;;  %v741_v8 = vmul.f32 0.5, %v3000_v7 }
 0x97a   :  { %v772_v11 = vmul.f32 0.5, %v3002_v9 }
 0x97b   :  { %v742_v19 = vadd.f32 0.5, %v741_v8 }
 0x97c   :  { %v773_v16 = vadd.f32 0.5, %v772_v11 }
 0x97d   :  { %v744_v23 = vmul.f32 %v742_v19, %v617_v10 }
 0x97e   :  { %v775_v27 = vmul.f32 %v773_v16, %v648_v49 }
 0x9e9   :  { %v747_v14 = vpop.permute.xlu0 %746 }
 0x9ea   :  { %v749_v28 = vmul.f32 %v747_v14, %v742_v19  ;;  %v778_v18 = vpop.permute.xlu1 %777 }
 0x9eb   :  { %v780_v20 = vmul.f32 %v778_v18, %v773_v16 }
 0x9ec   :  { %751 = vrot.lane.b32.xlu0 %v749_v28, %s3204_s0 }
 0x9ed   :  { %782 = vrot.lane.b32.xlu1 %v780_v20, %s3204_s0 }
 0xa5e   :  { %v752_v24 = vpop.permute.xlu0 %751 }
 0xa5f   :  { %v754_v29 = vadd.f32 %v752_v24, %v744_v23  ;;  %v783_v31 = vpop.permute.xlu1 %782 }
 0xa60   :  { %v785_v33 = vadd.f32 %v783_v31, %v775_v27 }
 0xa61   :  { %3003 = vtanh.f32 %v754_v29 }
 0xa62   :  { %3005 = vtanh.f32 %v785_v33 }
 0xa6b   :  { %v3004_v15 = vpop.eup %3003 }
 0xa6c   :  { %v3006_v36 = vpop.eup %3005  ;;  %757 = vrot.lane.b32.xlu0 %v3004_v15, %s3204_s0 }
 0xa6d   :  { %788 = vrot.lane.b32.xlu1 %v3006_v36, %s3204_s0 }
 0xade   :  { %v758_v38 = vpop.permute.xlu0 %757 }
 0xadf   :  { %v760_v32 = vmul.f32 %v758_v38, %v742_v19  ;;  %v789_v41 = vpop.permute.xlu1 %788 }
 0xae0   :  { %v791_v42 = vmul.f32 %v789_v41, %v773_v16 }
 0xae1   :  { %762 = vrot.lane.b32.xlu0 %v760_v32, %s3205_s5 }
 0xae2   :  { %793 = vrot.lane.b32.xlu1 %v791_v42, %s3206_s6 }
 0xb53   :  { %v763_v43 = vpop.permute.xlu0 %762 }
 0xb54   :  { %2620 = vst.msk [vmem:[%s3911_s4 + $0x18] sm:$0xff] %vm353_vm1, %v763_v43  ;;  %v794_v45 = vpop.permute.xlu1 %793 }
 0xb55   :  { %2621 = vst.msk [vmem:[%s3911_s4 + $0x20] sm:$0xff] %vm385_vm2, %v794_v45  ;;  %v798_v46 = vsel %vm353_vm1, %v763_v43, %v794_v45 }
 0xb56   :  { %2622 = vmatmul.mubr.msk.f32.vlgmr.msra.gmra.mrb[18].mxu0 %vm81_vm0, %v798_v46 }
 0xb57   :  { %2778 = vmatpush1.bf16.msra.mxu0 %v3260_v13  ;;  %1132 = vmatprep.mubr.f32.mxu0 %v3203_v0 }
 0xb58   :  { %2780 = vmatprep.subr.bf16.mxu0 %v3264_v22 }
 0xb5b   :  { %2782 = vmatpush1.bf16.msra.mxu0 %v3266_v26 }
 0xb5c   :  { %2784 = vmatprep.subr.bf16.mxu0 %v3269_v35 }
 0xb5f   :  { %2786 = vmatpush1.bf16.msra.mxu0 %v3272_v39 }
 0xb60   :  { %2788 = vmatprep.subr.bf16.mxu0 %v3275_v44 }
 0xb63   :  { %2790 = vmatpush1.bf16.msra.mxu0 %v3278_v48 }
 0xc29   :  { %v868_v10 = vpop.f32.mrb[18].mxu0 }
 0xc2a   :  { %v874_v47 = vadd.f32 %v868_v10, %v3368_v25  ;;  %v870_v49 = vpop.f32.mrb[19].mxu0 }
 0xc2b   :  { %v903_v37 = vadd.f32 %v870_v49, %v3365_v21 }
 0xc2c   :  { %3007 = vtanh.f32 %v874_v47  ;;  %v875_v52 = vmul.f32 0.5, %v874_v47 }
 0xc2d   :  { %3009 = vtanh.f32 %v903_v37  ;;  %v904_v53 = vmul.f32 0.5, %v903_v37 }
 0xc2e   :  { %3011 = vtanh.f32 %v875_v52 }
 0xc2f   :  { %3013 = vtanh.f32 %v904_v53 }
 0xc36   :  { %v3008_v50 = vpop.eup %3007 }
 0xc37   :  { %v3010_v51 = vpop.eup %3009  ;;  %882 = vrot.lane.b32.xlu0 %v3008_v50, %s3204_s0 }
 0xc38   :  { %911 = vrot.lane.b32.xlu1 %v3010_v51, %s3204_s0  ;;  %v3012_v54 = vpop.eup %3011 }
 0xc39   :  { %v3014_v55 = vpop.eup %3013  ;;  %v877_v56 = vmul.f32 0.5, %v3012_v54 }
 0xc3a   :  { %v906_v57 = vmul.f32 0.5, %v3014_v55 }
 0xc3b   :  { %v878_v25 = vadd.f32 0.5, %v877_v56 }
 0xc3c   :  { %v907_v62 = vadd.f32 0.5, %v906_v57 }
 0xc3d   :  { %v880_v3 = vmul.f32 %v878_v25, %v754_v29 }
 0xc3e   :  { %v909_v1 = vmul.f32 %v907_v62, %v785_v33 }
 0xca9   :  { %v883_v60 = vpop.permute.xlu0 %882 }
 0xcaa   :  { %v885_v21 = vmul.f32 %v883_v60, %v878_v25  ;;  %v912_v63 = vpop.permute.xlu1 %911 }
 0xcab   :  { %v914_v2 = vmul.f32 %v912_v63, %v907_v62 }
 0xcac   :  { %887 = vrot.lane.b32.xlu0 %v885_v21, %s3204_s0 }
 0xcad   :  { %916 = vrot.lane.b32.xlu1 %v914_v2, %s3204_s0 }
 0xd1e   :  { %v888_v4 = vpop.permute.xlu0 %887 }
 0xd1f   :  { %v890_v6 = vadd.f32 %v888_v4, %v880_v3  ;;  %v917_v7 = vpop.permute.xlu1 %916 }
 0xd20   :  { %v919_v9 = vadd.f32 %v917_v7, %v909_v1 }
 0xd21   :  { %3015 = vtanh.f32 %v890_v6 }
 0xd22   :  { %3017 = vtanh.f32 %v919_v9 }
 0xd2b   :  { %v3016_v8 = vpop.eup %3015 }
 0xd2c   :  { %v3018_v11 = vpop.eup %3017  ;;  %893 = vrot.lane.b32.xlu0 %v3016_v8, %s3204_s0 }
 0xd2d   :  { %922 = vrot.lane.b32.xlu1 %v3018_v11, %s3204_s0 }
 0xd9e   :  { %v894_v19 = vpop.permute.xlu0 %893 }
 0xd9f   :  { %v896_v14 = vmul.f32 %v894_v19, %v878_v25  ;;  %v923_v16 = vpop.permute.xlu1 %922 }
 0xda0   :  { %v925_v28 = vmul.f32 %v923_v16, %v907_v62 }
 0xda1   :  { %898 = vrot.lane.b32.xlu0 %v896_v14, %s3205_s5 }
 0xda2   :  { %927 = vrot.lane.b32.xlu1 %v925_v28, %s3206_s6 }
 0xe13   :  { %v899_v18 = vpop.permute.xlu0 %898 }
 0xe14   :  { %2623 = vst.msk [vmem:[%s3911_s4 + $0x20] sm:$0xff] %vm353_vm1, %v899_v18  ;;  %v928_v20 = vpop.permute.xlu1 %927 }
 0xe15   :  { %2624 = vst.msk [vmem:[%s3911_s4 + $0x18] sm:$0xff] %vm385_vm2, %v928_v20  ;;  %v931_v23 = vsel %vm353_vm1, %v899_v18, %v928_v20 }
 0xe16   :  { %2625 = vmatmul.mubr.msk.f32.vlgmr.msra.gmra.mrb[6].mxu1 %vm81_vm0, %v931_v23 }
 0xe17   :  { %2794 = vmatpush1.bf16.msra.mxu1 %v3260_v13  ;;  %1265 = vmatprep.mubr.f32.mxu1 %v3203_v0 }
 0xe18   :  { %2796 = vmatprep.subr.bf16.mxu1 %v3264_v22 }
 0xe1b   :  { %2798 = vmatpush1.bf16.msra.mxu1 %v3266_v26 }
 0xe1c   :  { %2800 = vmatprep.subr.bf16.mxu1 %v3269_v35 }
 0xe1f   :  { %2802 = vmatpush1.bf16.msra.mxu1 %v3272_v39 }
 0xe20   :  { %2804 = vmatprep.subr.bf16.mxu1 %v3275_v44 }
 0xe23   :  { %2806 = vmatpush1.bf16.msra.mxu1 %v3278_v48 }
 0xee9   :  { %v1001_v24 = vpop.f32.mrb[6].mxu1 }
 0xeea   :  { %v1007_v27 = vadd.f32 %v1001_v24, %v3372_v30  ;;  %v1003_v29 = vpop.f32.mrb[7].mxu1 }
 0xeeb   :  { %v1036_v13 = vadd.f32 %v1003_v29, %v3361_v17 }
 0xeec   :  { %3019 = vtanh.f32 %v1007_v27  ;;  %v1008_v26 = vmul.f32 0.5, %v1007_v27 }
 0xeed   :  { %3021 = vtanh.f32 %v1036_v13  ;;  %v1037_v35 = vmul.f32 0.5, %v1036_v13 }
 0xeee   :  { %3023 = vtanh.f32 %v1008_v26 }
 0xeef   :  { %3025 = vtanh.f32 %v1037_v35 }
 0xef6   :  { %v3020_v31 = vpop.eup %3019 }
 0xef7   :  { %v3022_v22 = vpop.eup %3021  ;;  %1015 = vrot.lane.b32.xlu0 %v3020_v31, %s3204_s0 }
 0xef8   :  { %1044 = vrot.lane.b32.xlu1 %v3022_v22, %s3204_s0  ;;  %v3024_v39 = vpop.eup %3023 }
 0xef9   :  { %v3026_v44 = vpop.eup %3025  ;;  %v1010_v48 = vmul.f32 0.5, %v3024_v39 }
 0xefa   :  { %v1039_v33 = vmul.f32 0.5, %v3026_v44 }
 0xefb   :  { %v1011_v30 = vadd.f32 0.5, %v1010_v48 }
 0xefc   :  { %v1040_v36 = vadd.f32 0.5, %v1039_v33 }
 0xefd   :  { %v1013_v41 = vmul.f32 %v1011_v30, %v890_v6 }
 0xefe   :  { %v1042_v43 = vmul.f32 %v1040_v36, %v919_v9 }
 0xf69   :  { %v1016_v15 = vpop.permute.xlu0 %1015 }
 0xf6a   :  { %v1018_v17 = vmul.f32 %v1016_v15, %v1011_v30  ;;  %v1045_v38 = vpop.permute.xlu1 %1044 }
 0xf6b   :  { %v1047_v32 = vmul.f32 %v1045_v38, %v1040_v36 }
 0xf6c   :  { %1020 = vrot.lane.b32.xlu0 %v1018_v17, %s3204_s0 }
 0xf6d   :  { %1049 = vrot.lane.b32.xlu1 %v1047_v32, %s3204_s0 }
 0xfde   :  { %v1021_v42 = vpop.permute.xlu0 %1020 }
 0xfdf   :  { %v1023_v45 = vadd.f32 %v1021_v42, %v1013_v41  ;;  %v1050_v46 = vpop.permute.xlu1 %1049 }
 0xfe0   :  { %v1052_v10 = vadd.f32 %v1050_v46, %v1042_v43 }
 0xfe1   :  { %3027 = vtanh.f32 %v1023_v45 }
 0xfe2   :  { %3029 = vtanh.f32 %v1052_v10 }
 0xfeb   :  { %v3028_v47 = vpop.eup %3027 }
 0xfec   :  { %v3030_v49 = vpop.eup %3029  ;;  %1026 = vrot.lane.b32.xlu0 %v3028_v47, %s3204_s0 }
 0xfed   :  { %1055 = vrot.lane.b32.xlu1 %v3030_v49, %s3204_s0 }
0x105e   :  { %v1027_v37 = vpop.permute.xlu0 %1026 }
0x105f   :  { %v1029_v50 = vmul.f32 %v1027_v37, %v1011_v30  ;;  %v1056_v51 = vpop.permute.xlu1 %1055 }
0x1060   :  { %v1058_v52 = vmul.f32 %v1056_v51, %v1040_v36 }
0x1061   :  { %1031 = vrot.lane.b32.xlu0 %v1029_v50, %s3205_s5 }
0x1062   :  { %1060 = vrot.lane.b32.xlu1 %v1058_v52, %s3206_s6 }
0x10d3   :  { %v1032_v53 = vpop.permute.xlu0 %1031 }
0x10d4   :  { %2626 = vst.msk [vmem:[%s3911_s4 + $0x28] sm:$0xff] %vm353_vm1, %v1032_v53  ;;  %v1061_v54 = vpop.permute.xlu1 %1060 }
0x10d5   :  { %2627 = vst.msk [vmem:[%s3911_s4 + $0x10] sm:$0xff] %vm385_vm2, %v1061_v54  ;;  %v1064_v55 = vsel %vm353_vm1, %v1032_v53, %v1061_v54  ;;  %v1340_v53 = vld [vmem:[#allocation3 + $0x88] sm:$0xff]  ;;  %v1342_v54 = vld [vmem:[#allocation3 + $0x98] sm:$0xff] }
0x10d6   :  { %2628 = vmatmul.mubr.msk.f32.vlgmr.msra.gmra.mrb[20].mxu0 %vm81_vm0, %v1064_v55  ;;  %v1339_v55 = vld [vmem:[#allocation3 + $0x80] sm:$0xff] }
0x10d7   :  { %1456 = vmatprep.mubr.f32.mxu0 %v3203_v0 }
0x11a9   :  { %v1134_v56 = vpop.f32.mrb[20].mxu0 }
0x11aa   :  { %v1140_v57 = vadd.f32 %v1134_v56, %v3376_v34  ;;  %v1136_v25 = vpop.f32.mrb[21].mxu0  ;;  %v2807_v56 = vpack.c.bf16 %v1342_v54, %v1340_v53  ;;  %v1334_v53 = vld [vmem:[%s3911_s4 + $0x20] sm:$0xff]  ;;  %v1335_v54 = vld [vmem:[%s3911_s4 + $0x28] sm:$0xff] }
0x11ab   :  { %v1169_v60 = vadd.f32 %v1136_v25, %v3357_v12  ;;  %v1523_v25 = vld [vmem:[#allocation5 + $0x88] sm:$0xff] }
0x11ac   :  { %3031 = vtanh.f32 %v1140_v57  ;;  %v1141_v63 = vmul.f32 0.5, %v1140_v57  ;;  %v1341_v57 = vld [vmem:[#allocation3 + $0x90] sm:$0xff]  ;;  %2808 = vmatprep.subr.bf16.mxu0 %v2807_v56 }
0x11ad   :  { %3033 = vtanh.f32 %v1169_v60  ;;  %v1170_v2 = vmul.f32 0.5, %v1169_v60  ;;  %v1525_v60 = vld [vmem:[#allocation5 + $0x98] sm:$0xff] }
0x11ae   :  { %3035 = vtanh.f32 %v1141_v63  ;;  %v1522_v63 = vld [vmem:[#allocation5 + $0x80] sm:$0xff] }
0x11af   :  { %3037 = vtanh.f32 %v1170_v2  ;;  %v1524_v2 = vld [vmem:[#allocation5 + $0x90] sm:$0xff] }
0x11b6   :  { %v3032_v62 = vpop.eup %3031 }
0x11b7   :  { %v3034_v21 = vpop.eup %3033  ;;  %1148 = vrot.lane.b32.xlu0 %v3032_v62, %s3204_s0  ;;  %v2809_v62 = vpack.c.bf16 %v1341_v57, %v1339_v55 }
0x11b8   :  { %1177 = vrot.lane.b32.xlu1 %v3034_v21, %s3204_s0  ;;  %v3036_v3 = vpop.eup %3035  ;;  %v3578_v21 = vpack.c.bf16 %v1525_v60, %v1523_v25  ;;  %v2633_v60 = vld [vmem:[%s3910_s3 + $0x2] sm:$0x3] }
0x11b9   :  { %v3038_v4 = vpop.eup %3037  ;;  %v1143_v1 = vmul.f32 0.5, %v3036_v3  ;;  %v1344_v3 = vld [vmem:[#allocation3 + $0xa8] sm:$0xff]  ;;  %2810 = vmatpush1.bf16.msra.mxu0 %v2809_v62  ;;  %v1361_v62 = vrot.slane %v2633_v60, %v73_v59 }
0x11ba   :  { %v1172_v6 = vmul.f32 0.5, %v3038_v4  ;;  %v3580_v4 = vpack.c.bf16 %v1524_v2, %v1522_v63  ;;  %2824 = vmatprep.subr.bf16.mxu1 %v3578_v21  ;;  %v1365_v63 = vrot.slane %v2633_v60, %v77_v61 }
0x11bb   :  { %v1144_v34 = vadd.f32 0.5, %v1143_v1  ;;  %v1346_v1 = vld [vmem:[#allocation3 + $0xb8] sm:$0xff] }
0x11bc   :  { %v1173_v9 = vadd.f32 0.5, %v1172_v6  ;;  %v1343_v6 = vld [vmem:[#allocation3 + $0xa0] sm:$0xff] }
0x11bd   :  { %v1146_v19 = vmul.f32 %v1144_v34, %v1023_v45 }
0x11be   :  { %v1175_v16 = vmul.f32 %v1173_v9, %v1052_v10 }
0x1229   :  { %v1149_v7 = vpop.permute.xlu0 %1148 }
0x122a   :  { %v1151_v12 = vmul.f32 %v1149_v7, %v1144_v34  ;;  %v1178_v8 = vpop.permute.xlu1 %1177  ;;  %v2811_v7 = vpack.c.bf16 %v1346_v1, %v1344_v3 }
0x122b   :  { %v1180_v11 = vmul.f32 %v1178_v8, %v1173_v9  ;;  %v1529_v8 = vld [vmem:[#allocation5 + $0xb8] sm:$0xff] }
0x122c   :  { %1153 = vrot.lane.b32.xlu0 %v1151_v12, %s3204_s0  ;;  %v1527_v12 = vld [vmem:[#allocation5 + $0xa8] sm:$0xff]  ;;  %2812 = vmatprep.subr.bf16.mxu0 %v2811_v7 }
0x122d   :  { %1182 = vrot.lane.b32.xlu1 %v1180_v11, %s3204_s0  ;;  %v3584_v11 = vpack.c.bf16 %v1529_v8, %v1527_v12 }
0x129e   :  { %v1154_v14 = vpop.permute.xlu0 %1153 }
0x129f   :  { %v1156_v28 = vadd.f32 %v1154_v14, %v1146_v19  ;;  %v1183_v18 = vpop.permute.xlu1 %1182 }
0x12a0   :  { %v1185_v20 = vadd.f32 %v1183_v18, %v1175_v16  ;;  %v1526_v16 = vld [vmem:[#allocation5 + $0xa0] sm:$0xff] }
0x12a1   :  { %3039 = vtanh.f32 %v1156_v28 }
0x12a2   :  { %3041 = vtanh.f32 %v1185_v20 }
0x12ab   :  { %v3040_v23 = vpop.eup %3039 }
0x12ac   :  { %v3042_v24 = vpop.eup %3041  ;;  %1159 = vrot.lane.b32.xlu0 %v3040_v23, %s3204_s0  ;;  %v1350_v23 = vld [vmem:[#allocation3 + $0xd8] sm:$0xff] }
0x12ad   :  { %1188 = vrot.lane.b32.xlu1 %v3042_v24, %s3204_s0 }
0x131e   :  { %v1160_v27 = vpop.permute.xlu0 %1159 }
0x131f   :  { %v1162_v29 = vmul.f32 %v1160_v27, %v1144_v34  ;;  %v1189_v13 = vpop.permute.xlu1 %1188  ;;  %v1345_v34 = vld [vmem:[#allocation3 + $0xb0] sm:$0xff]  ;;  %v1347_v27 = vld [vmem:[#allocation3 + $0xc0] sm:$0xff] }
0x1320   :  { %v1191_v31 = vmul.f32 %v1189_v13, %v1173_v9  ;;  %v2813_v9 = vpack.c.bf16 %v1345_v34, %v1343_v6 }
0x1321   :  { %1164 = vrot.lane.b32.xlu0 %v1162_v29, %s3205_s5  ;;  %v1349_v29 = vld [vmem:[#allocation3 + $0xd0] sm:$0xff] }
0x1322   :  { %1193 = vrot.lane.b32.xlu1 %v1191_v31, %s3206_s6  ;;  %2814 = vmatpush1.bf16.msra.mxu0 %v2813_v9  ;;  %v2817_v13 = vpack.c.bf16 %v1349_v29, %v1347_v27  ;;  %v1531_v31 = vld [vmem:[#allocation5 + $0xc8] sm:$0xff] }
0x1393   :  { %v1165_v22 = vpop.permute.xlu0 %1164 }
0x1394   :  { %2629 = vst.msk [vmem:[%s3911_s4 + $0x30] sm:$0xff] %vm353_vm1, %v1165_v22  ;;  %v1194_v26 = vpop.permute.xlu1 %1193 }
0x1395   :  { %2630 = vst.msk [vmem:[%s3911_s4 + $0x8] sm:$0xff] %vm385_vm2, %v1194_v26  ;;  %v1197_v35 = vsel %vm353_vm1, %v1165_v22, %v1194_v26  ;;  %v1533_v22 = vld [vmem:[#allocation5 + $0xd8] sm:$0xff] }
0x1396   :  { %2631 = vmatmul.mubr.msk.f32.vlgmr.msra.gmra.mrb[8].mxu1 %vm81_vm0, %v1197_v35  ;;  %v3592_v26 = vpack.c.bf16 %v1533_v22, %v1531_v31  ;;  %v1530_v35 = vld [vmem:[#allocation5 + $0xc0] sm:$0xff] }
0x1397   :  { %1602 = vmatprep.mubr.f32.mxu1 %v3203_v0  ;;  %2826 = vmatpush1.bf16.msra.mxu1 %v3580_v4 }
0x1398   :  { %2828 = vmatprep.subr.bf16.mxu1 %v3584_v11 }
0x139b   :  { %v1336_v55 = vld [vmem:[%s3911_s4 + $0x30] sm:$0xff] }
0x1469   :  { %v1267_v39 = vpop.f32.mrb[8].mxu1 }
0x146a   :  { %v1273_v44 = vadd.f32 %v1267_v39, %v3380_v40  ;;  %v1269_v48 = vpop.f32.mrb[9].mxu1  ;;  %v1532_v39 = vld [vmem:[#allocation5 + $0xd0] sm:$0xff] }
0x146b   :  { %v1302_v33 = vadd.f32 %v1269_v48, %v3353_v5  ;;  %v3594_v48 = vpack.c.bf16 %v1532_v39, %v1530_v35 }
0x146c   :  { %3043 = vtanh.f32 %v1273_v44  ;;  %v1274_v36 = vmul.f32 0.5, %v1273_v44  ;;  %v1352_v44 = vld [vmem:[#allocation3 + $0xe8] sm:$0xff] }
0x146d   :  { %3045 = vtanh.f32 %v1302_v33  ;;  %v1303_v17 = vmul.f32 0.5, %v1302_v33  ;;  %v1354_v33 = vld [vmem:[#allocation3 + $0xf8] sm:$0xff] }
0x146e   :  { %3047 = vtanh.f32 %v1274_v36  ;;  %v2819_v36 = vpack.c.bf16 %v1354_v33, %v1352_v44 }
0x146f   :  { %3049 = vtanh.f32 %v1303_v17 }
0x1476   :  { %v3044_v30 = vpop.eup %3043 }
0x1477   :  { %v3046_v15 = vpop.eup %3045  ;;  %1281 = vrot.lane.b32.xlu1 %v3044_v30, %s3204_s0  ;;  %v1351_v30 = vld [vmem:[#allocation3 + $0xe0] sm:$0xff] }
0x1478   :  { %1310 = vrot.lane.b32.xlu0 %v3046_v15, %s3204_s0  ;;  %v3048_v38 = vpop.eup %3047  ;;  %v1353_v15 = vld [vmem:[#allocation3 + $0xf0] sm:$0xff] }
0x1479   :  { %v3050_v32 = vpop.eup %3049  ;;  %v1276_v41 = vmul.f32 0.5, %v3048_v38  ;;  %v2821_v17 = vpack.c.bf16 %v1353_v15, %v1351_v30  ;;  %v1535_v38 = vld [vmem:[#allocation5 + $0xe8] sm:$0xff] }
0x147a   :  { %v1305_v42 = vmul.f32 0.5, %v3050_v32  ;;  %v1537_v32 = vld [vmem:[#allocation5 + $0xf8] sm:$0xff] }
0x147b   :  { %v3568_v40 = vadd.f32 0.5, %v1276_v41  ;;  %v1534_v41 = vld [vmem:[#allocation5 + $0xe0] sm:$0xff] }
0x147c   :  { %v3570_v5 = vadd.f32 0.5, %v1305_v42  ;;  %v3598_v42 = vpack.c.bf16 %v1537_v32, %v1535_v38 }
0x147d   :  { %v1279_v47 = vmul.f32 %v3568_v40, %v1156_v28  ;;  %v1528_v28 = vld [vmem:[#allocation5 + $0xb0] sm:$0xff] }
0x147e   :  { %v1308_v37 = vmul.f32 %v3570_v5, %v1185_v20  ;;  %v3589_v18 = vpack.c.bf16 %v1528_v28, %v1526_v16  ;;  %v1348_v20 = vld [vmem:[#allocation3 + $0xc8] sm:$0xff] }
0x147f   :  { %v2815_v24 = vpack.c.bf16 %v1350_v23, %v1348_v20 }
0x1480   :  { %2830 = vmatpush1.bf16.msra.mxu1 %v3589_v18 }
0x1481   :  { %2816 = vmatprep.subr.bf16.mxu0 %v2815_v24  ;;  %2832 = vmatprep.subr.bf16.mxu1 %v3592_v26 }
0x1482   :  { %2818 = vmatpush1.bf16.msra.mxu0 %v2817_v13 }
0x1483   :  { %2820 = vmatprep.subr.bf16.mxu0 %v2819_v36 }
0x1484   :  { %2834 = vmatpush1.bf16.msra.mxu1 %v3594_v48 }
0x1485   :  { %2836 = vmatprep.subr.bf16.mxu1 %v3598_v42 }
0x1486   :  { %2822 = vmatpush1.bf16.msra.mxu0 %v2821_v17 }
0x1487   :  { %2856 = vmatprep.subr.bf16.mxu0 %v3578_v21 }
0x14e9   :  { %v1282_v43 = vpop.permute.xlu1 %1281 }
0x14ea   :  { %v1284_v45 = vmul.f32 %v1282_v43, %v3568_v40  ;;  %v1311_v46 = vpop.permute.xlu0 %1310  ;;  %v1536_v43 = vld [vmem:[#allocation5 + $0xf0] sm:$0xff] }
0x14eb   :  { %v1313_v10 = vmul.f32 %v1311_v46, %v3570_v5 }
0x14ec   :  { %1286 = vrot.lane.b32.xlu1 %v1284_v45, %s3204_s0  ;;  %v3600_v45 = vpack.c.bf16 %v1536_v43, %v1534_v41 }
0x14ed   :  { %1315 = vrot.lane.b32.xlu0 %v1313_v10, %s3204_s0 }
0x14ee   :  { %2838 = vmatpush1.bf16.msra.mxu1 %v3600_v45 }
0x14ef   :  { %2840 = vmatprep.subr.bf16.mxu1 %v3578_v21 }
0x14f1   :  { %1603 = vmatmul.mubr.f32.vlgmr.msra.gmra.mrb[10].mxu1 %v3203_v0 }
0x14f2   :  { %2842 = vmatpush1.bf16.msra.mxu1 %v3580_v4  ;;  %1735 = vmatprep.mubr.f32.mxu1 %v3203_v0 }
0x14f3   :  { %2844 = vmatprep.subr.bf16.mxu1 %v3584_v11 }
0x14f6   :  { %2846 = vmatpush1.bf16.msra.mxu1 %v3589_v18 }
0x14f7   :  { %2848 = vmatprep.subr.bf16.mxu1 %v3592_v26 }
0x14fa   :  { %2850 = vmatpush1.bf16.msra.mxu1 %v3594_v48 }
0x14fb   :  { %2852 = vmatprep.subr.bf16.mxu1 %v3598_v42 }
0x14fe   :  { %2854 = vmatpush1.bf16.msra.mxu1 %v3600_v45 }
0x14ff   :  { %2872 = vmatprep.subr.bf16.mxu1 %v3578_v21 }
0x155e   :  { %v1287_v49 = vpop.permute.xlu1 %1286 }
0x155f   :  { %v1289_v50 = vadd.f32 %v1287_v49, %v1279_v47  ;;  %v1316_v51 = vpop.permute.xlu0 %1315 }
0x1560   :  { %v1318_v52 = vadd.f32 %v1316_v51, %v1308_v37  ;;  %v1332_v51 = vld [vmem:[%s3911_s4 + $0x10] sm:$0xff] }
0x1561   :  { %3051 = vtanh.f32 %v1289_v50  ;;  %v1331_v50 = vld [vmem:[%s3911_s4 + $0x8] sm:$0xff] }
0x1562   :  { %3053 = vtanh.f32 %v1318_v52  ;;  %v1333_v52 = vld [vmem:[%s3911_s4 + $0x18] sm:$0xff] }
0x156b   :  { %v3052_v19 = vpop.eup %3051 }
0x156c   :  { %v3054_v14 = vpop.eup %3053  ;;  %1292 = vrot.lane.b32.xlu1 %v3052_v19, %s3204_s0 }
0x156d   :  { %1321 = vrot.lane.b32.xlu0 %v3054_v14, %s3204_s0 }
0x15c4   :  { %v1604_v57 = vpop.f32.mrb[10].mxu1 }
0x15c5   :  { %v1606_v25 = vpop.f32.mrb[11].mxu1 }
0x15de   :  { %v1293_v46 = vpop.permute.xlu1 %1292 }
0x15df   :  { %v1295_v10 = vmul.f32 %v1293_v46, %v3568_v40  ;;  %v1322_v47 = vpop.permute.xlu0 %1321 }
0x15e0   :  { %v1324_v49 = vmul.f32 %v1322_v47, %v3570_v5 }
0x15e1   :  { %1297 = vrot.lane.b32.xlu1 %v1295_v10, %s3205_s5 }
0x15e2   :  { %1326 = vrot.lane.b32.xlu0 %v1324_v49, %s3206_s6 }
0x1653   :  { %v1298_v40 = vpop.permute.xlu1 %1297 }
0x1654   :  { %2632 = vst.msk [vmem:[%s3911_s4 + $0x38] sm:$0xff] %vm353_vm1, %v1298_v40  ;;  %v1327_v5 = vpop.permute.xlu0 %1326 }
0x1655   :  { %1329 = vst.msk [vmem:[%s3911_s4] sm:$0xff] %vm385_vm2, %v1327_v5 }
0x165b   :  { %v1337_v56 = vld [vmem:[%s3911_s4 + $0x38] sm:$0xff] }
0x165c   :  { %v1330_v37 = vld [vmem:[%s3911_s4] sm:$0xff] }
0x165d   :  { %2634 = vmatmul.mubr.msk.f32.vlgmr.msra.gmra.mrb[22].mxu0 %vm81_vm0, %v1330_v37 }
0x165e   :  { %1462 = vmatprep.mubr.f32.mxu0 %v3203_v0  ;;  %2858 = vmatpush1.bf16.msra.mxu0 %v3580_v4 }
0x165f   :  { %2860 = vmatprep.subr.bf16.mxu0 %v3584_v11 }
0x1661   :  { %2635 = vmatmul.mubr.msk.f32.gmra.mrb[24].mxu0 %vm81_vm0, %v1331_v50 }
0x1662   :  { %1468 = vmatprep.mubr.f32.mxu0 %v3203_v0  ;;  %2862 = vmatpush1.bf16.msra.mxu0 %v3589_v18 }
0x1663   :  { %2864 = vmatprep.subr.bf16.mxu0 %v3592_v26 }
0x1665   :  { %2636 = vmatmul.mubr.msk.f32.gmra.mrb[26].mxu0 %vm81_vm0, %v1332_v51 }
0x1666   :  { %1474 = vmatprep.mubr.f32.mxu0 %v3203_v0  ;;  %2866 = vmatpush1.bf16.msra.mxu0 %v3594_v48 }
0x1667   :  { %2868 = vmatprep.subr.bf16.mxu0 %v3598_v42 }
0x1669   :  { %2637 = vmatmul.mubr.msk.f32.gmra.mrb[28].mxu0 %vm81_vm0, %v1333_v52 }
0x166a   :  { %1480 = vmatprep.mubr.f32.mxu0 %v3203_v0  ;;  %2870 = vmatpush1.bf16.msra.mxu0 %v3600_v45 }
0x166b   :  { %2888 = vmatprep.subr.bf16.mxu0 %v3578_v21 }
0x166d   :  { %2638 = vmatmul.mubr.msk.f32.gmra.mrb[30].mxu0 %vm81_vm0, %v1334_v53 }
0x166e   :  { %1486 = vmatprep.mubr.f32.mxu0 %v3203_v0 }
0x1671   :  { %2639 = vmatmul.mubr.msk.f32.gmra.mrb[32].mxu0 %vm81_vm0, %v1335_v54 }
0x1672   :  { %1492 = vmatprep.mubr.f32.mxu0 %v3203_v0 }
0x1675   :  { %2640 = vmatmul.mubr.msk.f32.gmra.mrb[34].mxu0 %vm81_vm0, %v1336_v55 }
0x1676   :  { %1498 = vmatprep.mubr.f32.mxu0 %v3203_v0 }
0x1679   :  { %2641 = vmatmul.mubr.msk.f32.gmra.mrb[36].mxu0 %vm81_vm0, %v1337_v56 }
0x167a   :  { %1868 = vmatprep.mubr.f32.mxu0 %v3203_v0 }
0x1730   :  { %v1458_v2 = vpop.f32.mrb[22].mxu0 }
0x1731   :  { %v1459_v3 = vadd.f32 %v1458_v2, %v1361_v62  ;;  %v1460_v1 = vpop.f32.mrb[23].mxu0 }
0x1732   :  { %v3683_v6 = vadd.f32 %v1460_v1, %v1365_v63 }
0x1733   :  { %v1610_v34 = vadd.f32 %v1604_v57, %v1459_v3 }
0x1734   :  { %v1464_v7 = vpop.f32.mrb[24].mxu0 }
0x1735   :  { %3055 = vtanh.f32 %v1610_v34  ;;  %v3685_v9 = vadd.f32 %v1464_v7, %v1361_v62  ;;  %v1466_v12 = vpop.f32.mrb[25].mxu0  ;;  %v1611_v46 = vmul.f32 0.5, %v1610_v34 }
0x1736   :  { %v3687_v8 = vadd.f32 %v1466_v12, %v1365_v63 }
0x1738   :  { %v1470_v19 = vpop.f32.mrb[26].mxu0 }
0x1739   :  { %v3689_v14 = vadd.f32 %v1470_v19, %v1361_v62  ;;  %v1472_v59 = vpop.f32.mrb[27].mxu0 }
0x173a   :  { %v3691_v16 = vadd.f32 %v1472_v59, %v1365_v63 }
0x173c   :  { %v1476_v58 = vpop.f32.mrb[28].mxu0 }
0x173d   :  { %v3693_v61 = vadd.f32 %v1476_v58, %v1361_v62  ;;  %v1478_v28 = vpop.f32.mrb[29].mxu0 }
0x173e   :  { %v3695_v20 = vadd.f32 %v1478_v28, %v1365_v63 }
0x173f   :  { %v3056_v23 = vpop.eup %3055 }
0x1740   :  { %v1482_v24 = vpop.f32.mrb[30].mxu0  ;;  %1618 = vrot.lane.b32.xlu0 %v3056_v23, %s3204_s0 }
0x1741   :  { %v3698_v27 = vadd.f32 %v1482_v24, %v1361_v62  ;;  %v1484_v29 = vpop.f32.mrb[31].mxu0 }
0x1742   :  { %v3700_v13 = vadd.f32 %v1484_v29, %v1365_v63 }
0x1744   :  { %v1488_v31 = vpop.f32.mrb[32].mxu0 }
0x1745   :  { %v3702_v22 = vadd.f32 %v1488_v31, %v1361_v62  ;;  %v1490_v35 = vpop.f32.mrb[33].mxu0 }
0x1746   :  { %v3704_v39 = vadd.f32 %v1490_v35, %v1365_v63 }
0x1748   :  { %v1494_v44 = vpop.f32.mrb[34].mxu0 }
0x1749   :  { %v3706_v33 = vadd.f32 %v1494_v44, %v1361_v62  ;;  %v1496_v30 = vpop.f32.mrb[35].mxu0 }
0x174a   :  { %v1497_v15 = vadd.f32 %v1496_v30, %v1365_v63 }
0x174c   :  { %v1500_v36 = vpop.f32.mrb[36].mxu0 }
0x174d   :  { %v3708_v17 = vadd.f32 %v1500_v36, %v1361_v62  ;;  %v1502_v38 = vpop.f32.mrb[37].mxu0 }
0x174e   :  { %v1503_v32 = vadd.f32 %v1502_v38, %v1365_v63 }
0x1750   :  { %v1639_v41 = vadd.f32 %v1606_v25, %v1503_v32 }
0x1752   :  { %3057 = vtanh.f32 %v1639_v41  ;;  %v1640_v37 = vmul.f32 0.5, %v1639_v41 }
0x1753   :  { %3059 = vtanh.f32 %v1611_v46 }
0x1754   :  { %3061 = vtanh.f32 %v1640_v37 }
0x175c   :  { %v3058_v43 = vpop.eup %3057 }
0x175d   :  { %1647 = vrot.lane.b32.xlu1 %v3058_v43, %s3204_s0  ;;  %v3060_v10 = vpop.eup %3059 }
0x175e   :  { %v1613_v47 = vmul.f32 0.5, %v3060_v10  ;;  %v3062_v50 = vpop.eup %3061 }
0x175f   :  { %v1642_v51 = vmul.f32 0.5, %v3062_v50 }
0x1760   :  { %v1614_v49 = vadd.f32 0.5, %v1613_v47 }
0x1761   :  { %v1643_v52 = vadd.f32 0.5, %v1642_v51 }
0x1762   :  { %v1616_v55 = vmul.f32 0.0, %v1614_v49 }
0x1763   :  { %v1645_v60 = vmul.f32 0.0, %v1643_v52 }
0x17b2   :  { %v1619_v40 = vpop.permute.xlu0 %1618 }
0x17b3   :  { %v1621_v5 = vmul.f32 %v1619_v40, %v1614_v49 }
0x17b5   :  { %1623 = vrot.lane.b32.xlu0 %v1621_v5, %s3204_s0 }
0x17cf   :  { %v1648_v53 = vpop.permute.xlu1 %1647 }
0x17d0   :  { %v1650_v54 = vmul.f32 %v1648_v53, %v1643_v52 }
0x17d2   :  { %1652 = vrot.lane.b32.xlu1 %v1650_v54, %s3204_s0 }
0x1827   :  { %v1624_v56 = vpop.permute.xlu0 %1623 }
0x1828   :  { %v1626_v57 = vadd.f32 %v1624_v56, %v1616_v55 }
0x182a   :  { %3063 = vtanh.f32 %v1626_v57 }
0x1834   :  { %v3064_v25 = vpop.eup %3063 }
0x1835   :  { %1629 = vrot.lane.b32.xlu0 %v3064_v25, %s3204_s0 }
0x1844   :  { %v1653_v62 = vpop.permute.xlu1 %1652 }
0x1845   :  { %v1655_v63 = vadd.f32 %v1653_v62, %v1645_v60 }
0x1847   :  { %3065 = vtanh.f32 %v1655_v63 }
0x1851   :  { %v3066_v2 = vpop.eup %3065 }
0x1852   :  { %1658 = vrot.lane.b32.xlu1 %v3066_v2, %s3204_s0 }
0x18a7   :  { %v1630_v3 = vpop.permute.xlu0 %1629 }
0x18a8   :  { %v1632_v1 = vmul.f32 %v1630_v3, %v1614_v49 }
0x18aa   :  { %1634 = vrot.lane.b32.xlu0 %v1632_v1, %s3205_s5 }
0x18c4   :  { %v1659_v34 = vpop.permute.xlu1 %1658 }
0x18c5   :  { %v1661_v7 = vmul.f32 %v1659_v34, %v1643_v52 }
0x18c7   :  { %1663 = vrot.lane.b32.xlu1 %v1661_v7, %s3206_s6 }
0x191c   :  { %v1635_v12 = vpop.permute.xlu0 %1634 }
0x191d   :  { %1637 = vst.msk [vmem:[%s3911_s4] sm:$0xff] %vm353_vm1, %v1635_v12 }
0x1939   :  { %v1664_v19 = vpop.permute.xlu1 %1663 }
0x193a   :  { %2642 = vst.msk [vmem:[%s3911_s4 + $0x38] sm:$0xff] %vm385_vm2, %v1664_v19  ;;  %v1667_v59 = vsel %vm353_vm1, %v1635_v12, %v1664_v19 }
0x193b   :  { %2643 = vmatmul.mubr.msk.f32.vlgmr.msra.gmra.mrb[12].mxu1 %vm81_vm0, %v1667_v59 }
0x193c   :  { %2874 = vmatpush1.bf16.msra.mxu1 %v3580_v4  ;;  %2001 = vmatprep.mubr.f32.mxu1 %v3203_v0 }
0x193d   :  { %2876 = vmatprep.subr.bf16.mxu1 %v3584_v11 }
0x1940   :  { %2878 = vmatpush1.bf16.msra.mxu1 %v3589_v18 }
0x1941   :  { %2880 = vmatprep.subr.bf16.mxu1 %v3592_v26 }
0x1944   :  { %2882 = vmatpush1.bf16.msra.mxu1 %v3594_v48 }
0x1945   :  { %2884 = vmatprep.subr.bf16.mxu1 %v3598_v42 }
0x1948   :  { %2886 = vmatpush1.bf16.msra.mxu1 %v3600_v45 }
0x1949   :  { %2904 = vmatprep.subr.bf16.mxu1 %v3578_v21 }
0x1a0e   :  { %v1737_v58 = vpop.f32.mrb[12].mxu1 }
0x1a0f   :  { %v1743_v28 = vadd.f32 %v1737_v58, %v3685_v9  ;;  %v1739_v23 = vpop.f32.mrb[13].mxu1 }
0x1a10   :  { %v1772_v24 = vadd.f32 %v1739_v23, %v1497_v15 }
0x1a11   :  { %3067 = vtanh.f32 %v1743_v28  ;;  %v1744_v35 = vmul.f32 0.5, %v1743_v28 }
0x1a12   :  { %3069 = vtanh.f32 %v1772_v24  ;;  %v1773_v44 = vmul.f32 0.5, %v1772_v24 }
0x1a13   :  { %3071 = vtanh.f32 %v1744_v35 }
0x1a14   :  { %3073 = vtanh.f32 %v1773_v44 }
0x1a1b   :  { %v3068_v29 = vpop.eup %3067 }
0x1a1c   :  { %v3070_v31 = vpop.eup %3069  ;;  %1751 = vrot.lane.b32.xlu0 %v3068_v29, %s3204_s0 }
0x1a1d   :  { %1780 = vrot.lane.b32.xlu1 %v3070_v31, %s3204_s0  ;;  %v3072_v30 = vpop.eup %3071 }
0x1a1e   :  { %v3074_v36 = vpop.eup %3073  ;;  %v1746_v38 = vmul.f32 0.5, %v3072_v30 }
0x1a1f   :  { %v1775_v32 = vmul.f32 0.5, %v3074_v36 }
0x1a20   :  { %v1747_v41 = vadd.f32 0.5, %v1746_v38 }
0x1a21   :  { %v1776_v43 = vadd.f32 0.5, %v1775_v32 }
0x1a22   :  { %v1749_v47 = vmul.f32 %v1747_v41, %v1626_v57 }
0x1a23   :  { %v1778_v40 = vmul.f32 %v1776_v43, %v1655_v63 }
0x1a8e   :  { %v1752_v9 = vpop.permute.xlu0 %1751 }
0x1a8f   :  { %v1754_v15 = vmul.f32 %v1752_v9, %v1747_v41  ;;  %v1781_v46 = vpop.permute.xlu1 %1780 }
0x1a90   :  { %v1783_v10 = vmul.f32 %v1781_v46, %v1776_v43 }
0x1a91   :  { %1756 = vrot.lane.b32.xlu0 %v1754_v15, %s3204_s0 }
0x1a92   :  { %1785 = vrot.lane.b32.xlu1 %v1783_v10, %s3204_s0 }
0x1b03   :  { %v1757_v49 = vpop.permute.xlu0 %1756 }
0x1b04   :  { %v1759_v5 = vadd.f32 %v1757_v49, %v1749_v47  ;;  %v1786_v37 = vpop.permute.xlu1 %1785 }
0x1b05   :  { %v1788_v50 = vadd.f32 %v1786_v37, %v1778_v40 }
0x1b06   :  { %3075 = vtanh.f32 %v1759_v5 }
0x1b07   :  { %3077 = vtanh.f32 %v1788_v50 }
0x1b10   :  { %v3076_v51 = vpop.eup %3075 }
0x1b11   :  { %v3078_v52 = vpop.eup %3077  ;;  %1762 = vrot.lane.b32.xlu0 %v3076_v51, %s3204_s0 }
0x1b12   :  { %1791 = vrot.lane.b32.xlu1 %v3078_v52, %s3204_s0 }
0x1b83   :  { %v1763_v53 = vpop.permute.xlu0 %1762 }
0x1b84   :  { %v1765_v54 = vmul.f32 %v1763_v53, %v1747_v41  ;;  %v1792_v55 = vpop.permute.xlu1 %1791 }
0x1b85   :  { %v1794_v56 = vmul.f32 %v1792_v55, %v1776_v43 }
0x1b86   :  { %1767 = vrot.lane.b32.xlu0 %v1765_v54, %s3205_s5 }
0x1b87   :  { %1796 = vrot.lane.b32.xlu1 %v1794_v56, %s3206_s6 }
0x1bf8   :  { %v1768_v57 = vpop.permute.xlu0 %1767 }
0x1bf9   :  { %2644 = vst.msk [vmem:[%s3911_s4 + $0x8] sm:$0xff] %vm353_vm1, %v1768_v57  ;;  %v1797_v25 = vpop.permute.xlu1 %1796 }
0x1bfa   :  { %2645 = vst.msk [vmem:[%s3911_s4 + $0x30] sm:$0xff] %vm385_vm2, %v1797_v25  ;;  %v1800_v60 = vsel %vm353_vm1, %v1768_v57, %v1797_v25 }
0x1bfb   :  { %2646 = vmatmul.mubr.msk.f32.vlgmr.msra.gmra.mrb[38].mxu0 %vm81_vm0, %v1800_v60 }
0x1bfc   :  { %2890 = vmatpush1.bf16.msra.mxu0 %v3580_v4  ;;  %2134 = vmatprep.mubr.f32.mxu0 %v3203_v0 }
0x1bfd   :  { %2892 = vmatprep.subr.bf16.mxu0 %v3584_v11 }
0x1c00   :  { %2894 = vmatpush1.bf16.msra.mxu0 %v3589_v18 }
0x1c01   :  { %2896 = vmatprep.subr.bf16.mxu0 %v3592_v26 }
0x1c04   :  { %2898 = vmatpush1.bf16.msra.mxu0 %v3594_v48 }
0x1c05   :  { %2900 = vmatprep.subr.bf16.mxu0 %v3598_v42 }
0x1c08   :  { %2902 = vmatpush1.bf16.msra.mxu0 %v3600_v45 }
0x1c09   :  { %2920 = vmatprep.subr.bf16.mxu0 %v3578_v21 }
0x1cce   :  { %v1870_v62 = vpop.f32.mrb[38].mxu0 }
0x1ccf   :  { %v1876_v63 = vadd.f32 %v1870_v62, %v3689_v14  ;;  %v1872_v2 = vpop.f32.mrb[39].mxu0 }
0x1cd0   :  { %v1905_v3 = vadd.f32 %v1872_v2, %v3704_v39 }
0x1cd1   :  { %3079 = vtanh.f32 %v1876_v63  ;;  %v1877_v7 = vmul.f32 0.5, %v1876_v63 }
0x1cd2   :  { %3081 = vtanh.f32 %v1905_v3  ;;  %v1906_v12 = vmul.f32 0.5, %v1905_v3 }
0x1cd3   :  { %3083 = vtanh.f32 %v1877_v7 }
0x1cd4   :  { %3085 = vtanh.f32 %v1906_v12 }
0x1cdb   :  { %v3080_v1 = vpop.eup %3079 }
0x1cdc   :  { %v3082_v34 = vpop.eup %3081  ;;  %1884 = vrot.lane.b32.xlu0 %v3080_v1, %s3204_s0 }
0x1cdd   :  { %1913 = vrot.lane.b32.xlu1 %v3082_v34, %s3204_s0  ;;  %v3084_v19 = vpop.eup %3083 }
0x1cde   :  { %v3086_v59 = vpop.eup %3085  ;;  %v1879_v58 = vmul.f32 0.5, %v3084_v19 }
0x1cdf   :  { %v1908_v28 = vmul.f32 0.5, %v3086_v59 }
0x1ce0   :  { %v1880_v14 = vadd.f32 0.5, %v1879_v58 }
0x1ce1   :  { %v1909_v24 = vadd.f32 0.5, %v1908_v28 }
0x1ce2   :  { %v1882_v35 = vmul.f32 %v1880_v14, %v1759_v5 }
0x1ce3   :  { %v1911_v30 = vmul.f32 %v1909_v24, %v1788_v50 }
0x1d4e   :  { %v1885_v23 = vpop.permute.xlu0 %1884 }
0x1d4f   :  { %v1887_v39 = vmul.f32 %v1885_v23, %v1880_v14  ;;  %v1914_v29 = vpop.permute.xlu1 %1913 }
0x1d50   :  { %v1916_v31 = vmul.f32 %v1914_v29, %v1909_v24 }
0x1d51   :  { %1889 = vrot.lane.b32.xlu0 %v1887_v39, %s3204_s0 }
0x1d52   :  { %1918 = vrot.lane.b32.xlu1 %v1916_v31, %s3204_s0 }
0x1dc3   :  { %v1890_v44 = vpop.permute.xlu0 %1889 }
0x1dc4   :  { %v1892_v36 = vadd.f32 %v1890_v44, %v1882_v35  ;;  %v1919_v38 = vpop.permute.xlu1 %1918 }
0x1dc5   :  { %v1921_v32 = vadd.f32 %v1919_v38, %v1911_v30 }
0x1dc6   :  { %3087 = vtanh.f32 %v1892_v36 }
0x1dc7   :  { %3089 = vtanh.f32 %v1921_v32 }
0x1dd0   :  { %v3088_v41 = vpop.eup %3087 }
0x1dd1   :  { %v3090_v9 = vpop.eup %3089  ;;  %1895 = vrot.lane.b32.xlu0 %v3088_v41, %s3204_s0 }
0x1dd2   :  { %1924 = vrot.lane.b32.xlu1 %v3090_v9, %s3204_s0 }
0x1e43   :  { %v1896_v43 = vpop.permute.xlu0 %1895 }
0x1e44   :  { %v1898_v15 = vmul.f32 %v1896_v43, %v1880_v14  ;;  %v1925_v46 = vpop.permute.xlu1 %1924 }
0x1e45   :  { %v1927_v10 = vmul.f32 %v1925_v46, %v1909_v24 }
0x1e46   :  { %1900 = vrot.lane.b32.xlu0 %v1898_v15, %s3205_s5 }
0x1e47   :  { %1929 = vrot.lane.b32.xlu1 %v1927_v10, %s3206_s6 }
0x1eb8   :  { %v1901_v47 = vpop.permute.xlu0 %1900 }
0x1eb9   :  { %2647 = vst.msk [vmem:[%s3911_s4 + $0x10] sm:$0xff] %vm353_vm1, %v1901_v47  ;;  %v1930_v49 = vpop.permute.xlu1 %1929 }
0x1eba   :  { %2648 = vst.msk [vmem:[%s3911_s4 + $0x28] sm:$0xff] %vm385_vm2, %v1930_v49  ;;  %v1933_v40 = vsel %vm353_vm1, %v1901_v47, %v1930_v49 }
0x1ebb   :  { %2649 = vmatmul.mubr.msk.f32.vlgmr.msra.gmra.mrb[14].mxu1 %vm81_vm0, %v1933_v40 }
0x1ebc   :  { %2906 = vmatpush1.bf16.msra.mxu1 %v3580_v4  ;;  %2267 = vmatprep.mubr.f32.mxu1 %v3203_v0 }
0x1ebd   :  { %2908 = vmatprep.subr.bf16.mxu1 %v3584_v11 }
0x1ec0   :  { %2910 = vmatpush1.bf16.msra.mxu1 %v3589_v18 }
0x1ec1   :  { %2912 = vmatprep.subr.bf16.mxu1 %v3592_v26 }
0x1ec4   :  { %2914 = vmatpush1.bf16.msra.mxu1 %v3594_v48 }
0x1ec5   :  { %2916 = vmatprep.subr.bf16.mxu1 %v3598_v42 }
0x1ec8   :  { %2918 = vmatpush1.bf16.msra.mxu1 %v3600_v45 }
0x1ec9   :  { %2936 = vmatprep.subr.bf16.mxu1 %v3578_v21 }
0x1f8e   :  { %v2003_v5 = vpop.f32.mrb[14].mxu1 }
0x1f8f   :  { %v2009_v37 = vadd.f32 %v2003_v5, %v3693_v61  ;;  %v2005_v50 = vpop.f32.mrb[15].mxu1 }
0x1f90   :  { %v2038_v51 = vadd.f32 %v2005_v50, %v3700_v13 }
0x1f91   :  { %3091 = vtanh.f32 %v2009_v37  ;;  %v2010_v54 = vmul.f32 0.5, %v2009_v37 }
0x1f92   :  { %3093 = vtanh.f32 %v2038_v51  ;;  %v2039_v55 = vmul.f32 0.5, %v2038_v51 }
0x1f93   :  { %3095 = vtanh.f32 %v2010_v54 }
0x1f94   :  { %3097 = vtanh.f32 %v2039_v55 }
0x1f9b   :  { %v3092_v52 = vpop.eup %3091 }
0x1f9c   :  { %v3094_v53 = vpop.eup %3093  ;;  %2017 = vrot.lane.b32.xlu0 %v3092_v52, %s3204_s0 }
0x1f9d   :  { %2046 = vrot.lane.b32.xlu1 %v3094_v53, %s3204_s0  ;;  %v3096_v56 = vpop.eup %3095 }
0x1f9e   :  { %v3098_v21 = vpop.eup %3097  ;;  %v2012_v57 = vmul.f32 0.5, %v3096_v56 }
0x1f9f   :  { %v2041_v25 = vmul.f32 0.5, %v3098_v21 }
0x1fa0   :  { %v2013_v61 = vadd.f32 0.5, %v2012_v57 }
0x1fa1   :  { %v2042_v62 = vadd.f32 0.5, %v2041_v25 }
0x1fa2   :  { %v2015_v3 = vmul.f32 %v2013_v61, %v1892_v36 }
0x1fa3   :  { %v2044_v34 = vmul.f32 %v2042_v62, %v1921_v32 }
0x200e   :  { %v2018_v60 = vpop.permute.xlu0 %2017 }
0x200f   :  { %v2020_v13 = vmul.f32 %v2018_v60, %v2013_v61  ;;  %v2047_v63 = vpop.permute.xlu1 %2046 }
0x2010   :  { %v2049_v2 = vmul.f32 %v2047_v63, %v2042_v62 }
0x2011   :  { %2022 = vrot.lane.b32.xlu0 %v2020_v13, %s3204_s0 }
0x2012   :  { %2051 = vrot.lane.b32.xlu1 %v2049_v2, %s3204_s0 }
0x2083   :  { %v2023_v1 = vpop.permute.xlu0 %2022 }
0x2084   :  { %v2025_v7 = vadd.f32 %v2023_v1, %v2015_v3  ;;  %v2052_v12 = vpop.permute.xlu1 %2051 }
0x2085   :  { %v2054_v19 = vadd.f32 %v2052_v12, %v2044_v34 }
0x2086   :  { %3099 = vtanh.f32 %v2025_v7 }
0x2087   :  { %3101 = vtanh.f32 %v2054_v19 }
0x2090   :  { %v3100_v59 = vpop.eup %3099 }
0x2091   :  { %v3102_v58 = vpop.eup %3101  ;;  %2028 = vrot.lane.b32.xlu0 %v3100_v59, %s3204_s0 }
0x2092   :  { %2057 = vrot.lane.b32.xlu1 %v3102_v58, %s3204_s0 }
0x2103   :  { %v2029_v28 = vpop.permute.xlu0 %2028 }
0x2104   :  { %v2031_v14 = vmul.f32 %v2029_v28, %v2013_v61  ;;  %v2058_v23 = vpop.permute.xlu1 %2057 }
0x2105   :  { %v2060_v24 = vmul.f32 %v2058_v23, %v2042_v62 }
0x2106   :  { %2033 = vrot.lane.b32.xlu0 %v2031_v14, %s3205_s5 }
0x2107   :  { %2062 = vrot.lane.b32.xlu1 %v2060_v24, %s3206_s6 }
0x2178   :  { %v2034_v39 = vpop.permute.xlu0 %2033 }
0x2179   :  { %2650 = vst.msk [vmem:[%s3911_s4 + $0x18] sm:$0xff] %vm353_vm1, %v2034_v39  ;;  %v2063_v29 = vpop.permute.xlu1 %2062 }
0x217a   :  { %2651 = vst.msk [vmem:[%s3911_s4 + $0x20] sm:$0xff] %vm385_vm2, %v2063_v29  ;;  %v2066_v31 = vsel %vm353_vm1, %v2034_v39, %v2063_v29 }
0x217b   :  { %2652 = vmatmul.mubr.msk.f32.vlgmr.msra.gmra.mrb[40].mxu0 %vm81_vm0, %v2066_v31 }
0x217c   :  { %2922 = vmatpush1.bf16.msra.mxu0 %v3580_v4  ;;  %2400 = vmatprep.mubr.f32.mxu0 %v3203_v0 }
0x217d   :  { %2924 = vmatprep.subr.bf16.mxu0 %v3584_v11 }
0x2180   :  { %2926 = vmatpush1.bf16.msra.mxu0 %v3589_v18 }
0x2181   :  { %2928 = vmatprep.subr.bf16.mxu0 %v3592_v26 }
0x2184   :  { %2930 = vmatpush1.bf16.msra.mxu0 %v3594_v48 }
0x2185   :  { %2932 = vmatprep.subr.bf16.mxu0 %v3598_v42 }
0x2188   :  { %2934 = vmatpush1.bf16.msra.mxu0 %v3600_v45 }
0x224e   :  { %v2136_v35 = vpop.f32.mrb[40].mxu0 }
0x224f   :  { %v2142_v44 = vadd.f32 %v2136_v35, %v3698_v27  ;;  %v2138_v30 = vpop.f32.mrb[41].mxu0 }
0x2250   :  { %v2171_v36 = vadd.f32 %v2138_v30, %v3695_v20 }
0x2251   :  { %3103 = vtanh.f32 %v2142_v44  ;;  %v2143_v41 = vmul.f32 0.5, %v2142_v44 }
0x2252   :  { %3105 = vtanh.f32 %v2171_v36  ;;  %v2172_v9 = vmul.f32 0.5, %v2171_v36 }
0x2253   :  { %3107 = vtanh.f32 %v2143_v41 }
0x2254   :  { %3109 = vtanh.f32 %v2172_v9 }
0x225b   :  { %v3104_v38 = vpop.eup %3103 }
0x225c   :  { %v3106_v32 = vpop.eup %3105  ;;  %2150 = vrot.lane.b32.xlu0 %v3104_v38, %s3204_s0 }
0x225d   :  { %2179 = vrot.lane.b32.xlu1 %v3106_v32, %s3204_s0  ;;  %v3108_v43 = vpop.eup %3107 }
0x225e   :  { %v3110_v15 = vpop.eup %3109  ;;  %v2145_v46 = vmul.f32 0.5, %v3108_v43 }
0x225f   :  { %v2174_v10 = vmul.f32 0.5, %v3110_v15 }
0x2260   :  { %v2146_v27 = vadd.f32 0.5, %v2145_v46 }
0x2261   :  { %v2175_v49 = vadd.f32 0.5, %v2174_v10 }
0x2262   :  { %v2148_v37 = vmul.f32 %v2146_v27, %v2025_v7 }
0x2263   :  { %v2177_v51 = vmul.f32 %v2175_v49, %v2054_v19 }
0x22ce   :  { %v2151_v47 = vpop.permute.xlu0 %2150 }
0x22cf   :  { %v2153_v20 = vmul.f32 %v2151_v47, %v2146_v27  ;;  %v2180_v40 = vpop.permute.xlu1 %2179 }
0x22d0   :  { %v2182_v5 = vmul.f32 %v2180_v40, %v2175_v49 }
0x22d1   :  { %2155 = vrot.lane.b32.xlu0 %v2153_v20, %s3204_s0 }
0x22d2   :  { %2184 = vrot.lane.b32.xlu1 %v2182_v5, %s3204_s0 }
0x2343   :  { %v2156_v50 = vpop.permute.xlu0 %2155 }
0x2344   :  { %v2158_v52 = vadd.f32 %v2156_v50, %v2148_v37  ;;  %v2185_v53 = vpop.permute.xlu1 %2184 }
0x2345   :  { %v2187_v54 = vadd.f32 %v2185_v53, %v2177_v51 }
0x2346   :  { %3111 = vtanh.f32 %v2158_v52 }
0x2347   :  { %3113 = vtanh.f32 %v2187_v54 }
0x2350   :  { %v3112_v55 = vpop.eup %3111 }
0x2351   :  { %v3114_v56 = vpop.eup %3113  ;;  %2161 = vrot.lane.b32.xlu0 %v3112_v55, %s3204_s0 }
0x2352   :  { %2190 = vrot.lane.b32.xlu1 %v3114_v56, %s3204_s0 }
0x23c3   :  { %v2162_v21 = vpop.permute.xlu0 %2161 }
0x23c4   :  { %v2164_v57 = vmul.f32 %v2162_v21, %v2146_v27  ;;  %v2191_v25 = vpop.permute.xlu1 %2190 }
0x23c5   :  { %v2193_v61 = vmul.f32 %v2191_v25, %v2175_v49 }
0x23c6   :  { %2166 = vrot.lane.b32.xlu0 %v2164_v57, %s3205_s5 }
0x23c7   :  { %2195 = vrot.lane.b32.xlu1 %v2193_v61, %s3206_s6 }
0x2438   :  { %v2167_v60 = vpop.permute.xlu0 %2166 }
0x2439   :  { %2653 = vst.msk [vmem:[%s3911_s4 + $0x20] sm:$0xff] %vm353_vm1, %v2167_v60  ;;  %v2196_v62 = vpop.permute.xlu1 %2195 }
0x243a   :  { %2654 = vst.msk [vmem:[%s3911_s4 + $0x18] sm:$0xff] %vm385_vm2, %v2196_v62  ;;  %v2199_v13 = vsel %vm353_vm1, %v2167_v60, %v2196_v62 }
0x243b   :  { %2655 = vmatmul.mubr.msk.f32.vlgmr.msra.gmra.mrb[16].mxu1 %vm81_vm0, %v2199_v13 }
0x243c   :  { %2938 = vmatpush1.bf16.msra.mxu1 %v3580_v4  ;;  %2533 = vmatprep.mubr.f32.mxu1 %v3203_v0 }
0x243d   :  { %2940 = vmatprep.subr.bf16.mxu1 %v3584_v11 }
0x2440   :  { %2942 = vmatpush1.bf16.msra.mxu1 %v3589_v18 }
0x2441   :  { %2944 = vmatprep.subr.bf16.mxu1 %v3592_v26 }
0x2444   :  { %2946 = vmatpush1.bf16.msra.mxu1 %v3594_v48 }
0x2445   :  { %2948 = vmatprep.subr.bf16.mxu1 %v3598_v42 }
0x2448   :  { %2950 = vmatpush1.bf16.msra.mxu1 %v3600_v45 }
0x250e   :  { %v2269_v63 = vpop.f32.mrb[16].mxu1 }
0x250f   :  { %v2275_v2 = vadd.f32 %v2269_v63, %v3702_v22  ;;  %v2271_v3 = vpop.f32.mrb[17].mxu1 }
0x2510   :  { %v2304_v4 = vadd.f32 %v2271_v3, %v3691_v16 }
0x2511   :  { %3115 = vtanh.f32 %v2275_v2  ;;  %v2276_v18 = vmul.f32 0.5, %v2275_v2 }
0x2512   :  { %3117 = vtanh.f32 %v2304_v4  ;;  %v2305_v26 = vmul.f32 0.5, %v2304_v4 }
0x2513   :  { %3119 = vtanh.f32 %v2276_v18 }
0x2514   :  { %3121 = vtanh.f32 %v2305_v26 }
0x251b   :  { %v3116_v0 = vpop.eup %3115 }
0x251c   :  { %v3118_v11 = vpop.eup %3117  ;;  %2283 = vrot.lane.b32.xlu0 %v3116_v0, %s3204_s0 }
0x251d   :  { %2312 = vrot.lane.b32.xlu1 %v3118_v11, %s3204_s0  ;;  %v3120_v48 = vpop.eup %3119 }
0x251e   :  { %v3122_v42 = vpop.eup %3121  ;;  %v2278_v45 = vmul.f32 0.5, %v3120_v48 }
0x251f   :  { %v2307_v1 = vmul.f32 0.5, %v3122_v42 }
0x2520   :  { %v2279_v22 = vadd.f32 0.5, %v2278_v45 }
0x2521   :  { %v2308_v7 = vadd.f32 0.5, %v2307_v1 }
0x2522   :  { %v2281_v59 = vmul.f32 %v2279_v22, %v2158_v52 }
0x2523   :  { %v2310_v28 = vmul.f32 %v2308_v7, %v2187_v54 }
0x258e   :  { %v2284_v34 = vpop.permute.xlu0 %2283 }
0x258f   :  { %v2286_v16 = vmul.f32 %v2284_v34, %v2279_v22  ;;  %v2313_v12 = vpop.permute.xlu1 %2312 }
0x2590   :  { %v2315_v19 = vmul.f32 %v2313_v12, %v2308_v7 }
0x2591   :  { %2288 = vrot.lane.b32.xlu0 %v2286_v16, %s3204_s0 }
0x2592   :  { %2317 = vrot.lane.b32.xlu1 %v2315_v19, %s3204_s0 }
0x2603   :  { %v2289_v58 = vpop.permute.xlu0 %2288 }
0x2604   :  { %v2291_v14 = vadd.f32 %v2289_v58, %v2281_v59  ;;  %v2318_v23 = vpop.permute.xlu1 %2317 }
0x2605   :  { %v2320_v24 = vadd.f32 %v2318_v23, %v2310_v28 }
0x2606   :  { %3123 = vtanh.f32 %v2291_v14 }
0x2607   :  { %3125 = vtanh.f32 %v2320_v24 }
0x2610   :  { %v3124_v39 = vpop.eup %3123 }
0x2611   :  { %v3126_v29 = vpop.eup %3125  ;;  %2294 = vrot.lane.b32.xlu0 %v3124_v39, %s3204_s0 }
0x2612   :  { %2323 = vrot.lane.b32.xlu1 %v3126_v29, %s3204_s0 }
0x2683   :  { %v2295_v31 = vpop.permute.xlu0 %2294 }
0x2684   :  { %v2297_v35 = vmul.f32 %v2295_v31, %v2279_v22  ;;  %v2324_v44 = vpop.permute.xlu1 %2323 }
0x2685   :  { %v2326_v30 = vmul.f32 %v2324_v44, %v2308_v7 }
0x2686   :  { %2299 = vrot.lane.b32.xlu0 %v2297_v35, %s3205_s5 }
0x2687   :  { %2328 = vrot.lane.b32.xlu1 %v2326_v30, %s3206_s6 }
0x26f8   :  { %v2300_v36 = vpop.permute.xlu0 %2299 }
0x26f9   :  { %2656 = vst.msk [vmem:[%s3911_s4 + $0x28] sm:$0xff] %vm353_vm1, %v2300_v36  ;;  %v2329_v38 = vpop.permute.xlu1 %2328 }
0x26fa   :  { %2657 = vst.msk [vmem:[%s3911_s4 + $0x10] sm:$0xff] %vm385_vm2, %v2329_v38  ;;  %v2332_v32 = vsel %vm353_vm1, %v2300_v36, %v2329_v38 }
0x26fb   :  { %2658 = vmatmul.mubr.msk.f32.vlgmr.msra.gmra.mrb[42].mxu0 %vm81_vm0, %v2332_v32 }
0x27ce   :  { %v2402_v41 = vpop.f32.mrb[42].mxu0 }
0x27cf   :  { %v2408_v9 = vadd.f32 %v2402_v41, %v3706_v33  ;;  %v2404_v43 = vpop.f32.mrb[43].mxu0 }
0x27d0   :  { %v2437_v15 = vadd.f32 %v2404_v43, %v3687_v8 }
0x27d1   :  { %3127 = vtanh.f32 %v2408_v9  ;;  %v2409_v27 = vmul.f32 0.5, %v2408_v9 }
0x27d2   :  { %3129 = vtanh.f32 %v2437_v15  ;;  %v2438_v47 = vmul.f32 0.5, %v2437_v15 }
0x27d3   :  { %3131 = vtanh.f32 %v2409_v27 }
0x27d4   :  { %3133 = vtanh.f32 %v2438_v47 }
0x27db   :  { %v3128_v46 = vpop.eup %3127 }
0x27dc   :  { %v3130_v10 = vpop.eup %3129  ;;  %2416 = vrot.lane.b32.xlu0 %v3128_v46, %s3204_s0 }
0x27dd   :  { %2445 = vrot.lane.b32.xlu1 %v3130_v10, %s3204_s0  ;;  %v3132_v49 = vpop.eup %3131 }
0x27de   :  { %v3134_v20 = vpop.eup %3133  ;;  %v2411_v40 = vmul.f32 0.5, %v3132_v49 }
0x27df   :  { %v2440_v5 = vmul.f32 0.5, %v3134_v20 }
0x27e0   :  { %v2412_v33 = vadd.f32 0.5, %v2411_v40 }
0x27e1   :  { %v2441_v50 = vadd.f32 0.5, %v2440_v5 }
0x27e2   :  { %v2414_v53 = vmul.f32 %v2412_v33, %v2291_v14 }
0x27e3   :  { %v2443_v55 = vmul.f32 %v2441_v50, %v2320_v24 }
0x284e   :  { %v2417_v37 = vpop.permute.xlu0 %2416 }
0x284f   :  { %v2419_v8 = vmul.f32 %v2417_v37, %v2412_v33  ;;  %v2446_v51 = vpop.permute.xlu1 %2445 }
0x2850   :  { %v2448_v52 = vmul.f32 %v2446_v51, %v2441_v50 }
0x2851   :  { %2421 = vrot.lane.b32.xlu0 %v2419_v8, %s3204_s0 }
0x2852   :  { %2450 = vrot.lane.b32.xlu1 %v2448_v52, %s3204_s0 }
0x28c3   :  { %v2422_v54 = vpop.permute.xlu0 %2421 }
0x28c4   :  { %v2424_v56 = vadd.f32 %v2422_v54, %v2414_v53  ;;  %v2451_v21 = vpop.permute.xlu1 %2450 }
0x28c5   :  { %v2453_v57 = vadd.f32 %v2451_v21, %v2443_v55 }
0x28c6   :  { %3135 = vtanh.f32 %v2424_v56 }
0x28c7   :  { %3137 = vtanh.f32 %v2453_v57 }
0x28d0   :  { %v3136_v25 = vpop.eup %3135 }
0x28d1   :  { %v3138_v61 = vpop.eup %3137  ;;  %2427 = vrot.lane.b32.xlu0 %v3136_v25, %s3204_s0 }
0x28d2   :  { %2456 = vrot.lane.b32.xlu1 %v3138_v61, %s3204_s0 }
0x2943   :  { %v2428_v60 = vpop.permute.xlu0 %2427 }
0x2944   :  { %v2430_v62 = vmul.f32 %v2428_v60, %v2412_v33  ;;  %v2457_v13 = vpop.permute.xlu1 %2456 }
0x2945   :  { %v2459_v63 = vmul.f32 %v2457_v13, %v2441_v50 }
0x2946   :  { %2432 = vrot.lane.b32.xlu0 %v2430_v62, %s3205_s5 }
0x2947   :  { %2461 = vrot.lane.b32.xlu1 %v2459_v63, %s3206_s6 }
0x29b8   :  { %v2433_v2 = vpop.permute.xlu0 %2432 }
0x29b9   :  { %2659 = vst.msk [vmem:[%s3911_s4 + $0x30] sm:$0xff] %vm353_vm1, %v2433_v2  ;;  %v2462_v3 = vpop.permute.xlu1 %2461 }
0x29ba   :  { %2660 = vst.msk [vmem:[%s3911_s4 + $0x8] sm:$0xff] %vm385_vm2, %v2462_v3  ;;  %v2465_v4 = vsel %vm353_vm1, %v2433_v2, %v2462_v3 }
0x29bb   :  { %2661 = vmatmul.mubr.msk.f32.vlgmr.msra.gmra.mrb[18].mxu1 %vm81_vm0, %v2465_v4 }
0x2a8e   :  { %v2535_v0 = vpop.f32.mrb[18].mxu1 }
0x2a8f   :  { %v2541_v11 = vadd.f32 %v2535_v0, %v3708_v17  ;;  %v2537_v18 = vpop.f32.mrb[19].mxu1 }
0x2a90   :  { %v2570_v26 = vadd.f32 %v2537_v18, %v3683_v6 }
0x2a91   :  { %3139 = vtanh.f32 %v2541_v11  ;;  %v2542_v45 = vmul.f32 0.5, %v2541_v11 }
0x2a92   :  { %3141 = vtanh.f32 %v2570_v26  ;;  %v2571_v1 = vmul.f32 0.5, %v2570_v26 }
0x2a93   :  { %3143 = vtanh.f32 %v2542_v45 }
0x2a94   :  { %3145 = vtanh.f32 %v2571_v1 }
0x2a9b   :  { %v3140_v48 = vpop.eup %3139 }
0x2a9c   :  { %v3142_v42 = vpop.eup %3141  ;;  %2549 = vrot.lane.b32.xlu0 %v3140_v48, %s3204_s0 }
0x2a9d   :  { %2578 = vrot.lane.b32.xlu1 %v3142_v42, %s3204_s0  ;;  %v3144_v22 = vpop.eup %3143 }
0x2a9e   :  { %v3146_v34 = vpop.eup %3145  ;;  %v2544_v7 = vmul.f32 0.5, %v3144_v22 }
0x2a9f   :  { %v2573_v16 = vmul.f32 0.5, %v3146_v34 }
0x2aa0   :  { %v2545_v17 = vadd.f32 0.5, %v2544_v7 }
0x2aa1   :  { %v2574_v19 = vadd.f32 0.5, %v2573_v16 }
0x2aa2   :  { %v2547_v28 = vmul.f32 %v2545_v17, %v2424_v56 }
0x2aa3   :  { %v2576_v23 = vmul.f32 %v2574_v19, %v2453_v57 }
0x2b0e   :  { %v2550_v12 = vpop.permute.xlu0 %2549 }
0x2b0f   :  { %v2552_v6 = vmul.f32 %v2550_v12, %v2545_v17  ;;  %v2579_v59 = vpop.permute.xlu1 %2578 }
0x2b10   :  { %v2581_v58 = vmul.f32 %v2579_v59, %v2574_v19 }
0x2b11   :  { %2554 = vrot.lane.b32.xlu0 %v2552_v6, %s3204_s0 }
0x2b12   :  { %2583 = vrot.lane.b32.xlu1 %v2581_v58, %s3204_s0 }
0x2b83   :  { %v2555_v14 = vpop.permute.xlu0 %2554 }
0x2b84   :  { %v2557_v24 = vadd.f32 %v2555_v14, %v2547_v28  ;;  %v2584_v39 = vpop.permute.xlu1 %2583 }
0x2b85   :  { %v2586_v29 = vadd.f32 %v2584_v39, %v2576_v23 }
0x2b86   :  { %3147 = vtanh.f32 %v2557_v24 }
0x2b87   :  { %3149 = vtanh.f32 %v2586_v29 }
0x2b90   :  { %v3148_v31 = vpop.eup %3147 }
0x2b91   :  { %v3150_v35 = vpop.eup %3149  ;;  %2560 = vrot.lane.b32.xlu0 %v3148_v31, %s3204_s0 }
0x2b92   :  { %2589 = vrot.lane.b32.xlu1 %v3150_v35, %s3204_s0 }
0x2c03   :  { %v2561_v44 = vpop.permute.xlu0 %2560 }
0x2c04   :  { %v2563_v30 = vmul.f32 %v2561_v44, %v2545_v17  ;;  %v2590_v36 = vpop.permute.xlu1 %2589 }
0x2c05   :  { %v2592_v38 = vmul.f32 %v2590_v36, %v2574_v19 }
0x2c06   :  { %2565 = vrot.lane.b32.xlu0 %v2563_v30, %s3205_s5 }
0x2c07   :  { %2594 = vrot.lane.b32.xlu1 %v2592_v38, %s3206_s6 }
0x2c78   :  { %v2566_v32 = vpop.permute.xlu0 %2565 }
0x2c79   :  { %2662 = vst.msk [vmem:[%s3911_s4 + $0x38] sm:$0xff] %vm353_vm1, %v2566_v32  ;;  %v2595_v41 = vpop.permute.xlu1 %2594 }
0x2c7a   :  { %2597 = vst.msk [vmem:[%s3911_s4] sm:$0xff] %vm385_vm2, %v2595_v41 }
0x2c7b   :  { %2602 = vsyncpa [#allocation4], 1 }
0x2c7c   :  { %2603 = vsyncpa [#allocation6], 1 }

</bundles_post_ra>
